<compile_context>
chip_gen: v7x
topology: tpu7x:2x2x1
jax: 0.10.0
libtpu: 0.0.40
codegen_flags: <defaults>
</compile_context>

<pallas_src>
from functools import partial

import numpy as np
import jax
import jax.numpy as jnp
from jax.experimental import pallas as pl
from jax.experimental.pallas import tpu as pltpu


# ----------------------------------------------------------------------------
# Static bookkeeping (mirrors SplineBinaryEncoding.__init__, pure Python ints).
# ----------------------------------------------------------------------------
def make_spline_params(binwidths, window):
    binwidths = [int(b) for b in binwidths]
    wmin, wmax = int(window[0]), int(window[1])
    nbins = [(wmax - wmin) // bw + 1 for bw in binwidths]
    binshifts = [wmin // bw for bw in binwidths]          # python floor div == torch //
    bincumstarts = [0]
    for n in nbins[:-1]:
        bincumstarts.append(bincumstarts[-1] + n)
    return nbins, binshifts, bincumstarts


def _pad_weight_table(w, nbins, bincumstarts, d_pad, align=128):
    """Repack w so every per-binwidth slab starts on a 128-row boundary.

    Each slab reserves room for n+1 rows: row n ("carry" row) replicates the next
    row of the ORIGINAL contiguous table (clamped at the end), so the w[idx+1]
    read at a level's top bin matches torch's contiguous layout for arbitrary
    binwidth/window combinations. Remaining pad rows are zero and never receive
    hat weight. One-time parameter transformation (model-init cost).
    """
    N, D = w.shape
    slabs, rows, starts = [], [], []
    off = 0
    for n, cs in zip(nbins, bincumstarts):
        r = -(-(n + 1) // align) * align
        carry = w[min(cs + n, N - 1)][None, :]            # next slab's first row
        slab = jnp.concatenate(
            [w[cs:cs + n, :], carry, jnp.zeros((r - n - 1, D), w.dtype)], axis=0)
        slabs.append(slab)
        rows.append(r)
        starts.append(off)
        off += r
    w_pad = jnp.concatenate(slabs, axis=0)
    if d_pad != D:
        w_pad = jnp.pad(w_pad, ((0, 0), (0, d_pad - D)))
    return w_pad, rows, starts


# ----------------------------------------------------------------------------
# Kernel: one batch tile -> (TB, D_pad) spline embedding.
# ----------------------------------------------------------------------------
def _spline_kernel(coords_ref, w_ref, out_ref, a_ref, *, level_cfg, wmin, wmax):
    """
    coords_ref : (TB, C) int32       genomic coordinates
    w_ref      : (N_pad, D_pad)      weight table, slabs 128-row aligned (VMEM resident)
    out_ref    : (TB, D_pad) f32     sum over levels / coord dims of linear interpolation
    a_ref      : (TB, N_pad) scratch fused interpolation ("hat") matrix
    level_cfg  : static tuple of (binwidth, binshift, slab_start, slab_rows)
    """
    coords = coords_ref[...].astype(jnp.float32)                  # (TB, C)
    coords = jnp.clip(coords, float(wmin), float(wmax - 1))
    tb, n_coord = coords.shape

    # Build the fused interpolation matrix A, one 128-aligned column block per level.
    for bw, shift, start, rows in level_cfg:                      # static unroll (<=6)
        # x = idx + alpha as a single real number (no floor / int path needed).
        x = coords / bw - shift                                   # (TB, C)
        iota = jax.lax.broadcasted_iota(jnp.int32, (tb, rows), 1).astype(jnp.float32)
        hat = None
        for c in range(n_coord):                                  # C is tiny & static
            h = jnp.maximum(1.0 - jnp.abs(iota - x[:, c:c + 1]), 0.0)
            hat = h if hat is None else hat + h
        a_ref[:, start:start + rows] = hat.astype(a_ref.dtype)    # aligned static slice

    # Single MXU contraction, f32 accumulation, single output write.
    out_ref[...] = jnp.dot(a_ref[...], w_ref[...],
                           preferred_element_type=jnp.float32).astype(out_ref.dtype)


# ----------------------------------------------------------------------------
# Wrapper
# ----------------------------------------------------------------------------
def spline_binary_encoding(coordinates, w, *,
                           binwidths=(100, 200, 500, 1000, 2000, 5000),
                           window=(-100000, 100000),
                           block_b=256,
                           dot_dtype=jnp.bfloat16):
    """Pallas forward pass of SplineBinaryEncoding.

    coordinates : (B, C) int32 positions
    w           : (sum(nbins), D) float32 parameter table
    dot_dtype   : MXU operand dtype (bf16 default; jnp.float32 for exact math)
    returns     : (B, D) float32
    """
    B, C = coordinates.shape
    N, D = w.shape
    # f32 bin math is exact only for |coords| < 2^24 (coords are clamped to window).
    assert max(abs(int(window[0])), abs(int(window[1]))) < (1 << 24), \
        "window bounds must satisfy |w| < 2^24 (use window-relative coordinates)"

    nbins, binshifts, bincumstarts = make_spline_params(binwidths, window)
    assert N == sum(nbins), (w.shape, sum(nbins))

    d_pad = -(-D // 128) * 128                              # lane-dense output stores
    w_pad, slab_rows, slab_starts = _pad_weight_table(w, nbins, bincumstarts, d_pad)
    w_pad = w_pad.astype(dot_dtype)                         # cast once, outside kernel
    n_pad = w_pad.shape[0]

    level_cfg = tuple(
        (float(bw), float(sh), int(st), int(r))
        for bw, sh, st, r in zip(binwidths, binshifts, slab_starts, slab_rows))

    tb = min(block_b, B)
    assert tb == B or tb % 8 == 0, "batch tile must be a multiple of 8"
    grid = (pl.cdiv(B, tb),)

    kernel = partial(_spline_kernel, level_cfg=level_cfg,
                     wmin=int(window[0]), wmax=int(window[1]))

    out = pl.pallas_call(
        kernel,
        out_shape=jax.ShapeDtypeStruct((B, d_pad), jnp.float32),
        grid=grid,
        in_specs=[
            pl.BlockSpec((tb, C), lambda i: (i, 0)),          # coordinates: batch-tiled
            pl.BlockSpec((n_pad, d_pad), lambda i: (0, 0)),   # weight table, VMEM resident
        ],
        out_specs=pl.BlockSpec((tb, d_pad), lambda i: (i, 0)),  # lane-dense output rows
        scratch_shapes=[pltpu.VMEM((tb, n_pad), dot_dtype)],    # fused hat matrix A
        compiler_params=pltpu.CompilerParams(
            dimension_semantics=("parallel",)),               # >=2 steps -> both v7x TCs
    )(coordinates, w_pad)

    return out[:, :D] if d_pad != D else out


# ----------------------------------------------------------------------------
# Pure-JAX reference (mirrors the PyTorch forward exactly).
# ----------------------------------------------------------------------------
def spline_binary_encoding_ref(coordinates, w, *, binwidths, window):
    nbins, binshifts, bincumstarts = make_spline_params(binwidths, window)
    bw = jnp.asarray(binwidths, jnp.int32)[:, None, None]
    sh = jnp.asarray(binshifts, jnp.int32)[:, None, None]
    cs = jnp.asarray(bincumstarts, jnp.int32)[:, None, None]
    coords = jnp.clip(coordinates, window[0], window[1] - 1)        # (B, C) int32
    cumidxs = coords[None] // bw - sh + cs                           # (nb, B, C)
    alphas = (coords[None] % bw).astype(jnp.float32) / bw.astype(jnp.float32)
    w0 = w[cumidxs]                                                  # (nb, B, C, D)
    w1 = w[cumidxs + 1]
    contrib = w0 * (1.0 - alphas)[..., None] + w1 * alphas[..., None]
    return contrib.sum(axis=(0, 2))                                  # (B, D)


if __name__ == "__main__":
    # Small config consistent with the module: 4 binwidth levels, +-10 kb window,
    # D = 100 embedding dims (module default; padded to 128 lanes internally),
    # batch of 512 fragments with C = 2 cut-site coordinates each.
    # 512 rows / 256-row tiles -> 2 parallel grid steps.
    binwidths = (100, 200, 500, 1000)
    window = (-10000, 10000)
    D = 100
    B, C = 512, 2

    nbins, _, _ = make_spline_params(binwidths, window)
    N = sum(nbins)                                   # 201 + 101 + 41 + 21 = 364

    key = jax.random.PRNGKey(0)
    k_w, k_c = jax.random.split(key)
    # The module initializes w to zeros; use random weights so the check is meaningful.
    w = jax.random.normal(k_w, (N, D), jnp.float32) * 0.1
    coordinates = jax.random.randint(k_c, (B, C), window[0], window[1], dtype=jnp.int32)
    # Exercise clamping and exact bin boundaries.
    coordinates = coordinates.at[0, 0].set(window[0])
    coordinates = coordinates.at[0, 1].set(window[1] - 1)
    coordinates = coordinates.at[1, 0].set(window[1] + 1234)   # clamped down
    coordinates = coordinates.at[1, 1].set(window[0] - 987)    # clamped up
    coordinates = coordinates.at[2, 0].set(0)

    ref = spline_binary_encoding_ref(coordinates, w, binwidths=binwidths, window=window)

    # Exact-math path (f32 MXU operands).
    out_f32 = spline_binary_encoding(coordinates, w, binwidths=binwidths, window=window,
                                     block_b=256, dot_dtype=jnp.float32)
    out_f32 = jax.block_until_ready(out_f32)
    assert out_f32.shape == (B, D) and out_f32.dtype == jnp.float32
    np.testing.assert_allclose(np.asarray(out_f32), np.asarray(ref), rtol=1e-3, atol=1e-3)

    # Fast path (default): bf16 MXU operands, f32 accumulation.
    out_bf16 = spline_binary_encoding(coordinates, w, binwidths=binwidths, window=window,
                                      block_b=256)
    out_bf16 = jax.block_until_ready(out_bf16)
    assert out_bf16.shape == (B, D) and out_bf16.dtype == jnp.float32
    np.testing.assert_allclose(np.asarray(out_bf16), np.asarray(ref), rtol=2e-2, atol=2e-2)

    print("KERNEL_OK")
</pallas_src>

<mosaic_0001>
module attributes {stable_mosaic.version = 11 : i64} {
  func.func @_spline_kernel(%arg0: i32, %arg1: memref<256x2xi32, #tpu.memory_space<vmem>>, %arg2: memref<640x128xf32, #tpu.memory_space<vmem>>, %arg3: memref<256x128xf32, #tpu.memory_space<vmem>>, %arg4: memref<256x640xf32, #tpu.memory_space<vmem>>) attributes {dimension_semantics = [#tpu.dimension_semantics<parallel>], iteration_bounds = array<i64: 2>, scalar_prefetch = 0 : i64, scratch_operands = 1 : i64, tpu.core_type = #tpu.core_type<tc>, window_params = [{transform_indices = @transform_0, window_bounds = array<i64: 256, 2>}, {pipeline_mode = #tpu.pipeline_mode<synchronous>, transform_indices = @transform_1, window_bounds = array<i64: 640, 128>}, {transform_indices = @transform_2, window_bounds = array<i64: 256, 128>}]} {
    %c0 = arith.constant 0 : index
    %c0_0 = arith.constant 0 : index
    %0 = vector.load %arg1[%c0, %c0_0] : memref<256x2xi32, #tpu.memory_space<vmem>>, vector<256x2xi32>
    %1 = arith.sitofp %0 : vector<256x2xi32> to vector<256x2xf32>
    %cst = arith.constant -1.000000e+04 : f32
    %cst_1 = arith.constant 9.999000e+03 : f32
    %2 = vector.broadcast %cst : f32 to vector<256x2xf32>
    %3 = arith.maximumf %2, %1 : vector<256x2xf32>
    %4 = vector.broadcast %cst_1 : f32 to vector<256x2xf32>
    %5 = arith.minimumf %4, %3 : vector<256x2xf32>
    %cst_2 = arith.constant 1.000000e+02 : f32
    %6 = vector.broadcast %cst_2 : f32 to vector<256x2xf32>
    %7 = arith.divf %5, %6 : vector<256x2xf32>
    %cst_3 = arith.constant -1.000000e+02 : f32
    %8 = vector.broadcast %cst_3 : f32 to vector<256x2xf32>
    %9 = arith.subf %7, %8 : vector<256x2xf32>
    %10 = tpu.iota {dimensions = array<i32: 1>} : vector<256x256xi32>
    %11 = arith.sitofp %10 : vector<256x256xi32> to vector<256x256xf32>
    %12 = vector.extract_strided_slice %9 {offsets = [0, 0], sizes = [256, 1], strides = [1, 1]} : vector<256x2xf32> to vector<256x1xf32>
    %13 = vector.broadcast %12 : vector<256x1xf32> to vector<256x256xf32>
    %14 = arith.subf %11, %13 : vector<256x256xf32>
    %15 = math.absf %14 : vector<256x256xf32>
    %cst_4 = arith.constant 1.000000e+00 : f32
    %16 = vector.broadcast %cst_4 : f32 to vector<256x256xf32>
    %17 = arith.subf %16, %15 : vector<256x256xf32>
    %cst_5 = arith.constant 0.000000e+00 : f32
    %18 = vector.broadcast %cst_5 : f32 to vector<256x256xf32>
    %19 = arith.maximumf %17, %18 : vector<256x256xf32>
    %20 = vector.extract_strided_slice %9 {offsets = [0, 1], sizes = [256, 1], strides = [1, 1]} : vector<256x2xf32> to vector<256x1xf32>
    %21 = vector.broadcast %20 : vector<256x1xf32> to vector<256x256xf32>
    %22 = arith.subf %11, %21 : vector<256x256xf32>
    %23 = math.absf %22 : vector<256x256xf32>
    %cst_6 = arith.constant 1.000000e+00 : f32
    %24 = vector.broadcast %cst_6 : f32 to vector<256x256xf32>
    %25 = arith.subf %24, %23 : vector<256x256xf32>
    %cst_7 = arith.constant 0.000000e+00 : f32
    %26 = vector.broadcast %cst_7 : f32 to vector<256x256xf32>
    %27 = arith.maximumf %25, %26 : vector<256x256xf32>
    %28 = arith.addf %19, %27 : vector<256x256xf32>
    %c0_8 = arith.constant 0 : index
    %c0_9 = arith.constant 0 : index
    %29 = vector.load %arg4[%c0_8, %c0_9] : memref<256x640xf32, #tpu.memory_space<vmem>>, vector<256x256xf32>
    tpu.vector_store %arg4[%c0_8, %c0_9], %28 {strides = array<i32>} : memref<256x640xf32, #tpu.memory_space<vmem>>, vector<256x256xf32>,
    %cst_10 = arith.constant 2.000000e+02 : f32
    %30 = vector.broadcast %cst_10 : f32 to vector<256x2xf32>
    %31 = arith.divf %5, %30 : vector<256x2xf32>
    %cst_11 = arith.constant -5.000000e+01 : f32
    %32 = vector.broadcast %cst_11 : f32 to vector<256x2xf32>
    %33 = arith.subf %31, %32 : vector<256x2xf32>
    %34 = tpu.iota {dimensions = array<i32: 1>} : vector<256x128xi32>
    %35 = arith.sitofp %34 : vector<256x128xi32> to vector<256x128xf32>
    %36 = vector.extract_strided_slice %33 {offsets = [0, 0], sizes = [256, 1], strides = [1, 1]} : vector<256x2xf32> to vector<256x1xf32>
    %37 = vector.broadcast %36 : vector<256x1xf32> to vector<256x128xf32>
    %38 = arith.subf %35, %37 : vector<256x128xf32>
    %39 = math.absf %38 : vector<256x128xf32>
    %cst_12 = arith.constant 1.000000e+00 : f32
    %40 = vector.broadcast %cst_12 : f32 to vector<256x128xf32>
    %41 = arith.subf %40, %39 : vector<256x128xf32>
    %cst_13 = arith.constant 0.000000e+00 : f32
    %42 = vector.broadcast %cst_13 : f32 to vector<256x128xf32>
    %43 = arith.maximumf %41, %42 : vector<256x128xf32>
    %44 = vector.extract_strided_slice %33 {offsets = [0, 1], sizes = [256, 1], strides = [1, 1]} : vector<256x2xf32> to vector<256x1xf32>
    %45 = vector.broadcast %44 : vector<256x1xf32> to vector<256x128xf32>
    %46 = arith.subf %35, %45 : vector<256x128xf32>
    %47 = math.absf %46 : vector<256x128xf32>
    %cst_14 = arith.constant 1.000000e+00 : f32
    %48 = vector.broadcast %cst_14 : f32 to vector<256x128xf32>
    %49 = arith.subf %48, %47 : vector<256x128xf32>
    %cst_15 = arith.constant 0.000000e+00 : f32
    %50 = vector.broadcast %cst_15 : f32 to vector<256x128xf32>
    %51 = arith.maximumf %49, %50 : vector<256x128xf32>
    %52 = arith.addf %43, %51 : vector<256x128xf32>
    %c0_16 = arith.constant 0 : index
    %c256 = arith.constant 256 : index
    %53 = vector.load %arg4[%c0_16, %c256] : memref<256x640xf32, #tpu.memory_space<vmem>>, vector<256x128xf32>
    tpu.vector_store %arg4[%c0_16, %c256], %52 {strides = array<i32>} : memref<256x640xf32, #tpu.memory_space<vmem>>, vector<256x128xf32>,
    %cst_17 = arith.constant 5.000000e+02 : f32
    %54 = vector.broadcast %cst_17 : f32 to vector<256x2xf32>
    %55 = arith.divf %5, %54 : vector<256x2xf32>
    %cst_18 = arith.constant -2.000000e+01 : f32
    %56 = vector.broadcast %cst_18 : f32 to vector<256x2xf32>
    %57 = arith.subf %55, %56 : vector<256x2xf32>
    %58 = tpu.iota {dimensions = array<i32: 1>} : vector<256x128xi32>
    %59 = arith.sitofp %58 : vector<256x128xi32> to vector<256x128xf32>
    %60 = vector.extract_strided_slice %57 {offsets = [0, 0], sizes = [256, 1], strides = [1, 1]} : vector<256x2xf32> to vector<256x1xf32>
    %61 = vector.broadcast %60 : vector<256x1xf32> to vector<256x128xf32>
    %62 = arith.subf %59, %61 : vector<256x128xf32>
    %63 = math.absf %62 : vector<256x128xf32>
    %cst_19 = arith.constant 1.000000e+00 : f32
    %64 = vector.broadcast %cst_19 : f32 to vector<256x128xf32>
    %65 = arith.subf %64, %63 : vector<256x128xf32>
    %cst_20 = arith.constant 0.000000e+00 : f32
    %66 = vector.broadcast %cst_20 : f32 to vector<256x128xf32>
    %67 = arith.maximumf %65, %66 : vector<256x128xf32>
    %68 = vector.extract_strided_slice %57 {offsets = [0, 1], sizes = [256, 1], strides = [1, 1]} : vector<256x2xf32> to vector<256x1xf32>
    %69 = vector.broadcast %68 : vector<256x1xf32> to vector<256x128xf32>
    %70 = arith.subf %59, %69 : vector<256x128xf32>
    %71 = math.absf %70 : vector<256x128xf32>
    %cst_21 = arith.constant 1.000000e+00 : f32
    %72 = vector.broadcast %cst_21 : f32 to vector<256x128xf32>
    %73 = arith.subf %72, %71 : vector<256x128xf32>
    %cst_22 = arith.constant 0.000000e+00 : f32
    %74 = vector.broadcast %cst_22 : f32 to vector<256x128xf32>
    %75 = arith.maximumf %73, %74 : vector<256x128xf32>
    %76 = arith.addf %67, %75 : vector<256x128xf32>
    %c0_23 = arith.constant 0 : index
    %c384 = arith.constant 384 : index
    %77 = vector.load %arg4[%c0_23, %c384] : memref<256x640xf32, #tpu.memory_space<vmem>>, vector<256x128xf32>
    tpu.vector_store %arg4[%c0_23, %c384], %76 {strides = array<i32>} : memref<256x640xf32, #tpu.memory_space<vmem>>, vector<256x128xf32>,
    %cst_24 = arith.constant 1.000000e+03 : f32
    %78 = vector.broadcast %cst_24 : f32 to vector<256x2xf32>
    %79 = arith.divf %5, %78 : vector<256x2xf32>
    %cst_25 = arith.constant -1.000000e+01 : f32
    %80 = vector.broadcast %cst_25 : f32 to vector<256x2xf32>
    %81 = arith.subf %79, %80 : vector<256x2xf32>
    %82 = tpu.iota {dimensions = array<i32: 1>} : vector<256x128xi32>
    %83 = arith.sitofp %82 : vector<256x128xi32> to vector<256x128xf32>
    %84 = vector.extract_strided_slice %81 {offsets = [0, 0], sizes = [256, 1], strides = [1, 1]} : vector<256x2xf32> to vector<256x1xf32>
    %85 = vector.broadcast %84 : vector<256x1xf32> to vector<256x128xf32>
    %86 = arith.subf %83, %85 : vector<256x128xf32>
    %87 = math.absf %86 : vector<256x128xf32>
    %cst_26 = arith.constant 1.000000e+00 : f32
    %88 = vector.broadcast %cst_26 : f32 to vector<256x128xf32>
    %89 = arith.subf %88, %87 : vector<256x128xf32>
    %cst_27 = arith.constant 0.000000e+00 : f32
    %90 = vector.broadcast %cst_27 : f32 to vector<256x128xf32>
    %91 = arith.maximumf %89, %90 : vector<256x128xf32>
    %92 = vector.extract_strided_slice %81 {offsets = [0, 1], sizes = [256, 1], strides = [1, 1]} : vector<256x2xf32> to vector<256x1xf32>
    %93 = vector.broadcast %92 : vector<256x1xf32> to vector<256x128xf32>
    %94 = arith.subf %83, %93 : vector<256x128xf32>
    %95 = math.absf %94 : vector<256x128xf32>
    %cst_28 = arith.constant 1.000000e+00 : f32
    %96 = vector.broadcast %cst_28 : f32 to vector<256x128xf32>
    %97 = arith.subf %96, %95 : vector<256x128xf32>
    %cst_29 = arith.constant 0.000000e+00 : f32
    %98 = vector.broadcast %cst_29 : f32 to vector<256x128xf32>
    %99 = arith.maximumf %97, %98 : vector<256x128xf32>
    %100 = arith.addf %91, %99 : vector<256x128xf32>
    %c0_30 = arith.constant 0 : index
    %c512 = arith.constant 512 : index
    %101 = vector.load %arg4[%c0_30, %c512] : memref<256x640xf32, #tpu.memory_space<vmem>>, vector<256x128xf32>
    tpu.vector_store %arg4[%c0_30, %c512], %100 {strides = array<i32>} : memref<256x640xf32, #tpu.memory_space<vmem>>, vector<256x128xf32>,
    %c0_31 = arith.constant 0 : index
    %c0_32 = arith.constant 0 : index
    %102 = vector.load %arg4[%c0_31, %c0_32] : memref<256x640xf32, #tpu.memory_space<vmem>>, vector<256x640xf32>
    %c0_33 = arith.constant 0 : index
    %c0_34 = arith.constant 0 : index
    %103 = vector.load %arg2[%c0_33, %c0_34] : memref<640x128xf32, #tpu.memory_space<vmem>>, vector<640x128xf32>
    %cst_35 = arith.constant dense<0.000000e+00> : vector<256x128xf32>
    %104 = tpu.matmul %102, %103, %cst_35 {dimension_numbers = #tpu.dot_dimension_numbers<[1], [0], [0], [1], [0, 0, 1, 1], [], []>} : vector<256x640xf32>, vector<640x128xf32>, vector<256x128xf32> -> vector<256x128xf32>
    %c0_36 = arith.constant 0 : index
    %c0_37 = arith.constant 0 : index
    %105 = vector.load %arg3[%c0_36, %c0_37] : memref<256x128xf32, #tpu.memory_space<vmem>>, vector<256x128xf32>
    tpu.vector_store %arg3[%c0_36, %c0_37], %104 {strides = array<i32>} : memref<256x128xf32, #tpu.memory_space<vmem>>, vector<256x128xf32>,
    return
  }
  func.func @transform_0(%arg0: i32) -> (i32, i32) {
    %c0_i32 = arith.constant 0 : i32
    %c0_i32_0 = arith.constant 0 : i32
    return %arg0, %c0_i32 : i32, i32
  }
  func.func @transform_1(%arg0: i32) -> (i32, i32) {
    %c0_i32 = arith.constant 0 : i32
    %c0_i32_0 = arith.constant 0 : i32
    %c0_i32_1 = arith.constant 0 : i32
    return %c0_i32, %c0_i32_0 : i32, i32
  }
  func.func @transform_2(%arg0: i32) -> (i32, i32) {
    %c0_i32 = arith.constant 0 : i32
    %c0_i32_0 = arith.constant 0 : i32
    return %arg0, %c0_i32 : i32, i32
  }
}

</mosaic_0001>

<bundles_post_ra>
// kernel: tpu_custom_call.1
= control target key start
LH: loop header
LB: loop body
LE: loop exit
PB: predicated region body
PF: predicated region fallthrough
CT: control target
= control target key end

     0   :  { %7 = vsyncpa [#allocation4], 0  ;;  %s7312_s0 = inlined_call_operand.vmem [shape: s32[512,2], index: 0, kind: input, shape index: {}]   ;;  %s7313_s1 = inlined_call_operand.hbm [shape: f32[640,128], index: 1, kind: input, shape index: {}]   ;;  %s7314_s2 = inlined_call_operand.hbm [shape: f32[512,128], index: 2, kind: output, shape index: {}]  }
   0x1   :  { %8 = vsyncpa [#allocation5], 0 }
   0x2   :  { %10 = vsyncpa [#allocation5 + $0x1], 0  ;;  %s5013_s9 = smov 0   ;;  %s5015_s10 = smov 0  }
   0x3   :  { %s5017_s11 = smov 0   ;;  %s5019_s12 = smov 0  }
   0x4 LB: > { %s5034_s13 = sadd.s32 4294967295, %s4987_s12   ;;  %s4340_s14 = sadd.s32 4294967294, %s4987_s12   ;;  %s4987_s12 = sphi %s5019_s12, %s7873_s12   ;;  %s4983_s11 = sphi %s5017_s11, %s7872_s11   ;;  %s4979_s10 = sphi %s5015_s10, %s7871_s10   ;;  %s4975_s9 = sphi %s5013_s9, %s7870_s9  }
   0x5   : > { %s5038_s15 = sadd.s32 1, %s4987_s12   ;;  %s70_s16 = sadd.s32 1, %s4983_s11 }
   0x6   : > { %s67_s17 = ssub.s32 %s4987_s12, %s5038_s15  ;;  %p80_p0 = scmp.ne.s32.totalorder %s4983_s11, %s4979_s10 }
   0x7   : > { %p68_p1 = scmp.eq.s32.totalorder %s67_s17, 0  ;;  %p81_p2 = scmp.eq.s32.totalorder %s5034_s13, 1 }
   0x8   : > { %p86_p3 = scmp.ne.s32.totalorder %s4979_s10, %s4975_s9  ;;  %p87_p4 = scmp.eq.s32.totalorder %s4340_s14, 1 }
   0x9   : > { %s5049_s18 = scalar_select %p68_p1, %s4983_s11, %s70_s16  }
   0xa   : > { %p5051_p5 = por %p81_p2, %p80_p0  ;;  %p5055_p6 = por %p87_p4, %p86_p3 }
   0xb   : > { %p4341_p7 = scmp.ge.s32.totalorder %s4987_s12, 1  ;;  %p94_p8 = scmp.lt.s32.totalorder %s4987_s12, 3 }
   0xc   : > { %s7437_s19 = scalar_select %p5051_p5, 1, 0 }
   0xd   : > { %s7438_s20 = scalar_select %p5055_p6, 1, 0 }
   0xe   : > { %p7315_p9 = scmp.eq.s32.totalorder %s5034_s13, 0  ;;  %p5062_p10 = pnand %p4341_p7, %p94_p8 }
   0xf   : > { %s4989_s22 = smov [#allocation3]   ;;  %s4893_s27 = scalar_lea.hbm %s7313_s1, 10240 }
  0x10   : > { %s7439_s21 = scalar_select %p5062_p10, 1, 0 }
  0x11   : > { %s106_s23 = sshll.u32 %s4989_s22, 4  ;;  %p4817_p11 = pneg %p5062_p10  ;;  %s107_s23 = int_to_ptr.vmem [resolvable:$true] %s106_s23 }
  0x12   : > { %p4894_p13 = scmp.ne.s32.totalorder %s7313_s1, %s4893_s27  ;;  %p4900_p3 = scmp.lt.u32.totalorder %s4893_s27, %s7313_s1 }
  0x13   : > { %p5070_p12 = pnand %p7315_p9, %p4817_p11 }
  0x15   : > { %p4895_p0 = pneg %p5070_p12 }
  0x17   : > { %p4896_p1 = pnand %p4895_p0, %p4894_p13 }
  0x19   : > { %p4897_p2 = pneg %p4896_p1 }
  0x1b   : > { %p4902_p4 = pnand %p4900_p3, %p4897_p2 }
  0x1d   : > { %4905 = shalt.err (!%p4902_p4)
}
  0x1e   : > { %s4906_s4 = scalar_lea.vmem %s107_s23, 10240  ;;  %p4914_p9 = scmp.lt.s32.totalorder %s107_s23, %s107_s23 }
  0x1f   : > { %p4907_p7 = scmp.ne.s32.totalorder %s107_s23, %s4906_s4  ;;  %p4915_p6 = scmp.lt.s32.totalorder %s4906_s4, %s4906_s4 }
  0x21   : > { %p4909_p8 = pnand %p4907_p7, %p4895_p0  ;;  %p4916_p5 = por %p4915_p6, %p4914_p9 }
  0x23   : > { %p4910_p11 = pneg %p4909_p8 }
  0x25   : > { %p4917_p10 = pnand %p4916_p5, %p4910_p11 }
  0x27   : > { %4920 = shalt.err (!%p4917_p10)
}
  0x28   : > { %s4990_s5 = smov 128   ;;  %s4991_s6 = smov 8  }
  0x29   : > { %4820 = dma.hbm_to_vmem [thread:$0]  (!%p5070_p12), %s7313_s1, 10240, %s107_s23, [#allocation4], %s4990_s5, %s4990_s5, %s4991_s6  }
  0x2a   : > { %p7441_p13 = scmp.ne.s32.totalorder %s7439_s21, 0 }
  0x2c   : > { %131 = sbr.rel (%p7441_p13) target bundleno = 995 (0x3e3), region = 28 }
  0x33   : > { %p7442_p1 = scmp.eq.s32.totalorder %s5034_s13, 0 }
  0x35   : > { %4966 = dma.done.wait (%p7442_p1), [#allocation4], 10240   ;;  %p7443_p0 = pmov %p7442_p1 }
  0x36   : > { %s4347_s14 = sshll.u32 %s5034_s13, 5  ;;  %v7318_v0 = vmov 0   ;;  %s150_s23 = sand.u32 1, %s4979_s10  }
  0x37   : > { %4968 = vsyncadd (%p7443_p0), [#allocation4], 4294957056  ;;  %4869 = vset.pattern.permute.xlu1 %v7318_v0  ;;  %4868 = vset.pattern.permute.xlu0 %v7318_v0  ;;  %p154_p5 = scmp.lt.s32.totalorder %s4347_s14, 63  ;;  %s4346_s24 = sshll.u32 %s150_s23, 8 }
  0x38   : > { %s7199_s25 = scalar_lea.vmem [#allocation6], %s4346_s24  ;;  %s4482_s26 = sshll.u32 %s5034_s13, 12 }
  0x39   : > { %s7875_s14 = smov (!%p154_p5, %s4347_s14), 63  ;;  %s4266_s27 = sshll.u32 %s7199_s25, 4  ;;  %s7264_s27 = int_to_ptr.vmem [resolvable:$true] %s4266_s27 }
  0x3a   : > { %s4348_s16 = sshll.u32 %s7875_s14, 3  ;;  %s7262_s30 = scalar_lea.hbm %s7314_s2, %s4482_s26 }
  0x3b   : > { %s5102_s21 = scalar_lea.vmem %s7312_s0, %s4348_s16  ;;  %s7271_s13 = scalar_lea.sflag [#allocation5], %s150_s23 }
  0x3c   : > { %v162_v1 = vld [vmem:[%s5102_s21 + $0x10] sm:$0xff]  ;;  %v160_v2 = vld [vmem:[%s5102_s21] sm:$0xff]  ;;  %v163_v3 = vld [vmem:[%s5102_s21 + $0x18] sm:$0xff]  ;;  %s4921_s3 = scalar_lea.vmem %s7264_s27, 4096  ;;  %p7868_p9 = scmp.ne.s32.totalorder %s7437_s19, 0 }
  0x3d   : > { %v194_v4 = vcvt.s32.f32 %v162_v1  ;;  %v192_v5 = vcvt.s32.f32 %v160_v2  ;;  %v195_v6 = vcvt.s32.f32 %v163_v3  ;;  %v161_v7 = vld [vmem:[%s5102_s21 + $0x8] sm:$0xff]  ;;  %v164_v9 = vld [vmem:[%s5102_s21 + $0x20] sm:$0xff]  ;;  %v167_v13 = vld [vmem:[%s5102_s21 + $0x38] sm:$0xff]  ;;  %p4922_p6 = scmp.ne.s32.totalorder %s7264_s27, %s4921_s3  ;;  %s4995_s4 = smov [#allocation6]  }
  0x3e   : > { %v165_v8 = vld [vmem:[%s5102_s21 + $0x28] sm:$0xff]  ;;  %v193_v10 = vcvt.s32.f32 %v161_v7  ;;  %v196_v12 = vcvt.s32.f32 %v164_v9  ;;  %v166_v14 = vld [vmem:[%s5102_s21 + $0x30] sm:$0xff]  ;;  %v199_v22 = vcvt.s32.f32 %v167_v13  ;;  %v168_v23 = vld [vmem:[%s5102_s21 + $0x40] sm:$0xff]  ;;  %s4925_s5 = sshll.u32 %s4995_s4, 4  ;;  %s4926_s5 = int_to_ptr.vmem [resolvable:$false] %s4925_s5 }
  0x3f   : > { %v197_v11 = vcvt.s32.f32 %v165_v8  ;;  %v226_v15 = vmax.f32 %v194_v4, -10000.0  ;;  %v224_v16 = vmax.f32 %v192_v5, -10000.0  ;;  %v227_v17 = vmax.f32 %v195_v6, -10000.0  ;;  %v169_v18 = vld [vmem:[%s5102_s21 + $0x48] sm:$0xff]  ;;  %v171_v24 = vld [vmem:[%s5102_s21 + $0x58] sm:$0xff]  ;;  %v170_v29 = vld [vmem:[%s5102_s21 + $0x50] sm:$0xff]  ;;  %p4923_p10 = pnand %p4922_p6, %p7868_p9  ;;  %p4928_p2 = scmp.lt.s32.totalorder %s7264_s27, %s4926_s5 }
  0x40   : > { %v225_v19 = vmax.f32 %v193_v10, -10000.0  ;;  %v228_v21 = vmax.f32 %v196_v12, -10000.0  ;;  %v198_v28 = vcvt.s32.f32 %v166_v14  ;;  %v201_v33 = vcvt.s32.f32 %v169_v18  ;;  %v173_v48 = vld [vmem:[%s5102_s21 + $0x68] sm:$0xff]  ;;  %v172_v53 = vld [vmem:[%s5102_s21 + $0x60] sm:$0xff]  ;;  %v175_v62 = vld [vmem:[%s5102_s21 + $0x78] sm:$0xff]  ;;  %s4927_s6 = scalar_lea.vmem %s4926_s5, 8192 }
  0x41   : > { %v229_v20 = vmax.f32 %v197_v11, -10000.0  ;;  %v5115_v25 = vmin.f32 %v226_v15, 9999.0  ;;  %v5117_v26 = vmin.f32 %v224_v16, 9999.0  ;;  %v200_v37 = vcvt.s32.f32 %v168_v23  ;;  %v174_v63 = vld [vmem:[%s5102_s21 + $0x70] sm:$0xff]  ;;  %p4924_p12 = pneg %p4923_p10  ;;  %p4929_p3 = scmp.lt.s32.totalorder %s4927_s6, %s4921_s3 }
  0x42   : > { %v5119_v27 = vmin.f32 %v227_v17, 9999.0  ;;  %v5122_v30 = vmin.f32 %v225_v19, 9999.0  ;;  %v5126_v32 = vmin.f32 %v228_v21, 9999.0  ;;  %v203_v39 = vcvt.s32.f32 %v171_v24 }
  0x43   : > { %7444 = vst [vmem:[#allocation9_spill] sm:$0xff] %v5115_v25  ;;  %7445 = vst [vmem:[#allocation10_spill] sm:$0xff] %v5117_v26  ;;  %v5124_v31 = vmin.f32 %v229_v20, 9999.0  ;;  %v291_v34 = vmul.f32 0.01, %v5115_v25  ;;  %v202_v47 = vcvt.s32.f32 %v170_v29  ;;  %v205_v57 = vcvt.s32.f32 %v173_v48  ;;  %p4930_p4 = por %p4929_p3, %p4928_p2 }
  0x44   : > { %7446 = vst [vmem:[#allocation11_spill] sm:$0xff] %v5119_v27  ;;  %7447 = vst [vmem:[#allocation12_spill] sm:$0xff] %v5122_v30  ;;  %v289_v35 = vmul.f32 0.01, %v5117_v26  ;;  %v292_v36 = vmul.f32 0.01, %v5119_v27  ;;  %v204_v61 = vcvt.s32.f32 %v172_v53  ;;  %v207_v8 = vcvt.s32.f32 %v175_v62 }
  0x45   : > { %7448 = vst [vmem:[#allocation13_spill] sm:$0xff] %v5124_v31  ;;  %7449 = vst [vmem:[#allocation14_spill] sm:$0xff] %v5126_v32  ;;  %v290_v38 = vmul.f32 0.01, %v5122_v30  ;;  %v5132_v40 = vadd.f32 100.0, %v291_v34  ;;  %v231_v43 = vmax.f32 %v199_v22, -10000.0  ;;  %v206_v9 = vcvt.s32.f32 %v174_v63  ;;  %p4931_p7 = pnand %p4930_p4, %p4924_p12 }
  0x46   : > { %v5134_v41 = vadd.f32 100.0, %v289_v35  ;;  %v294_v42 = vmul.f32 0.01, %v5124_v31  ;;  %v5137_v44 = vadd.f32 100.0, %v292_v36  ;;  %v293_v45 = vmul.f32 0.01, %v5126_v32 }
  0x47   : > { %v230_v46 = vmax.f32 %v198_v28, -10000.0  ;;  %370 = vperm.xlu1 %4869, %v5132_v40   ;;  %v5143_v49 = vadd.f32 100.0, %v290_v38  ;;  %v5145_v50 = vmin.f32 %v231_v43, 9999.0  ;;  %v233_v51 = vmax.f32 %v201_v33, -10000.0  ;;  %v177_v10 = vld [vmem:[%s5102_s21 + $0x88] sm:$0xff] }
  0x48   : > { %360 = vperm.xlu0 %4868, %v5134_v41   ;;  %v232_v52 = vmax.f32 %v200_v37, -10000.0  ;;  %v5150_v55 = vadd.f32 100.0, %v294_v42  ;;  %v235_v56 = vmax.f32 %v203_v39, -10000.0  ;;  %v5152_v58 = vadd.f32 100.0, %v293_v45  ;;  %v176_v15 = vld [vmem:[%s5102_s21 + $0x80] sm:$0xff]  ;;  %v179_v22 = vld [vmem:[%s5102_s21 + $0x98] sm:$0xff] }
  0x49   : > { %7450 = vst [vmem:[#allocation15_spill] sm:$0xff] %v5145_v50  ;;  %v5148_v54 = vmin.f32 %v230_v46, 9999.0  ;;  %v296_v59 = vmul.f32 0.01, %v5145_v50  ;;  %v234_v60 = vmax.f32 %v202_v47, -10000.0  ;;  %v209_v21 = vcvt.s32.f32 %v177_v10 }
  0x4a   : > { %v5160_v2 = vmin.f32 %v233_v51, 9999.0  ;;  %v5162_v3 = vmin.f32 %v232_v52, 9999.0  ;;  %v5164_v4 = vmin.f32 %v235_v56, 9999.0  ;;  %v208_v29 = vcvt.s32.f32 %v176_v15 }
  0x4b   : > { %7451 = vst [vmem:[#allocation16_spill] sm:$0xff] %v5148_v54  ;;  %375 = vperm.xlu1 %4869, %v5137_v44   ;;  %v295_v1 = vmul.f32 0.01, %v5148_v54  ;;  %v237_v5 = vmax.f32 %v205_v57, -10000.0  ;;  %v5166_v6 = vmin.f32 %v234_v60, 9999.0  ;;  %v211_v35 = vcvt.s32.f32 %v179_v22 }
  0x4c   : > { %365 = vperm.xlu0 %4868, %v5143_v49   ;;  %7452 = vst [vmem:[#allocation17_spill] sm:$0xff] %v5160_v2  ;;  %7453 = vst [vmem:[#allocation18_spill] sm:$0xff] %v5162_v3  ;;  %v236_v7 = vmax.f32 %v204_v61, -10000.0  ;;  %v5171_v11 = vadd.f32 100.0, %v296_v59  ;;  %v298_v13 = vmul.f32 0.01, %v5160_v2 }
  0x4d   : > { %7454 = vst [vmem:[#allocation19_spill] sm:$0xff] %v5164_v4  ;;  %7455 = vst [vmem:[#allocation20_spill] sm:$0xff] %v5166_v6  ;;  %v5173_v12 = vadd.f32 100.0, %v295_v1  ;;  %v297_v14 = vmul.f32 0.01, %v5162_v3  ;;  %v239_v20 = vmax.f32 %v207_v8, -10000.0 }
  0x4e   : > { %v300_v16 = vmul.f32 0.01, %v5164_v4  ;;  %v5179_v17 = vmin.f32 %v237_v5, 9999.0  ;;  %v299_v18 = vmul.f32 0.01, %v5166_v6 }
  0x4f   : > { %385 = vperm.xlu1 %4869, %v5150_v55   ;;  %v5182_v19 = vmin.f32 %v236_v7, 9999.0  ;;  %v5187_v23 = vadd.f32 100.0, %v298_v13  ;;  %v5189_v24 = vadd.f32 100.0, %v297_v14  ;;  %v238_v28 = vmax.f32 %v206_v9, -10000.0  ;;  %v178_v33 = vld [vmem:[%s5102_s21 + $0x90] sm:$0xff] }
  0x50   : > { %380 = vperm.xlu0 %4868, %v5152_v58   ;;  %7456 = vst [vmem:[#allocation21_spill] sm:$0xff] %v5179_v17  ;;  %v302_v34 = vmul.f32 0.01, %v5179_v17  ;;  %v5194_v37 = vmin.f32 %v239_v20, 9999.0  ;;  %v241_v38 = vmax.f32 %v209_v21, -10000.0  ;;  %v210_v39 = vcvt.s32.f32 %v178_v33 }
  0x51   : > { %7457 = vst [vmem:[#allocation22_spill] sm:$0xff] %v5182_v19  ;;  %v301_v36 = vmul.f32 0.01, %v5182_v19  ;;  %v5198_v42 = vadd.f32 100.0, %v300_v16  ;;  %v5200_v43 = vadd.f32 100.0, %v299_v18  ;;  %v240_v46 = vmax.f32 %v208_v29, -10000.0 }
  0x52   : > { %7458 = vst [vmem:[#allocation23_spill] sm:$0xff] %v5194_v37  ;;  %v5202_v45 = vmin.f32 %v238_v28, 9999.0  ;;  %v181_v47 = vld [vmem:[%s5102_s21 + $0xa8] sm:$0xff]  ;;  %v180_v48 = vld [vmem:[%s5102_s21 + $0xa0] sm:$0xff]  ;;  %v5206_v51 = vadd.f32 100.0, %v302_v34 }
  0x53   : > { %395 = vperm.xlu1 %4869, %v5171_v11   ;;  %v243_v52 = vmax.f32 %v211_v35, -10000.0  ;;  %v183_v53 = vld [vmem:[%s5102_s21 + $0xb8] sm:$0xff]  ;;  %v5209_v56 = vadd.f32 100.0, %v301_v36  ;;  %v304_v57 = vmul.f32 0.01, %v5194_v37  ;;  %v242_v60 = vmax.f32 %v210_v39, -10000.0 }
  0x54   : > { %390 = vperm.xlu0 %4868, %v5173_v12   ;;  %7459 = vst [vmem:[#allocation24_spill] sm:$0xff] %v5202_v45  ;;  %v5212_v59 = vmin.f32 %v241_v38, 9999.0  ;;  %v303_v61 = vmul.f32 0.01, %v5202_v45  ;;  %v213_v63 = vcvt.s32.f32 %v181_v47  ;;  %v212_v1 = vcvt.s32.f32 %v180_v48  ;;  %v182_v5 = vld [vmem:[%s5102_s21 + $0xb0] sm:$0xff] }
  0x55   : > { %v5217_v62 = vmin.f32 %v240_v46, 9999.0  ;;  %v5220_v7 = vmin.f32 %v243_v52, 9999.0  ;;  %v215_v8 = vcvt.s32.f32 %v183_v53  ;;  %v5222_v9 = vadd.f32 100.0, %v304_v57  ;;  %v185_v21 = vld [vmem:[%s5102_s21 + $0xc8] sm:$0xff] }
  0x56   : > { %7460 = vst [vmem:[#allocation25_spill] sm:$0xff] %v5212_v59  ;;  %v306_v10 = vmul.f32 0.01, %v5212_v59  ;;  %v5225_v13 = vmin.f32 %v242_v60, 9999.0  ;;  %v214_v14 = vcvt.s32.f32 %v182_v5  ;;  %v5229_v15 = vadd.f32 100.0, %v303_v61 }
  0x57   : > { %405 = vperm.xlu1 %4869, %v5187_v23   ;;  %7461 = vst [vmem:[#allocation26_spill] sm:$0xff] %v5217_v62  ;;  %7462 = vst [vmem:[#allocation27_spill] sm:$0xff] %v5220_v7  ;;  %v305_v16 = vmul.f32 0.01, %v5217_v62  ;;  %v245_v18 = vmax.f32 %v213_v63, -10000.0  ;;  %v244_v20 = vmax.f32 %v212_v1, -10000.0  ;;  %v217_v36 = vcvt.s32.f32 %v185_v21 }
  0x58   : > { %400 = vperm.xlu0 %4868, %v5189_v24   ;;  %7463 = vst [vmem:[#allocation28_spill] sm:$0xff] %v5222_v9  ;;  %7464 = vst [vmem:[#allocation29_spill] sm:$0xff] %v5225_v13  ;;  %v184_v22 = vld [vmem:[%s5102_s21 + $0xc0] sm:$0xff]  ;;  %v308_v28 = vmul.f32 0.01, %v5220_v7  ;;  %v247_v29 = vmax.f32 %v215_v8, -10000.0 }
  0x59   : > { %v5235_v33 = vadd.f32 100.0, %v306_v10  ;;  %v307_v34 = vmul.f32 0.01, %v5225_v13  ;;  %v246_v35 = vmax.f32 %v214_v14, -10000.0  ;;  %v187_v38 = vld [vmem:[%s5102_s21 + $0xd8] sm:$0xff]  ;;  %v5241_v39 = vadd.f32 100.0, %v305_v16 }
  0x5a   : > { %v5243_v46 = vmin.f32 %v245_v18, 9999.0  ;;  %v5245_v47 = vmin.f32 %v244_v20, 9999.0  ;;  %v216_v48 = vcvt.s32.f32 %v184_v22  ;;  %v186_v52 = vld [vmem:[%s5102_s21 + $0xd0] sm:$0xff]  ;;  %v219_v57 = vcvt.s32.f32 %v187_v38  ;;  %v189_v5 = vld [vmem:[%s5102_s21 + $0xe8] sm:$0xff] }
  0x5b   : > { %415 = vperm.xlu1 %4869, %v5198_v42   ;;  %7465 = vst [vmem:[#allocation30_spill] sm:$0xff] %v5235_v33  ;;  %v5248_v53 = vmin.f32 %v247_v29, 9999.0  ;;  %v5250_v60 = vadd.f32 100.0, %v308_v28  ;;  %v5252_v61 = vmin.f32 %v246_v35, 9999.0  ;;  %v218_v1 = vcvt.s32.f32 %v186_v52 }
  0x5c   : > { %410 = vperm.xlu0 %4868, %v5200_v43   ;;  %7466 = vst [vmem:[#allocation31_spill] sm:$0xff] %v5243_v46  ;;  %7467 = vst [vmem:[#allocation32_spill] sm:$0xff] %v5245_v47  ;;  %v249_v63 = vmax.f32 %v217_v36, -10000.0  ;;  %v5257_v8 = vadd.f32 100.0, %v307_v34  ;;  %v310_v10 = vmul.f32 0.01, %v5243_v46  ;;  %v221_v35 = vcvt.s32.f32 %v189_v5 }
  0x5d   : > { %7468 = vst [vmem:[#allocation33_spill] sm:$0xff] %v5248_v53  ;;  %7469 = vst [vmem:[#allocation34_spill] sm:$0xff] %v5250_v60  ;;  %v309_v14 = vmul.f32 0.01, %v5245_v47  ;;  %v248_v16 = vmax.f32 %v216_v48, -10000.0  ;;  %v188_v18 = vld [vmem:[%s5102_s21 + $0xe0] sm:$0xff] }
  0x5e   : > { %7470 = vst [vmem:[#allocation35_spill] sm:$0xff] %v5252_v61  ;;  %v312_v20 = vmul.f32 0.01, %v5248_v53  ;;  %v251_v21 = vmax.f32 %v219_v57, -10000.0  ;;  %v311_v22 = vmul.f32 0.01, %v5252_v61  ;;  %v220_v48 = vcvt.s32.f32 %v188_v18 }
  0x5f   : > { %425 = vperm.xlu1 %4869, %v5206_v51   ;;  %v5264_v28 = vmin.f32 %v249_v63, 9999.0  ;;  %v250_v29 = vmax.f32 %v218_v1, -10000.0  ;;  %v5268_v34 = vadd.f32 100.0, %v310_v10  ;;  %v5270_v36 = vadd.f32 100.0, %v309_v14  ;;  %v191_v52 = vld [vmem:[%s5102_s21 + $0xf8] sm:$0xff] }
  0x60   : > { %420 = vperm.xlu0 %4868, %v5209_v56   ;;  %v5272_v38 = vmin.f32 %v248_v16, 9999.0  ;;  %v190_v0 = vld [vmem:[%s5102_s21 + $0xf0] sm:$0xff]  ;;  %v5276_v57 = vadd.f32 100.0, %v312_v20  ;;  %v5280_v63 = vadd.f32 100.0, %v311_v22  ;;  %v252_v14 = vmax.f32 %v220_v48, -10000.0 }
  0x61   : > { %7471 = vst [vmem:[#allocation36_spill] sm:$0xff] %v5264_v28  ;;  %7472 = vst [vmem:[#allocation37_spill] sm:$0xff] %v5268_v34  ;;  %v314_v1 = vmul.f32 0.01, %v5264_v28  ;;  %v5283_v5 = vmin.f32 %v250_v29, 9999.0  ;;  %v223_v16 = vcvt.s32.f32 %v191_v52  ;;  %v222_v18 = vcvt.s32.f32 %v190_v0 }
  0x62   : > { %7473 = vst [vmem:[#allocation38_spill] sm:$0xff] %v5272_v38  ;;  %7474 = vst [vmem:[#allocation39_spill] sm:$0xff] %v5276_v57  ;;  %v313_v10 = vmul.f32 0.01, %v5272_v38 }
  0x63   : > { %435 = vperm.xlu1 %4869, %v5222_v9   ;;  %7476 = vst [vmem:[#allocation41_spill] sm:$0xff] %v5283_v5  ;;  %v315_v22 = vmul.f32 0.01, %v5283_v5  ;;  %v254_v48 = vmax.f32 %v222_v18, -10000.0 }
  0x64   : > { %430 = vperm.xlu0 %4868, %v5229_v15   ;;  %v5296_v29 = vadd.f32 100.0, %v313_v10 }
  0x65   : > { %v5302_v0 = vadd.f32 100.0, %v315_v22  ;;  %v5310_v10 = vmin.f32 %v254_v48, 9999.0  ;;  %v1288_v48 = vmul.f32 0.005, %v5122_v30 }
  0x67   : > { %445 = vperm.xlu1 %4869, %v5235_v33   ;;  %v5278_v33 = vmin.f32 %v251_v21, 9999.0  ;;  %v5289_v21 = vadd.f32 100.0, %v314_v1  ;;  %7481 = vst [vmem:[#allocation46_spill] sm:$0xff] %v5310_v10 }
  0x68   : > { %440 = vperm.xlu0 %4868, %v5241_v39  }
  0x69   : > { %7475 = vst [vmem:[#allocation40_spill] sm:$0xff] %v5278_v33  ;;  %v316_v20 = vmul.f32 0.01, %v5278_v33 }
  0x6b   : > { %455 = vperm.xlu1 %4869, %v5250_v60   ;;  %v253_v60 = vmax.f32 %v221_v35, -10000.0  ;;  %v5298_v35 = vmin.f32 %v252_v14, 9999.0  ;;  %v5300_v52 = vadd.f32 100.0, %v316_v20  ;;  %v319_v20 = vmul.f32 0.01, %v5310_v10 }
  0x6c   : > { %450 = vperm.xlu0 %4868, %v5257_v8  }
  0x6d   : > { %v5292_v9 = vmin.f32 %v253_v60, 9999.0  ;;  %7478 = vst [vmem:[#allocation43_spill] sm:$0xff] %v5298_v35  ;;  %7479 = vst [vmem:[#allocation44_spill] sm:$0xff] %v5300_v52  ;;  %v317_v60 = vmul.f32 0.01, %v5298_v35 }
  0x6e   : > { %v5324_v22 = vadd.f32 100.0, %v319_v20 }
  0x6f   : > { %465 = vperm.xlu1 %4869, %v5268_v34   ;;  %7477 = vst [vmem:[#allocation42_spill] sm:$0xff] %v5292_v9  ;;  %v255_v34 = vmax.f32 %v223_v16, -10000.0  ;;  %v318_v1 = vmul.f32 0.01, %v5292_v9  ;;  %v5316_v16 = vadd.f32 100.0, %v317_v60 }
  0x70   : > { %460 = vperm.xlu0 %4868, %v5270_v36   ;;  %v1291_v60 = vmul.f32 0.005, %v5126_v32 }
  0x71   : > { %v5314_v14 = vadd.f32 100.0, %v318_v1  ;;  %v5329_v1 = vadd.f32 50.0, %v1288_v48  ;;  %v1295_v48 = vmul.f32 0.005, %v5162_v3 }
  0x73   : > { %475 = vperm.xlu1 %4869, %v5276_v57   ;;  %v5308_v57 = vmin.f32 %v255_v34, 9999.0  ;;  %7482 = vst [vmem:[#allocation47_spill] sm:$0xff] %v5314_v14 }
  0x74   : > { %470 = vperm.xlu0 %4868, %v5280_v63  }
  0x75   : > { %7480 = vst [vmem:[#allocation45_spill] sm:$0xff] %v5308_v57  ;;  %v320_v18 = vmul.f32 0.01, %v5308_v57 }
  0x77   : > { %485 = vperm.xlu1 %4869, %v5289_v21   ;;  %v5322_v34 = vadd.f32 100.0, %v320_v18  ;;  %v1293_v18 = vmul.f32 0.005, %v5148_v54 }
  0x78   : > { %480 = vperm.xlu0 %4868, %v5296_v29  }
  0x79   : > { %7483 = vst [vmem:[#allocation48_spill] sm:$0xff] %v5322_v34  ;;  %v5339_v20 = vadd.f32 50.0, %v1293_v18 }
  0x7b   : > { %495 = vperm.xlu1 %4869, %v5300_v52   ;;  %v7328_v52 = vmov 1  }
  0x7c   : > { %490 = vperm.xlu0 %4868, %v5302_v0  }
  0x7f   : > { %505 = vperm.xlu1 %4869, %v5314_v14   ;;  %v5334_v14 = vadd.f32 50.0, %v1291_v60 }
  0x80   : > { %500 = vperm.xlu0 %4868, %v5316_v16  }
  0x83   : > { %515 = vperm.xlu1 %4869, %v5322_v34   ;;  %v5344_v34 = vadd.f32 50.0, %v1295_v48 }
  0x84   : > { %510 = vperm.xlu0 %4868, %v5324_v22  }
  0x87   : > { %4870 = vset.pattern.permute.xlu1 %v7328_v52  ;;  %v1297_v52 = vmul.f32 0.005, %v5166_v6 }
  0x88   : > { %1358 = vperm.xlu0 %4868, %v5329_v1   ;;  %779 = vperm.xlu1 %4870, %v5143_v49   ;;  %v1299_v49 = vmul.f32 0.005, %v5182_v19 }
  0x89   : > { %v5349_v60 = vadd.f32 50.0, %v1297_v52 }
  0x8a   : > { %v5354_v18 = vadd.f32 50.0, %v1299_v49 }
  0x8c   : > { %1373 = vperm.xlu0 %4868, %v5334_v14   ;;  %783 = vperm.xlu1 %4870, %v5132_v40   ;;  %v1301_v40 = vmul.f32 0.005, %v5202_v45 }
  0x8e   : > { %v5359_v48 = vadd.f32 50.0, %v1301_v40 }
  0x90   : > { %1383 = vperm.xlu0 %4868, %v5339_v20   ;;  %791 = vperm.xlu1 %4870, %v5152_v58   ;;  %v1303_v58 = vmul.f32 0.005, %v5217_v62 }
  0x92   : > { %v5364_v52 = vadd.f32 50.0, %v1303_v58 }
  0x94   : > { %1393 = vperm.xlu0 %4868, %v5344_v34   ;;  %799 = vperm.xlu1 %4870, %v5173_v12   ;;  %v1305_v12 = vmul.f32 0.005, %v5225_v13 }
  0x96   : > { %v5369_v49 = vadd.f32 50.0, %v1305_v12 }
  0x98   : > { %1403 = vperm.xlu0 %4868, %v5349_v60   ;;  %807 = vperm.xlu1 %4870, %v5189_v24   ;;  %v1307_v24 = vmul.f32 0.005, %v5245_v47 }
  0x9a   : > { %v5374_v40 = vadd.f32 50.0, %v1307_v24 }
  0x9c   : > { %1413 = vperm.xlu0 %4868, %v5354_v18   ;;  %815 = vperm.xlu1 %4870, %v5200_v43   ;;  %v1309_v43 = vmul.f32 0.005, %v5252_v61  ;;  %v7490_v61 = vmov 0.0|0.0  }
  0x9e   : > { %v5379_v58 = vadd.f32 50.0, %v1309_v43 }
  0xa0   : > { %1423 = vperm.xlu0 %4868, %v5359_v48   ;;  %823 = vperm.xlu1 %4870, %v5209_v56   ;;  %v1311_v56 = vmul.f32 0.005, %v5272_v38 }
  0xa2   : > { %v5384_v12 = vadd.f32 50.0, %v1311_v56  ;;  %v3465_v56 = vld [vmem:[#allocation3] sm:$0xff] }
  0xa4   : > { %1433 = vperm.xlu0 %4868, %v5364_v52   ;;  %831 = vperm.xlu1 %4870, %v5229_v15   ;;  %v1313_v15 = vmul.f32 0.005, %v5283_v5  ;;  %v3466_v5 = vld [vmem:[#allocation3 + $0x8] sm:$0xff] }
  0xa5   : > { %v4612_v38 = vpack.c.bf16 %v3466_v5, %v3465_v56  ;;  %v1287_v5 = vmul.f32 0.005, %v5117_v26  ;;  %v1304_v26 = vmul.f32 0.005, %v5212_v59 }
  0xa6   : > { %v5389_v24 = vadd.f32 50.0, %v1313_v15  ;;  %v1961_v15 = vmul.f32 0.002, %v5122_v30 }
  0xa8   : > { %1443 = vperm.xlu0 %4868, %v5369_v49   ;;  %839 = vperm.xlu1 %4870, %v5241_v39   ;;  %v1315_v39 = vmul.f32 0.005, %v5298_v35  ;;  %v1966_v35 = vmul.f32 0.002, %v5148_v54 }
  0xaa   : > { %v5394_v43 = vadd.f32 50.0, %v1315_v39  ;;  %v3468_v39 = vld [vmem:[#allocation3 + $0x18] sm:$0xff] }
  0xac   : > { %1453 = vperm.xlu0 %4868, %v5374_v40   ;;  %847 = vperm.xlu1 %4870, %v5257_v8   ;;  %7484 = vst [vmem:[#allocation49_spill] sm:$0xff] %v5394_v43  ;;  %v1317_v8 = vmul.f32 0.005, %v5310_v10  ;;  %v5407_v10 = vadd.f32 20.0, %v1961_v15 }
  0xae   : > { %7486 = vst [vmem:[#allocation51_spill] sm:$0xff] %v5407_v10 }
  0xb0   : > { %1463 = vperm.xlu0 %4868, %v5379_v58   ;;  %855 = vperm.xlu1 %4870, %v5270_v36   ;;  %v5399_v36 = vadd.f32 50.0, %v1317_v8  ;;  %v1964_v8 = vmul.f32 0.002, %v5126_v32  ;;  %v5418_v32 = vadd.f32 50.0, %v1287_v5  ;;  %v7489_v5 = vmov 0  }
  0xb2   : > { %7485 = vst [vmem:[#allocation50_spill] sm:$0xff] %v5399_v36  ;;  %v5414_v56 = vadd.f32 20.0, %v1964_v8  ;;  %v5427_v8 = vadd.f32 20.0, %v1966_v35  ;;  %v3473_v35 = vld [vmem:[#allocation3 + $0x40] sm:$0xff] }
  0xb4   : > { %1473 = vperm.xlu0 %4868, %v5384_v12   ;;  %863 = vperm.xlu1 %4870, %v5280_v63   ;;  %v7342_v63 = vmov 0.0|0.0   ;;  %7487 = vst [vmem:[#allocation52_spill] sm:$0xff] %v5414_v56  ;;  %7488 = vst [vmem:[#allocation53_spill] sm:$0xff] %v5427_v8 }
  0xb5   : > { %4611 = vmatprep.subr.bf16.mxu0 %v7342_v63  ;;  %4739 = vmatprep.subr.bf16.mxu1 %v7342_v63 }
  0xb6   : > { %4613 = vmatpush1.bf16.msra.mxu0 %v4612_v38  ;;  %v3469_v38 = vld [vmem:[#allocation3 + $0x20] sm:$0xff] }
  0xb7   : > { %4614 = vmatprep.subr.bf16.mxu0 %v7342_v63 }
  0xb8   : > { %1483 = vperm.xlu0 %4868, %v5389_v24   ;;  %871 = vperm.xlu1 %4870, %v5296_v29   ;;  %v3467_v29 = vld [vmem:[#allocation3 + $0x10] sm:$0xff] }
  0xb9   : > { %v4615_v30 = vpack.c.bf16 %v3468_v39, %v3467_v29  ;;  %v3471_v39 = vld [vmem:[#allocation3 + $0x30] sm:$0xff] }
  0xbb   : > { %4616 = vmatpush1.bf16.msra.mxu0 %v4615_v30 }
  0xbc   : > { %1493 = vperm.xlu0 %4868, %v5394_v43   ;;  %879 = vperm.xlu1 %4870, %v5302_v0   ;;  %v3470_v0 = vld [vmem:[#allocation3 + $0x28] sm:$0xff] }
  0xbd   : > { %4617 = vmatprep.subr.bf16.mxu0 %v7342_v63  ;;  %v4618_v15 = vpack.c.bf16 %v3470_v0, %v3469_v38  ;;  %v1968_v38 = vmul.f32 0.002, %v5162_v3 }
  0xbf   : > { %4619 = vmatpush1.bf16.msra.mxu0 %v4618_v15  ;;  %v1290_v15 = vmul.f32 0.005, %v5119_v27  ;;  %v3478_v27 = vld [vmem:[#allocation3 + $0x68] sm:$0xff] }
  0xc0   : > { %1503 = vperm.xlu0 %4868, %v5399_v36   ;;  %887 = vperm.xlu1 %4870, %v5316_v16   ;;  %v1289_v16 = vmul.f32 0.005, %v5115_v25  ;;  %v1302_v25 = vmul.f32 0.005, %v5194_v37 }
  0xc1   : > { %4620 = vmatprep.subr.bf16.mxu0 %v7342_v63 }
  0xc2   : > { %v5432_v0 = vadd.f32 50.0, %v1289_v16  ;;  %v5445_v16 = vadd.f32 50.0, %v1290_v15 }
  0xc4   : > { %2031 = vperm.xlu0 %4868, %v5407_v10   ;;  %895 = vperm.xlu1 %4870, %v5324_v22   ;;  %v3472_v10 = vld [vmem:[#allocation3 + $0x38] sm:$0xff] }
  0xc5   : > { %v4621_v22 = vpack.c.bf16 %v3472_v10, %v3471_v39  ;;  %v5441_v10 = vadd.f32 20.0, %v1968_v38  ;;  %v1970_v39 = vmul.f32 0.002, %v5166_v6  ;;  %v1972_v38 = vmul.f32 0.002, %v5182_v19 }
  0xc6   : > { %v5421_v29 = vpop.permute.xlu1 %370  ;;  %v1974_v19 = vmul.f32 0.002, %v5202_v45 }
  0xc7   : > { %v5423_v30 = vpop.permute.xlu0 %360  ;;  %4622 = vmatpush1.bf16.msra.mxu0 %v4621_v22  ;;  %7491 = vst [vmem:[#allocation54_spill] sm:$0xff] %v5441_v10  ;;  %v1292_v22 = vmul.f32 0.005, %v5124_v31  ;;  %v5453_v62 = vadd.f32 20.0, %v1970_v39  ;;  %v5466_v39 = vadd.f32 20.0, %v1972_v38 }
  0xc8   : > { %2046 = vperm.xlu0 %4868, %v5414_v56   ;;  %4871 = vset.pattern.permute.xlu1 %v7489_v5  ;;  %v3474_v56 = vld [vmem:[#allocation3 + $0x48] sm:$0xff]  ;;  %v5479_v38 = vadd.f32 20.0, %v1974_v19  ;;  %v2654_v19 = vmul.f32 0.001, %v5243_v46 }
  0xc9   : > { %1353 = vperm.xlu1 %4871, %v5418_v32   ;;  %4623 = vmatprep.subr.bf16.mxu0 %v7490_v61  ;;  %v4624_v3 = vpack.c.bf16 %v3474_v56, %v3473_v35  ;;  %7492 = vst [vmem:[#allocation55_spill] sm:$0xff] %v5453_v62  ;;  %v3475_v56 = vld [vmem:[#allocation3 + $0x50] sm:$0xff]  ;;  %v3476_v35 = vld [vmem:[#allocation3 + $0x58] sm:$0xff]  ;;  %v5458_v15 = vadd.f32 50.0, %v1292_v22  ;;  %7493 = vst [vmem:[#allocation56_spill] sm:$0xff] %v5466_v39 }
  0xca   : > { %v5435_v54 = vpop.permute.xlu1 %375  ;;  %v4627_v6 = vpack.c.bf16 %v3476_v35, %v3475_v56  ;;  %v1296_v56 = vmul.f32 0.005, %v5160_v2  ;;  %7494 = vst [vmem:[#allocation57_spill] sm:$0xff] %v5479_v38 }
  0xcb   : > { %v5437_v63 = vpop.permute.xlu0 %365  ;;  %4625 = vmatpush1.bf16.msra.mxu0 %v4624_v3 }
  0xcc   : > { %2056 = vperm.xlu0 %4868, %v5427_v8   ;;  %4626 = vmatprep.subr.bf16.mxu0 %v7490_v61  ;;  %v1294_v8 = vmul.f32 0.005, %v5145_v50  ;;  %v5483_v45 = vadd.f32 50.0, %v1296_v56 }
  0xcd   : > { %1363 = vperm.xlu1 %4871, %v5432_v0  }
  0xce   : > { %v5448_v47 = vpop.permute.xlu1 %385  ;;  %v5471_v22 = vadd.f32 50.0, %v1294_v8  ;;  %v1298_v8 = vmul.f32 0.005, %v5164_v4  ;;  %v5504_v4 = vadd.f32 10.0, %v2654_v19  ;;  %v5520_v19 = vadd.f32 50.0, %v1302_v25 }
  0xcf   : > { %v5450_v13 = vpop.permute.xlu0 %380  ;;  %4628 = vmatpush1.bf16.msra.mxu0 %v4627_v6  ;;  %v2650_v6 = vmul.f32 0.001, %v5212_v59 }
  0xd0   : > { %2066 = vperm.xlu0 %4868, %v5441_v10   ;;  %v3477_v10 = vld [vmem:[#allocation3 + $0x60] sm:$0xff]  ;;  %4629 = vmatprep.subr.bf16.mxu0 %v7490_v61  ;;  %7496 = vst [vmem:[#allocation59_spill] sm:$0xff] %v5504_v4 }
  0xd1   : > { %1368 = vperm.xlu1 %4871, %v5445_v16  }
  0xd2   : > { %v5461_v31 = vpop.permute.xlu1 %395 }
  0xd3   : > { %v5463_v3 = vpop.permute.xlu0 %390 }
  0xd4   : > { %2076 = vperm.xlu0 %4868, %v5453_v62   ;;  %v4630_v62 = vpack.c.bf16 %v3478_v27, %v3477_v10  ;;  %v5492_v27 = vadd.f32 10.0, %v2650_v6  ;;  %v1300_v10 = vmul.f32 0.005, %v5179_v17 }
  0xd5   : > { %1378 = vperm.xlu1 %4871, %v5458_v15  }
  0xd6   : > { %v5474_v35 = vpop.permute.xlu1 %405  ;;  %4631 = vmatpush1.bf16.msra.mxu0 %v4630_v62  ;;  %7495 = vst [vmem:[#allocation58_spill] sm:$0xff] %v5492_v27  ;;  %v5496_v62 = vadd.f32 50.0, %v1298_v8  ;;  %v5508_v6 = vadd.f32 50.0, %v1300_v10 }
  0xd7   : > { %v5476_v50 = vpop.permute.xlu0 %400  ;;  %4632 = vmatprep.subr.bf16.mxu0 %v7490_v61 }
  0xd8   : > { %2086 = vperm.xlu0 %4868, %v5466_v39  }
  0xd9   : > { %1388 = vperm.xlu1 %4871, %v5471_v22  }
  0xda   : > { %v5487_v2 = vpop.permute.xlu1 %415 }
  0xdb   : > { %v5489_v5 = vpop.permute.xlu0 %410 }
  0xdc   : > { %2096 = vperm.xlu0 %4868, %v5479_v38   ;;  %v2658_v38 = vmul.f32 0.001, %v5264_v28 }
  0xdd   : > { %1398 = vperm.xlu1 %4871, %v5483_v45  }
  0xde   : > { %v5499_v56 = vpop.permute.xlu1 %425  ;;  %v5516_v17 = vadd.f32 10.0, %v2658_v38  ;;  %v5531_v38 = vadd.f32 50.0, %v1304_v26  ;;  %v7504_v26 = vmov 1  }
  0xdf   : > { %v5501_v39 = vpop.permute.xlu0 %420 }
  0xe0   : > { %2784 = vperm.xlu0 %4868, %v5492_v27   ;;  %7498 = vst [vmem:[#allocation61_spill] sm:$0xff] %v5516_v17  ;;  %v2662_v27 = vmul.f32 0.001, %v5292_v9 }
  0xe1   : > { %1408 = vperm.xlu1 %4871, %v5496_v62  }
  0xe2   : > { %v5511_v8 = vpop.permute.xlu1 %435  ;;  %v5528_v37 = vadd.f32 10.0, %v2662_v27 }
  0xe3   : > { %v5513_v36 = vpop.permute.xlu0 %430 }
  0xe4   : > { %7497 = vst [vmem:[#allocation60_spill] sm:$0xff] %v5513_v36  ;;  %2804 = vperm.xlu0 %4868, %v5504_v4   ;;  %7500 = vst [vmem:[#allocation63_spill] sm:$0xff] %v5528_v37  ;;  %v1306_v4 = vmul.f32 0.005, %v5220_v7 }
  0xe5   : > { %1418 = vperm.xlu1 %4871, %v5508_v6  }
  0xe6   : > { %v5523_v10 = vpop.permute.xlu1 %445  ;;  %v5540_v59 = vadd.f32 50.0, %v1306_v4 }
  0xe7   : > { %v5525_v43 = vpop.permute.xlu0 %440 }
  0xe8   : > { %7499 = vst [vmem:[#allocation62_spill] sm:$0xff] %v5525_v43  ;;  %2824 = vperm.xlu0 %4868, %v5516_v17   ;;  %v1308_v17 = vmul.f32 0.005, %v5243_v46 }
  0xe9   : > { %1428 = vperm.xlu1 %4871, %v5520_v19  }
  0xea   : > { %v5534_v36 = vpop.permute.xlu1 %455  ;;  %v5550_v7 = vadd.f32 50.0, %v1308_v17 }
  0xeb   : > { %v5536_v25 = vpop.permute.xlu0 %450 }
  0xec   : > { %7501 = vst [vmem:[#allocation64_spill] sm:$0xff] %v5536_v25  ;;  %2844 = vperm.xlu0 %4868, %v5528_v37   ;;  %v1310_v37 = vmul.f32 0.005, %v5248_v53  ;;  %v1314_v53 = vmul.f32 0.005, %v5278_v33 }
  0xed   : > { %1438 = vperm.xlu1 %4871, %v5531_v38   ;;  %v1318_v33 = vmul.f32 0.005, %v5308_v57  ;;  %v3480_v57 = vld [vmem:[#allocation3 + $0x78] sm:$0xff] }
  0xee   : > { %v5543_v27 = vpop.permute.xlu1 %465  ;;  %v5559_v46 = vadd.f32 50.0, %v1310_v37  ;;  %v5577_v37 = vadd.f32 50.0, %v1314_v53 }
  0xef   : > { %7502 = vst [vmem:[#allocation65_spill] sm:$0xff] %v5543_v27  ;;  %v5545_v43 = vpop.permute.xlu0 %460  ;;  %v5595_v53 = vadd.f32 50.0, %v1318_v33 }
  0xf0   : > { %7503 = vst [vmem:[#allocation66_spill] sm:$0xff] %v5545_v43  ;;  %4889 = vset.pattern.permute.xlu0 %v7504_v26  ;;  %v1312_v43 = vmul.f32 0.005, %v5264_v28  ;;  %v1316_v28 = vmul.f32 0.005, %v5292_v9 }
  0xf1   : > { %775 = vperm.xlu0 %4889, %v5134_v41   ;;  %1448 = vperm.xlu1 %4871, %v5540_v59   ;;  %7512 = vst [vmem:[#allocation74_spill] sm:$0xff] %v5595_v53 }
  0xf2   : > { %v5553_v25 = vpop.permute.xlu1 %475  ;;  %v5568_v17 = vadd.f32 50.0, %v1312_v43  ;;  %v5586_v43 = vadd.f32 50.0, %v1316_v28  ;;  %v3479_v28 = vld [vmem:[#allocation3 + $0x70] sm:$0xff] }
  0xf3   : > { %v5555_v4 = vpop.permute.xlu0 %470 }
  0xf4   : > { %7505 = vst [vmem:[#allocation67_spill] sm:$0xff] %v5555_v4 }
  0xf5   : > { %787 = vperm.xlu0 %4889, %v5137_v44   ;;  %1458 = vperm.xlu1 %4871, %v5550_v7  }
  0xf6   : > { %v5562_v27 = vpop.permute.xlu1 %485 }
  0xf7   : > { %v5564_v41 = vpop.permute.xlu0 %480 }
  0xf8   : > { %7506 = vst [vmem:[#allocation68_spill] sm:$0xff] %v5564_v41 }
  0xf9   : > { %795 = vperm.xlu0 %4889, %v5150_v55   ;;  %1468 = vperm.xlu1 %4871, %v5559_v46  }
  0xfa   : > { %v5571_v4 = vpop.permute.xlu1 %495 }
  0xfb   : > { %v5573_v44 = vpop.permute.xlu0 %490 }
  0xfc   : > { %7507 = vst [vmem:[#allocation69_spill] sm:$0xff] %v5573_v44 }
  0xfd   : > { %803 = vperm.xlu0 %4889, %v5171_v11   ;;  %1478 = vperm.xlu1 %4871, %v5568_v17  }
  0xfe   : > { %v5580_v41 = vpop.permute.xlu1 %505 }
  0xff   : > { %7508 = vst [vmem:[#allocation70_spill] sm:$0xff] %v5580_v41  ;;  %v5582_v55 = vpop.permute.xlu0 %500  ;;  %v3482_v41 = vld [vmem:[#allocation3 + $0x88] sm:$0xff] }
 0x100   : > { %7509 = vst [vmem:[#allocation71_spill] sm:$0xff] %v5582_v55 }
 0x101   : > { %811 = vperm.xlu0 %4889, %v5187_v23   ;;  %1488 = vperm.xlu1 %4871, %v5577_v37  }
 0x102   : > { %v5589_v44 = vpop.permute.xlu1 %515 }
 0x103   : > { %7510 = vst [vmem:[#allocation72_spill] sm:$0xff] %v5589_v44  ;;  %v5591_v11 = vpop.permute.xlu0 %510 }
 0x104   : > { %7511 = vst [vmem:[#allocation73_spill] sm:$0xff] %v5591_v11  ;;  %v7516_v11 = vld [vmem:[#allocation28_spill] sm:$0xff] }
 0x105   : > { %819 = vperm.xlu0 %4889, %v5198_v42   ;;  %1498 = vperm.xlu1 %4871, %v5586_v43   ;;  %v4633_v42 = vpack.c.bf16 %v3480_v57, %v3479_v28  ;;  %v7521_v28 = vld [vmem:[#allocation34_spill] sm:$0xff] }
 0x107   : > { %v5597_v9 = vpop.permute.xlu0 %1358  ;;  %v5599_v55 = vpop.permute.xlu1 %779  ;;  %4634 = vmatpush1.bf16.msra.mxu0 %v4633_v42 }
 0x108   : > { %7513 = vst [vmem:[#allocation75_spill] sm:$0xff] %v5597_v9  ;;  %4635 = vmatprep.subr.bf16.mxu0 %v7490_v61 }
 0x109   : > { %827 = vperm.xlu0 %4889, %v5206_v51   ;;  %1508 = vperm.xlu1 %4871, %v5595_v53   ;;  %v7519_v51 = vld [vmem:[#allocation30_spill] sm:$0xff] }
 0x10b   : > { %v5603_v23 = vpop.permute.xlu0 %1373  ;;  %v5605_v44 = vpop.permute.xlu1 %783 }
 0x10c   : > { %7514 = vst [vmem:[#allocation76_spill] sm:$0xff] %v5603_v23  ;;  %7515 = vst [vmem:[#allocation77_spill] sm:$0xff] %v5605_v44  ;;  %v3481_v23 = vld [vmem:[#allocation3 + $0x80] sm:$0xff] }
 0x10d   : > { %835 = vperm.xlu0 %4889, %v7516_v11   ;;  %4872 = vset.pattern.permute.xlu1 %v7504_v26  ;;  %v3483_v11 = vld [vmem:[#allocation3 + $0x90] sm:$0xff]  ;;  %v3484_v26 = vld [vmem:[#allocation3 + $0x98] sm:$0xff] }
 0x10e   : > { %1644 = vperm.xlu1 %4872, %v5329_v1   ;;  %v4636_v1 = vpack.c.bf16 %v3482_v41, %v3481_v23 }
 0x10f   : > { %v5610_v33 = vpop.permute.xlu0 %1383  ;;  %v5612_v9 = vpop.permute.xlu1 %791 }
 0x110   : > { %7517 = vst [vmem:[#allocation28_spill] sm:$0xff] %v5610_v33  ;;  %7518 = vst [vmem:[#allocation78_spill] sm:$0xff] %v5612_v9  ;;  %4637 = vmatpush1.bf16.msra.mxu0 %v4636_v1  ;;  %v4639_v33 = vpack.c.bf16 %v3484_v26, %v3483_v11  ;;  %v3486_v9 = vld [vmem:[#allocation3 + $0xa8] sm:$0xff]  ;;  %v3487_v26 = vld [vmem:[#allocation3 + $0xb0] sm:$0xff]  ;;  %v353_v1 = vlaneseq }
 0x111   : > { %843 = vperm.xlu0 %4889, %v7519_v51   ;;  %4638 = vmatprep.subr.bf16.mxu0 %v7490_v61  ;;  %v3485_v51 = vld [vmem:[#allocation3 + $0xa0] sm:$0xff]  ;;  %v7526_v11 = vld [vmem:[#allocation39_spill] sm:$0xff] }
 0x112   : > { %1648 = vperm.xlu1 %4872, %v5432_v0   ;;  %v4642_v53 = vpack.c.bf16 %v3486_v9, %v3485_v51  ;;  %v3489_v9 = vld [vmem:[#allocation3 + $0xc0] sm:$0xff]  ;;  %v354_v51 = vand.u32 127, %v353_v1  ;;  %v3494_v1 = vld [vmem:[#allocation3 + $0xe8] sm:$0xff] }
 0x113   : > { %v5617_v44 = vpop.permute.xlu0 %1393  ;;  %v5619_v57 = vpop.permute.xlu1 %799 }
 0x114   : > { %7520 = vst [vmem:[#allocation30_spill] sm:$0xff] %v5617_v44  ;;  %v7523_v44 = vld [vmem:[#allocation37_spill] sm:$0xff]  ;;  %4640 = vmatpush1.bf16.msra.mxu0 %v4639_v33 }
 0x115   : > { %851 = vperm.xlu0 %4889, %v7521_v28   ;;  %4641 = vmatprep.subr.bf16.mxu0 %v7490_v61 }
 0x116   : > { %1656 = vperm.xlu1 %4872, %v5334_v14   ;;  %v3488_v14 = vld [vmem:[#allocation3 + $0xb8] sm:$0xff] }
 0x117   : > { %v5623_v42 = vpop.permute.xlu0 %1403  ;;  %v5626_v0 = vpop.permute.xlu1 %807  ;;  %v4645_v28 = vpack.c.bf16 %v3488_v14, %v3487_v26  ;;  %v7531_v14 = vld [vmem:[#allocation44_spill] sm:$0xff] }
 0x118   : > { %7522 = vst [vmem:[#allocation34_spill] sm:$0xff] %v5623_v42  ;;  %4643 = vmatpush1.bf16.msra.mxu0 %v4642_v53  ;;  %v3492_v53 = vld [vmem:[#allocation3 + $0xd8] sm:$0xff] }
 0x119   : > { %859 = vperm.xlu0 %4889, %v7523_v44   ;;  %4644 = vmatprep.subr.bf16.mxu0 %v7490_v61 }
 0x11a   : > { %1664 = vperm.xlu1 %4872, %v5339_v20   ;;  %v3490_v20 = vld [vmem:[#allocation3 + $0xc8] sm:$0xff] }
 0x11b   : > { %v5630_v41 = vpop.permute.xlu0 %1413  ;;  %v5633_v23 = vpop.permute.xlu1 %815 }
 0x11c   : > { %7524 = vst [vmem:[#allocation37_spill] sm:$0xff] %v5630_v41  ;;  %7525 = vst [vmem:[#allocation79_spill] sm:$0xff] %v5633_v23  ;;  %4646 = vmatpush1.bf16.msra.mxu0 %v4645_v28  ;;  %v4648_v41 = vpack.c.bf16 %v3490_v20, %v3489_v9  ;;  %v5654_v28 = vcvt.s32.f32 %v354_v51  ;;  %v7534_v20 = vld [vmem:[#allocation47_spill] sm:$0xff] }
 0x11d   : > { %867 = vperm.xlu0 %4889, %v7526_v11   ;;  %4647 = vmatprep.subr.bf16.mxu0 %v7490_v61 }
 0x11e   : > { %1672 = vperm.xlu1 %4872, %v5344_v34   ;;  %v3491_v34 = vld [vmem:[#allocation3 + $0xd0] sm:$0xff] }
 0x11f   : > { %v5637_v44 = vpop.permute.xlu0 %1423  ;;  %v5640_v33 = vpop.permute.xlu1 %823  ;;  %v4651_v42 = vpack.c.bf16 %v3492_v53, %v3491_v34  ;;  %v3496_v34 = vld [vmem:[#allocation3 + $0xf8] sm:$0xff] }
 0x120   : > { %7527 = vst [vmem:[#allocation39_spill] sm:$0xff] %v5637_v44  ;;  %7528 = vst [vmem:[#allocation80_spill] sm:$0xff] %v5640_v33  ;;  %v355_v44 = vadd.s32 128, %v354_v51  ;;  %4649 = vmatpush1.bf16.msra.mxu0 %v4648_v41  ;;  %v522_v51 = vsub.f32 %v5654_v28, %v5421_v29 }
 0x121   : > { %875 = vperm.xlu0 %4889, %v5289_v21   ;;  %4650 = vmatprep.subr.bf16.mxu0 %v7490_v61 }
 0x122   : > { %1680 = vperm.xlu1 %4872, %v5349_v60   ;;  %v3493_v60 = vld [vmem:[#allocation3 + $0xe0] sm:$0xff] }
 0x123   : > { %v5644_v11 = vpop.permute.xlu0 %1433  ;;  %v5647_v26 = vpop.permute.xlu1 %831 }
 0x124   : > { %7529 = vst [vmem:[#allocation81_spill] sm:$0xff] %v5644_v11  ;;  %7530 = vst [vmem:[#allocation82_spill] sm:$0xff] %v5647_v26  ;;  %v5659_v11 = vcvt.s32.f32 %v355_v44  ;;  %4652 = vmatpush1.bf16.msra.mxu0 %v4651_v42 }
 0x125   : > { %883 = vperm.xlu0 %4889, %v7531_v14   ;;  %v4654_v14 = vpack.c.bf16 %v3494_v1, %v3493_v60  ;;  %4653 = vmatprep.subr.bf16.mxu0 %v7490_v61  ;;  %v586_v60 = vand.u32 2147483647, %v522_v51  ;;  %v518_v1 = vsub.f32 %v5654_v28, %v5423_v30  ;;  %v528_v51 = vsub.f32 %v5654_v28, %v5448_v47 }
 0x126   : > { %1688 = vperm.xlu1 %4872, %v5354_v18   ;;  %v3495_v18 = vld [vmem:[#allocation3 + $0xf0] sm:$0xff]  ;;  %v523_v44 = vsub.f32 %v5659_v11, %v5421_v29  ;;  %v525_v29 = vsub.f32 %v5659_v11, %v5435_v54 }
 0x127   : > { %v5651_v21 = vpop.permute.xlu0 %1443  ;;  %v5656_v9 = vpop.permute.xlu1 %839  ;;  %v4657_v42 = vpack.c.bf16 %v3496_v34, %v3495_v18  ;;  %v521_v18 = vsub.f32 %v5659_v11, %v5437_v63  ;;  %v519_v34 = vsub.f32 %v5659_v11, %v5423_v30  ;;  %v527_v30 = vsub.f32 %v5659_v11, %v5450_v13 }
 0x128   : > { %7532 = vst [vmem:[#allocation44_spill] sm:$0xff] %v5651_v21  ;;  %7533 = vst [vmem:[#allocation83_spill] sm:$0xff] %v5656_v9  ;;  %v7537_v21 = vld [vmem:[#allocation48_spill] sm:$0xff]  ;;  %4655 = vmatpush1.bf16.msra.mxu0 %v4654_v14  ;;  %v520_v14 = vsub.f32 %v5654_v28, %v5437_v63  ;;  %v650_v63 = vsub.f32 1.0, %v586_v60 }
 0x129   : > { %891 = vperm.xlu0 %4889, %v7534_v20   ;;  %4656 = vmatprep.subr.bf16.mxu0 %v7490_v61  ;;  %v585_v9 = vand.u32 2147483647, %v521_v18  ;;  %v5710_v60 = vand.u32 2147483647, %v519_v34  ;;  %v531_v18 = vsub.f32 %v5659_v11, %v5463_v3 }
 0x12a   : > { %1696 = vperm.xlu1 %4872, %v5359_v48  }
 0x12b   : > { %v5662_v41 = vpop.permute.xlu0 %1453  ;;  %v5667_v53 = vpop.permute.xlu1 %847 }
 0x12c   : > { %7535 = vst [vmem:[#allocation47_spill] sm:$0xff] %v5662_v41  ;;  %7536 = vst [vmem:[#allocation84_spill] sm:$0xff] %v5667_v53  ;;  %4658 = vmatpush1.bf16.msra.mxu0 %v4657_v42  ;;  %v589_v41 = vand.u32 2147483647, %v525_v29  ;;  %v584_v53 = vand.u32 2147483647, %v520_v14 }
 0x12d   : > { %899 = vperm.xlu0 %4889, %v7537_v21   ;;  %v524_v21 = vsub.f32 %v5654_v28, %v5435_v54  ;;  %v526_v54 = vsub.f32 %v5654_v28, %v5450_v13  ;;  %4659 = vmatprep.subr.bf16.mxu0 %v7490_v61  ;;  %v5717_v14 = vmax.f32 %v650_v63, 0.0  ;;  %v536_v63 = vsub.f32 %v5654_v28, %v5474_v35 }
 0x12e   : > { %1704 = vperm.xlu1 %4872, %v5364_v52   ;;  %v587_v52 = vand.u32 2147483647, %v523_v44  ;;  %v582_v44 = vand.u32 2147483647, %v518_v1  ;;  %v592_v1 = vand.u32 2147483647, %v528_v51 }
 0x12f   : > { %v5673_v48 = vpop.permute.xlu0 %1463  ;;  %v5678_v20 = vpop.permute.xlu1 %855  ;;  %v590_v13 = vand.u32 2147483647, %v526_v54  ;;  %v653_v51 = vsub.f32 1.0, %v589_v41 }
 0x130   : > { %7538 = vst [vmem:[#allocation48_spill] sm:$0xff] %v5673_v48  ;;  %7539 = vst [vmem:[#allocation85_spill] sm:$0xff] %v5678_v20  ;;  %v529_v20 = vsub.f32 %v5659_v11, %v5448_v47  ;;  %v588_v48 = vand.u32 2147483647, %v524_v21  ;;  %v532_v47 = vsub.f32 %v5654_v28, %v5461_v31  ;;  %v530_v21 = vsub.f32 %v5654_v28, %v5463_v3 }
 0x131   : > { %1640 = vperm.xlu0 %4889, %v5418_v32  }
 0x132   : > { %1712 = vperm.xlu1 %4872, %v5369_v49   ;;  %v651_v49 = vsub.f32 1.0, %v587_v52  ;;  %v593_v26 = vand.u32 2147483647, %v529_v20  ;;  %v591_v52 = vand.u32 2147483647, %v527_v30  ;;  %v652_v34 = vsub.f32 1.0, %v588_v48 }
 0x133   : > { %v5698_v32 = vpop.permute.xlu0 %1473  ;;  %v5703_v42 = vpop.permute.xlu1 %863  ;;  %v648_v20 = vsub.f32 1.0, %v584_v53  ;;  %v596_v54 = vand.u32 2147483647, %v532_v47  ;;  %v594_v23 = vand.u32 2147483647, %v530_v21  ;;  %v5739_v47 = vmax.f32 %v653_v51, 0.0 }
 0x134   : > { %7540 = vst [vmem:[#allocation86_spill] sm:$0xff] %v5698_v32  ;;  %7541 = vst [vmem:[#allocation87_spill] sm:$0xff] %v5703_v42  ;;  %v533_v32 = vsub.f32 %v5659_v11, %v5461_v31  ;;  %v5724_v42 = vmax.f32 %v651_v49, 0.0  ;;  %v657_v30 = vsub.f32 1.0, %v593_v26  ;;  %v655_v53 = vsub.f32 1.0, %v591_v52 }
 0x135   : > { %1652 = vperm.xlu0 %4889, %v5445_v16   ;;  %v646_v16 = vsub.f32 1.0, %v582_v44  ;;  %v656_v44 = vsub.f32 1.0, %v592_v1  ;;  %v595_v48 = vand.u32 2147483647, %v531_v18  ;;  %v5741_v26 = vmax.f32 %v648_v20, 0.0 }
 0x136   : > { %1720 = vperm.xlu1 %4872, %v5374_v40   ;;  %v649_v40 = vsub.f32 1.0, %v585_v9  ;;  %v597_v33 = vand.u32 2147483647, %v533_v32  ;;  %v5737_v32 = vmax.f32 %v652_v34, 0.0  ;;  %v660_v49 = vsub.f32 1.0, %v596_v54 }
 0x137   : > { %v5715_v29 = vpop.permute.xlu0 %1483  ;;  %v5721_v31 = vpop.permute.xlu1 %871  ;;  %v5731_v41 = vmax.f32 %v646_v16, 0.0  ;;  %v534_v21 = vsub.f32 %v5654_v28, %v5476_v50  ;;  %v5748_v16 = vmax.f32 %v656_v44, 0.0  ;;  %v658_v18 = vsub.f32 1.0, %v594_v23 }
 0x138   : > { %7542 = vst [vmem:[#allocation88_spill] sm:$0xff] %v5715_v29  ;;  %7543 = vst [vmem:[#allocation89_spill] sm:$0xff] %v5721_v31  ;;  %v654_v29 = vsub.f32 1.0, %v590_v13  ;;  %v661_v1 = vsub.f32 1.0, %v597_v33  ;;  %v600_v13 = vand.u32 2147483647, %v536_v63  ;;  %v535_v33 = vsub.f32 %v5659_v11, %v5476_v50 }
 0x139   : > { %1660 = vperm.xlu0 %4889, %v5458_v15   ;;  %v537_v15 = vsub.f32 %v5659_v11, %v5474_v35  ;;  %v5750_v35 = vmax.f32 %v657_v30, 0.0  ;;  %v5757_v51 = vmax.f32 %v655_v53, 0.0  ;;  %v541_v23 = vsub.f32 %v5659_v11, %v5487_v2 }
 0x13a   : > { %1728 = vperm.xlu1 %4872, %v5379_v58   ;;  %v5744_v58 = vmax.f32 %v649_v40, 0.0  ;;  %v5752_v52 = vmax.f32 %v654_v29, 0.0  ;;  %v5763_v40 = vmax.f32 %v660_v49, 0.0  ;;  %v540_v29 = vsub.f32 %v5654_v28, %v5487_v2 }
 0x13b   : > { %v5729_v3 = vpop.permute.xlu0 %1493  ;;  %v5735_v9 = vpop.permute.xlu1 %879  ;;  %v601_v20 = vand.u32 2147483647, %v537_v15  ;;  %v5772_v63 = vmax.f32 %v661_v1, 0.0  ;;  %v664_v44 = vsub.f32 1.0, %v600_v13  ;;  %v598_v30 = vand.u32 2147483647, %v534_v21 }
 0x13c   : > { %7544 = vst [vmem:[#allocation90_spill] sm:$0xff] %v5729_v3  ;;  %7545 = vst [vmem:[#allocation91_spill] sm:$0xff] %v5735_v9  ;;  %v539_v50 = vsub.f32 %v5659_v11, %v5489_v5  ;;  %v5776_v53 = vmax.f32 %v658_v18, 0.0  ;;  %v545_v2 = vsub.f32 %v5659_v11, %v5499_v56  ;;  %v542_v15 = vsub.f32 %v5654_v28, %v5501_v39  ;;  %v7551_v3 = vld [vmem:[#allocation49_spill] sm:$0xff] }
 0x13d   : > { %1668 = vperm.xlu0 %4889, %v5471_v22   ;;  %v659_v22 = vsub.f32 1.0, %v595_v48  ;;  %v544_v48 = vsub.f32 %v5654_v28, %v5499_v56  ;;  %v665_v1 = vsub.f32 1.0, %v601_v20  ;;  %v599_v13 = vand.u32 2147483647, %v535_v33 }
 0x13e   : > { %1736 = vperm.xlu1 %4872, %v5384_v12   ;;  %v538_v12 = vsub.f32 %v5654_v28, %v5489_v5  ;;  %v543_v5 = vsub.f32 %v5659_v11, %v5501_v39  ;;  %v604_v18 = vand.u32 2147483647, %v540_v29  ;;  %v5794_v56 = vmax.f32 %v664_v44, 0.0 }
 0x13f   : > { %v5755_v34 = vpop.permute.xlu0 %1503  ;;  %v5761_v54 = vpop.permute.xlu1 %887  ;;  %v5787_v49 = vmax.f32 %v659_v22, 0.0  ;;  %v662_v9 = vsub.f32 1.0, %v598_v30  ;;  %v548_v22 = vsub.f32 %v5654_v28, %v5511_v8  ;;  %v609_v20 = vand.u32 2147483647, %v545_v2 }
 0x140   : > { %7546 = vst [vmem:[#allocation92_spill] sm:$0xff] %v5755_v34  ;;  %7547 = vst [vmem:[#allocation93_spill] sm:$0xff] %v5761_v54  ;;  %v605_v34 = vand.u32 2147483647, %v541_v23  ;;  %v602_v54 = vand.u32 2147483647, %v538_v12 }
 0x141   : > { %1676 = vperm.xlu0 %4889, %v5483_v45   ;;  %7550 = vst [vmem:[#allocation96_spill] sm:$0xff] %v5794_v56  ;;  %v606_v33 = vand.u32 2147483647, %v542_v15  ;;  %v663_v29 = vsub.f32 1.0, %v599_v13  ;;  %v607_v23 = vand.u32 2147483647, %v543_v5 }
 0x142   : > { %1744 = vperm.xlu1 %4872, %v5389_v24   ;;  %v603_v24 = vand.u32 2147483647, %v539_v50  ;;  %v7554_v12 = vld [vmem:[#allocation10_spill] sm:$0xff]  ;;  %v668_v44 = vsub.f32 1.0, %v604_v18  ;;  %v669_v31 = vsub.f32 1.0, %v605_v34  ;;  %v666_v30 = vsub.f32 1.0, %v602_v54 }
 0x143   : > { %v5785_v45 = vpop.permute.xlu0 %2031  ;;  %v5791_v21 = vpop.permute.xlu1 %895  ;;  %v549_v50 = vsub.f32 %v5659_v11, %v5511_v8  ;;  %v612_v2 = vand.u32 2147483647, %v548_v22  ;;  %v7557_v15 = vld [vmem:[#allocation60_spill] sm:$0xff]  ;;  %v673_v5 = vsub.f32 1.0, %v609_v20  ;;  %v7558_v54 = vld [vmem:[#allocation50_spill] sm:$0xff]  ;;  %v5818_v18 = vmax.f32 %v663_v29, 0.0 }
 0x144   : > { %7548 = vst [vmem:[#allocation94_spill] sm:$0xff] %v5785_v45  ;;  %7549 = vst [vmem:[#allocation95_spill] sm:$0xff] %v5791_v21  ;;  %v608_v45 = vand.u32 2147483647, %v544_v48  ;;  %v5801_v21 = vmax.f32 %v665_v1, 0.0  ;;  %v5809_v48 = vmax.f32 %v662_v9, 0.0  ;;  %v546_v1 = vsub.f32 %v5654_v28, %v7557_v15 }
 0x145   : > { %1684 = vperm.xlu0 %4889, %v5496_v62   ;;  %v1960_v62 = vmul.f32 0.002, %v7554_v12  ;;  %v547_v34 = vsub.f32 %v5659_v11, %v7557_v15  ;;  %v5825_v12 = vmax.f32 %v669_v31, 0.0  ;;  %v613_v20 = vand.u32 2147483647, %v549_v50 }
 0x146   : > { %1752 = vperm.xlu1 %4872, %v7551_v3   ;;  %7553 = vst [vmem:[#allocation97_spill] sm:$0xff] %v5801_v21  ;;  %7556 = vst [vmem:[#allocation99_spill] sm:$0xff] %v5809_v48  ;;  %v667_v3 = vsub.f32 1.0, %v603_v24  ;;  %v672_v13 = vsub.f32 1.0, %v608_v45  ;;  %v7561_v24 = vld [vmem:[#allocation9_spill] sm:$0xff]  ;;  %v5827_v45 = vmax.f32 %v666_v30, 0.0 }
 0x147   : > { %v5799_v39 = vpop.permute.xlu0 %2046  ;;  %v5820_v9 = vadd.f32 20.0, %v1960_v62  ;;  %v1962_v22 = vmul.f32 0.002, %v7561_v24  ;;  %7563 = vst [vmem:[#allocation101_spill] sm:$0xff] %v5825_v12  ;;  %v676_v29 = vsub.f32 1.0, %v612_v2  ;;  %v3498_v62 = vld [vmem:[#allocation3 + $0x108] sm:$0xff] }
 0x148   : > { %7552 = vst [vmem:[#allocation49_spill] sm:$0xff] %v5799_v39  ;;  %v5806_v56 = vpop.permute.xlu1 %1353  ;;  %v670_v39 = vsub.f32 1.0, %v606_v33  ;;  %7564 = vst [vmem:[#allocation102_spill] sm:$0xff] %v5827_v45  ;;  %v5832_v15 = vmax.f32 %v667_v3, 0.0  ;;  %v5836_v24 = vmax.f32 %v673_v5, 0.0  ;;  %v7570_v30 = vmov 0  }
 0x149   : > { %7555 = vst [vmem:[#allocation98_spill] sm:$0xff] %v5806_v56  ;;  %1692 = vperm.xlu0 %4889, %v5508_v6   ;;  %v671_v6 = vsub.f32 1.0, %v607_v23  ;;  %7560 = vst [vmem:[#allocation50_spill] sm:$0xff] %v5820_v9  ;;  %v5823_v56 = vmax.f32 %v668_v44, 0.0  ;;  %v3497_v23 = vld [vmem:[#allocation3 + $0x100] sm:$0xff]  ;;  %v5848_v3 = vadd.f32 20.0, %v1962_v22 }
 0x14a   : > { %1760 = vperm.xlu1 %4872, %v7558_v54   ;;  %7566 = vst [vmem:[#allocation104_spill] sm:$0xff] %v5832_v15  ;;  %v610_v54 = vand.u32 2147483647, %v546_v1  ;;  %7568 = vst [vmem:[#allocation106_spill] sm:$0xff] %v5836_v24  ;;  %v5838_v44 = vmax.f32 %v670_v39, 0.0  ;;  %v7574_v2 = vld [vmem:[#allocation11_spill] sm:$0xff]  ;;  %v5858_v24 = vpack.c.bf16 %v3498_v62, %v3497_v23 }
 0x14b   : > { %v5816_v8 = vpop.permute.xlu0 %2056  ;;  %7562 = vst [vmem:[#allocation100_spill] sm:$0xff] %v5823_v56  ;;  %v611_v31 = vand.u32 2147483647, %v547_v34  ;;  %7573 = vst [vmem:[#allocation110_spill] sm:$0xff] %v5848_v3  ;;  %v1963_v1 = vmul.f32 0.002, %v7574_v2  ;;  %v553_v34 = vsub.f32 %v5659_v11, %v5523_v10 }
 0x14c   : > { %7559 = vst [vmem:[#allocation60_spill] sm:$0xff] %v5816_v8  ;;  %v5829_v33 = vpop.permute.xlu1 %1363  ;;  %v5834_v8 = vmax.f32 %v672_v13, 0.0  ;;  %7569 = vst [vmem:[#allocation107_spill] sm:$0xff] %v5838_v44  ;;  %v3499_v13 = vld [vmem:[#allocation3 + $0x110] sm:$0xff]  ;;  %v3500_v5 = vld [vmem:[#allocation3 + $0x118] sm:$0xff]  ;;  %v677_v39 = vsub.f32 1.0, %v613_v20  ;;  %v556_v20 = vsub.f32 %v5654_v28, %v5534_v36  ;;  %4755 = vmatpush1.bf16.msra.mxu1 %v5858_v24 }
 0x14d   : > { %7565 = vst [vmem:[#allocation103_spill] sm:$0xff] %v5829_v33  ;;  %1700 = vperm.xlu0 %4889, %v5520_v19   ;;  %v5843_v33 = vmax.f32 %v671_v6, 0.0  ;;  %v552_v19 = vsub.f32 %v5654_v28, %v5523_v10  ;;  %v674_v22 = vsub.f32 1.0, %v610_v54  ;;  %v557_v10 = vsub.f32 %v5659_v11, %v5534_v36  ;;  %v7578_v44 = vld [vmem:[#allocation64_spill] sm:$0xff]  ;;  %v7581_v62 = vld [vmem:[#allocation13_spill] sm:$0xff]  ;;  %4740 = vmatprep.subr.bf16.mxu1 %v7490_v61  ;;  %v7646_v21 = vld [vmem:[#allocation26_spill] sm:$0xff] }
 0x14e   : > { %7567 = vst [vmem:[#allocation105_spill] sm:$0xff] %v5834_v8  ;;  %4873 = vset.pattern.permute.xlu1 %v7570_v30  ;;  %v7575_v8 = vld [vmem:[#allocation62_spill] sm:$0xff]  ;;  %v675_v54 = vsub.f32 1.0, %v611_v31  ;;  %v3501_v36 = vld [vmem:[#allocation3 + $0x120] sm:$0xff]  ;;  %v617_v12 = vand.u32 2147483647, %v553_v34 }
 0x14f   : > { %v5841_v50 = vpop.permute.xlu0 %2066  ;;  %7572 = vst [vmem:[#allocation109_spill] sm:$0xff] %v5843_v33  ;;  %2026 = vperm.xlu1 %4873, %v5820_v9   ;;  %v5860_v9 = vmax.f32 %v676_v29, 0.0  ;;  %v551_v2 = vsub.f32 %v5659_v11, %v7575_v8  ;;  %v554_v33 = vsub.f32 %v5654_v28, %v7578_v44  ;;  %v5875_v29 = vpack.c.bf16 %v3500_v5, %v3499_v13 }
 0x150   : > { %7571 = vst [vmem:[#allocation108_spill] sm:$0xff] %v5841_v50  ;;  %v550_v50 = vsub.f32 %v5654_v28, %v7575_v8  ;;  %v5855_v6 = vpop.permute.xlu1 %1368  ;;  %v5878_v8 = vadd.f32 20.0, %v1963_v1  ;;  %v616_v56 = vand.u32 2147483647, %v552_v19  ;;  %v5885_v13 = vmax.f32 %v677_v39, 0.0  ;;  %v7588_v39 = vld [vmem:[#allocation15_spill] sm:$0xff] }
 0x151   : > { %7576 = vst [vmem:[#allocation62_spill] sm:$0xff] %v5855_v6  ;;  %1708 = vperm.xlu0 %4889, %v5531_v38   ;;  %7577 = vst [vmem:[#allocation111_spill] sm:$0xff] %v5860_v9  ;;  %v555_v38 = vsub.f32 %v5659_v11, %v7578_v44  ;;  %v1965_v6 = vmul.f32 0.002, %v7581_v62  ;;  %v3502_v9 = vld [vmem:[#allocation3 + $0x128] sm:$0xff]  ;;  %v5887_v31 = vmax.f32 %v674_v22, 0.0  ;;  %4756 = vmatpush1.bf16.msra.mxu1 %v5875_v29 }
 0x152   : > { %7580 = vst [vmem:[#allocation112_spill] sm:$0xff] %v5878_v8  ;;  %v614_v44 = vand.u32 2147483647, %v550_v50  ;;  %7583 = vst [vmem:[#allocation114_spill] sm:$0xff] %v5885_v13  ;;  %v615_v5 = vand.u32 2147483647, %v551_v2  ;;  %v5892_v19 = vpack.c.bf16 %v3502_v9, %v3501_v36  ;;  %4741 = vmatprep.subr.bf16.mxu1 %v7490_v61 }
 0x153   : > { %v5872_v23 = vpop.permute.xlu0 %2076  ;;  %2036 = vperm.xlu1 %4873, %v5848_v3   ;;  %7584 = vst [vmem:[#allocation115_spill] sm:$0xff] %v5887_v31  ;;  %v620_v1 = vand.u32 2147483647, %v556_v20  ;;  %v621_v3 = vand.u32 2147483647, %v557_v10  ;;  %v5894_v50 = vmax.f32 %v675_v54, 0.0 }
 0x154   : > { %7579 = vst [vmem:[#allocation64_spill] sm:$0xff] %v5872_v23  ;;  %v5882_v45 = vpop.permute.xlu1 %1378  ;;  %v618_v23 = vand.u32 2147483647, %v554_v33  ;;  %v619_v62 = vand.u32 2147483647, %v555_v38  ;;  %v3503_v2 = vld [vmem:[#allocation3 + $0x130] sm:$0xff] }
 0x155   : > { %7582 = vst [vmem:[#allocation113_spill] sm:$0xff] %v5882_v45  ;;  %1716 = vperm.xlu0 %4889, %v5540_v59   ;;  %7586 = vst [vmem:[#allocation117_spill] sm:$0xff] %v5894_v50  ;;  %v5897_v59 = vadd.f32 20.0, %v1965_v6  ;;  %v1967_v34 = vmul.f32 0.002, %v7588_v39  ;;  %v3504_v22 = vld [vmem:[#allocation3 + $0x138] sm:$0xff]  ;;  %4757 = vmatpush1.bf16.msra.mxu1 %v5892_v19 }
 0x156   : > { %v680_v33 = vsub.f32 1.0, %v616_v56  ;;  %v681_v20 = vsub.f32 1.0, %v617_v12  ;;  %v678_v10 = vsub.f32 1.0, %v614_v44  ;;  %v7589_v38 = vld [vmem:[#allocation65_spill] sm:$0xff]  ;;  %v679_v54 = vsub.f32 1.0, %v615_v5  ;;  %4742 = vmatprep.subr.bf16.mxu1 %v7490_v61 }
 0x157   : > { %v5889_v15 = vpop.permute.xlu0 %2086  ;;  %2041 = vperm.xlu1 %4873, %v5878_v8   ;;  %7587 = vst [vmem:[#allocation118_spill] sm:$0xff] %v5897_v59  ;;  %v560_v45 = vsub.f32 %v5654_v28, %v7589_v38  ;;  %v684_v36 = vsub.f32 1.0, %v620_v1  ;;  %v561_v6 = vsub.f32 %v5659_v11, %v7589_v38  ;;  %v7591_v8 = vld [vmem:[#allocation66_spill] sm:$0xff]  ;;  %v682_v13 = vsub.f32 1.0, %v618_v23  ;;  %v7594_v1 = vld [vmem:[#allocation17_spill] sm:$0xff] }
 0x158   : > { %7585 = vst [vmem:[#allocation116_spill] sm:$0xff] %v5889_v15  ;;  %v5903_v9 = vpop.permute.xlu1 %1388  ;;  %v558_v39 = vsub.f32 %v5654_v28, %v7591_v8  ;;  %v685_v15 = vsub.f32 1.0, %v621_v3  ;;  %v559_v56 = vsub.f32 %v5659_v11, %v7591_v8  ;;  %v5915_v44 = vpack.c.bf16 %v3504_v22, %v3503_v2  ;;  %v3505_v3 = vld [vmem:[#allocation3 + $0x140] sm:$0xff]  ;;  %v3506_v23 = vld [vmem:[#allocation3 + $0x148] sm:$0xff] }
 0x159   : > { %7590 = vst [vmem:[#allocation65_spill] sm:$0xff] %v5903_v9  ;;  %1724 = vperm.xlu0 %4889, %v5550_v7   ;;  %v683_v7 = vsub.f32 1.0, %v619_v62  ;;  %v5918_v5 = vadd.f32 20.0, %v1967_v34  ;;  %v1969_v38 = vmul.f32 0.002, %v7594_v1  ;;  %v5922_v9 = vmax.f32 %v680_v33, 0.0 }
 0x15a   : > { %v5924_v8 = vmax.f32 %v681_v20, 0.0  ;;  %v624_v31 = vand.u32 2147483647, %v560_v45  ;;  %v5931_v62 = vmax.f32 %v679_v54, 0.0  ;;  %v5933_v34 = vmax.f32 %v684_v36, 0.0  ;;  %4758 = vmatpush1.bf16.msra.mxu1 %v5915_v44  ;;  %v7605_v54 = vld [vmem:[#allocation19_spill] sm:$0xff] }
 0x15b   : > { %v5912_v12 = vpop.permute.xlu0 %2096  ;;  %2051 = vperm.xlu1 %4873, %v5897_v59   ;;  %7593 = vst [vmem:[#allocation119_spill] sm:$0xff] %v5918_v5  ;;  %7595 = vst [vmem:[#allocation120_spill] sm:$0xff] %v5922_v9  ;;  %v625_v22 = vand.u32 2147483647, %v561_v6  ;;  %v622_v59 = vand.u32 2147483647, %v558_v39  ;;  %v5942_v45 = vpack.c.bf16 %v3506_v23, %v3505_v3  ;;  %4743 = vmatprep.subr.bf16.mxu1 %v7490_v61 }
 0x15c   : > { %7592 = vst [vmem:[#allocation66_spill] sm:$0xff] %v5912_v12  ;;  %7596 = vst [vmem:[#allocation121_spill] sm:$0xff] %v5924_v8  ;;  %v5926_v12 = vmax.f32 %v678_v10, 0.0  ;;  %v5928_v2 = vpop.permute.xlu1 %1398  ;;  %v5935_v1 = vmax.f32 %v685_v15, 0.0  ;;  %v5937_v50 = vmax.f32 %v682_v13, 0.0  ;;  %v5944_v10 = vmax.f32 %v683_v7, 0.0 }
 0x15d   : > { %7598 = vst [vmem:[#allocation123_spill] sm:$0xff] %v5928_v2  ;;  %1732 = vperm.xlu0 %4889, %v5559_v46   ;;  %7599 = vst [vmem:[#allocation124_spill] sm:$0xff] %v5931_v62  ;;  %v623_v33 = vand.u32 2147483647, %v559_v56  ;;  %v5947_v46 = vadd.f32 20.0, %v1969_v38  ;;  %v3507_v15 = vld [vmem:[#allocation3 + $0x150] sm:$0xff]  ;;  %v564_v6 = vsub.f32 %v5654_v28, %v5553_v25  ;;  %v565_v56 = vsub.f32 %v5659_v11, %v5553_v25 }
 0x15e   : > { %7597 = vst [vmem:[#allocation122_spill] sm:$0xff] %v5926_v12  ;;  %7600 = vst [vmem:[#allocation125_spill] sm:$0xff] %v5933_v34  ;;  %v1971_v36 = vmul.f32 0.002, %v7605_v54  ;;  %v3508_v13 = vld [vmem:[#allocation3 + $0x158] sm:$0xff]  ;;  %v688_v39 = vsub.f32 1.0, %v624_v31  ;;  %v568_v31 = vsub.f32 %v5654_v28, %v5562_v27  ;;  %v569_v54 = vsub.f32 %v5659_v11, %v5562_v27  ;;  %4759 = vmatpush1.bf16.msra.mxu1 %v5942_v45 }
 0x15f   : > { %7601 = vst [vmem:[#allocation126_spill] sm:$0xff] %v5935_v1  ;;  %7602 = vst [vmem:[#allocation127_spill] sm:$0xff] %v5937_v50  ;;  %v5939_v20 = vpop.permute.xlu0 %2784  ;;  %2061 = vperm.xlu1 %4873, %v5918_v5   ;;  %v7606_v3 = vld [vmem:[#allocation67_spill] sm:$0xff]  ;;  %v689_v38 = vsub.f32 1.0, %v625_v22  ;;  %v7608_v2 = vld [vmem:[#allocation68_spill] sm:$0xff]  ;;  %4744 = vmatprep.subr.bf16.mxu1 %v7490_v61 }
 0x160   : > { %7603 = vst [vmem:[#allocation128_spill] sm:$0xff] %v5939_v20  ;;  %7604 = vst [vmem:[#allocation129_spill] sm:$0xff] %v5944_v10  ;;  %v562_v7 = vsub.f32 %v5654_v28, %v7606_v3  ;;  %v5957_v23 = vpop.permute.xlu1 %1408  ;;  %v686_v20 = vsub.f32 1.0, %v622_v59  ;;  %v563_v5 = vsub.f32 %v5659_v11, %v7606_v3  ;;  %v566_v25 = vsub.f32 %v5654_v28, %v7608_v2  ;;  %v7610_v3 = vld [vmem:[#allocation21_spill] sm:$0xff]  ;;  %v3510_v50 = vld [vmem:[#allocation3 + $0x168] sm:$0xff] }
 0x161   : > { %7607 = vst [vmem:[#allocation67_spill] sm:$0xff] %v5957_v23  ;;  %1740 = vperm.xlu0 %4889, %v5568_v17   ;;  %v567_v34 = vsub.f32 %v5659_v11, %v7608_v2  ;;  %v5973_v17 = vpack.c.bf16 %v3508_v13, %v3507_v15  ;;  %v687_v59 = vsub.f32 1.0, %v623_v33  ;;  %v5976_v22 = vadd.f32 20.0, %v1971_v36  ;;  %v3509_v27 = vld [vmem:[#allocation3 + $0x160] sm:$0xff] }
 0x162   : > { %v1973_v1 = vmul.f32 0.002, %v7610_v3  ;;  %v628_v10 = vand.u32 2147483647, %v564_v6  ;;  %v629_v9 = vand.u32 2147483647, %v565_v56  ;;  %v5990_v6 = vpack.c.bf16 %v3510_v50, %v3509_v27 }
 0x163   : > { %v5970_v23 = vpop.permute.xlu0 %2804  ;;  %2071 = vperm.xlu1 %4873, %v5947_v46   ;;  %v626_v2 = vand.u32 2147483647, %v562_v7  ;;  %v5983_v15 = vmax.f32 %v688_v39, 0.0  ;;  %v5985_v33 = vmax.f32 %v689_v38, 0.0  ;;  %v627_v13 = vand.u32 2147483647, %v563_v5  ;;  %4760 = vmatpush1.bf16.msra.mxu1 %v5973_v17 }
 0x164   : > { %7609 = vst [vmem:[#allocation68_spill] sm:$0xff] %v5970_v23  ;;  %v5980_v8 = vpop.permute.xlu1 %1418  ;;  %v632_v36 = vand.u32 2147483647, %v568_v31  ;;  %v633_v23 = vand.u32 2147483647, %v569_v54  ;;  %7615 = vst [vmem:[#allocation134_spill] sm:$0xff] %v5990_v6  ;;  %4745 = vmatprep.subr.bf16.mxu1 %v7490_v61 }
 0x165   : > { %7611 = vst [vmem:[#allocation130_spill] sm:$0xff] %v5980_v8  ;;  %1748 = vperm.xlu0 %4889, %v5577_v37   ;;  %7612 = vst [vmem:[#allocation131_spill] sm:$0xff] %v5983_v15  ;;  %v630_v12 = vand.u32 2147483647, %v566_v25  ;;  %v631_v3 = vand.u32 2147483647, %v567_v34  ;;  %v572_v37 = vsub.f32 %v5654_v28, %v5571_v4 }
 0x166   : > { %7613 = vst [vmem:[#allocation132_spill] sm:$0xff] %v5985_v33  ;;  %v5992_v56 = vmax.f32 %v686_v20, 0.0  ;;  %v5997_v39 = vadd.f32 20.0, %v1973_v1  ;;  %v7617_v5 = vld [vmem:[#allocation23_spill] sm:$0xff]  ;;  %v3512_v54 = vld [vmem:[#allocation3 + $0x178] sm:$0xff]  ;;  %v6001_v38 = vmax.f32 %v687_v59, 0.0  ;;  %v573_v1 = vsub.f32 %v5659_v11, %v5571_v4 }
 0x167   : > { %v5987_v62 = vpop.permute.xlu0 %2824  ;;  %2081 = vperm.xlu1 %4873, %v5976_v22   ;;  %v1975_v7 = vmul.f32 0.002, %v7617_v5  ;;  %v3511_v34 = vld [vmem:[#allocation3 + $0x170] sm:$0xff]  ;;  %v692_v31 = vsub.f32 1.0, %v628_v10  ;;  %v693_v50 = vsub.f32 1.0, %v629_v9  ;;  %v690_v25 = vsub.f32 1.0, %v626_v2  ;;  %4761 = vmatpush1.bf16.msra.mxu1 %v5990_v6 }
 0x168   : > { %7614 = vst [vmem:[#allocation133_spill] sm:$0xff] %v5987_v62  ;;  %7616 = vst [vmem:[#allocation135_spill] sm:$0xff] %v5992_v56  ;;  %v6003_v20 = vpop.permute.xlu1 %1428  ;;  %v691_v27 = vsub.f32 1.0, %v627_v13  ;;  %v696_v62 = vsub.f32 1.0, %v632_v36  ;;  %v905_v5 = vsub.f32 %v5659_v11, %v5599_v55  ;;  %v697_v8 = vsub.f32 1.0, %v633_v23  ;;  %v7620_v33 = vld [vmem:[#allocation69_spill] sm:$0xff]  ;;  %4746 = vmatprep.subr.bf16.mxu1 %v7490_v61 }
 0x169   : > { %7618 = vst [vmem:[#allocation136_spill] sm:$0xff] %v6001_v38  ;;  %7619 = vst [vmem:[#allocation137_spill] sm:$0xff] %v6003_v20  ;;  %1756 = vperm.xlu0 %4889, %v5586_v43   ;;  %v694_v15 = vsub.f32 1.0, %v630_v12  ;;  %v570_v59 = vsub.f32 %v5654_v28, %v7620_v33  ;;  %v6015_v9 = vpack.c.bf16 %v3512_v54, %v3511_v34  ;;  %v695_v43 = vsub.f32 1.0, %v631_v3  ;;  %v3513_v4 = vld [vmem:[#allocation3 + $0x180] sm:$0xff]  ;;  %v3514_v23 = vld [vmem:[#allocation3 + $0x188] sm:$0xff] }
 0x16a   : > { %v636_v2 = vand.u32 2147483647, %v572_v37  ;;  %v6018_v13 = vadd.f32 20.0, %v1975_v7  ;;  %v6021_v12 = vmax.f32 %v692_v31, 0.0  ;;  %v6023_v36 = vmax.f32 %v693_v50, 0.0  ;;  %v7627_v3 = vld [vmem:[#allocation74_spill] sm:$0xff] }
 0x16b   : > { %v6012_v10 = vpop.permute.xlu0 %2844  ;;  %7622 = vst [vmem:[#allocation138_spill] sm:$0xff] %v6015_v9  ;;  %2091 = vperm.xlu1 %4873, %v5997_v39   ;;  %v6025_v20 = vmax.f32 %v690_v25, 0.0  ;;  %v571_v34 = vsub.f32 %v5659_v11, %v7620_v33  ;;  %v6032_v37 = vmax.f32 %v691_v27, 0.0  ;;  %v6034_v7 = vand.u32 2147483647, %v573_v1  ;;  %4762 = vmatpush1.bf16.msra.mxu1 %v6015_v9 }
 0x16c   : > { %7621 = vst [vmem:[#allocation69_spill] sm:$0xff] %v6012_v10  ;;  %7623 = vst [vmem:[#allocation139_spill] sm:$0xff] %v6021_v12  ;;  %v6029_v54 = vpop.permute.xlu1 %1438  ;;  %v904_v10 = vsub.f32 %v5654_v28, %v5599_v55  ;;  %v969_v31 = vand.u32 2147483647, %v905_v5  ;;  %v6038_v12 = vmax.f32 %v696_v62, 0.0  ;;  %v6040_v50 = vmax.f32 %v697_v8, 0.0  ;;  %4747 = vmatprep.subr.bf16.mxu1 %v7490_v61 }
 0x16d   : > { %7624 = vst [vmem:[#allocation140_spill] sm:$0xff] %v6023_v36  ;;  %7625 = vst [vmem:[#allocation141_spill] sm:$0xff] %v6025_v20  ;;  %1764 = vperm.xlu0 %4889, %v7627_v3   ;;  %v6042_v25 = vand.u32 2147483647, %v570_v59  ;;  %v6045_v33 = vpack.c.bf16 %v3514_v23, %v3513_v4  ;;  %v6049_v27 = vmax.f32 %v695_v43, 0.0  ;;  %v700_v1 = vsub.f32 1.0, %v636_v2 }
 0x16e   : > { %7626 = vst [vmem:[#allocation142_spill] sm:$0xff] %v6029_v54  ;;  %7628 = vst [vmem:[#allocation74_spill] sm:$0xff] %v6032_v37  ;;  %v6047_v54 = vmax.f32 %v694_v15, 0.0  ;;  %v7634_v3 = vld [vmem:[#allocation77_spill] sm:$0xff]  ;;  %v3515_v8 = vld [vmem:[#allocation3 + $0x190] sm:$0xff]  ;;  %v701_v23 = vsub.f32 1.0, %v6034_v7 }
 0x16f   : > { %7629 = vst [vmem:[#allocation143_spill] sm:$0xff] %v6038_v12  ;;  %7630 = vst [vmem:[#allocation144_spill] sm:$0xff] %v6040_v50  ;;  %v907_v36 = vsub.f32 %v5659_v11, %v7634_v3  ;;  %2101 = vperm.xlu1 %4873, %v6018_v13   ;;  %v3516_v62 = vld [vmem:[#allocation3 + $0x198] sm:$0xff]  ;;  %v6055_v5 = vand.u32 2147483647, %v571_v34  ;;  %v906_v59 = vsub.f32 %v5654_v28, %v7634_v3  ;;  %v7636_v2 = vld [vmem:[#allocation54_spill] sm:$0xff]  ;;  %4763 = vmatpush1.bf16.msra.mxu1 %v6045_v33 }
 0x170   : > { %7631 = vst [vmem:[#allocation145_spill] sm:$0xff] %v6045_v33  ;;  %7632 = vst [vmem:[#allocation146_spill] sm:$0xff] %v6047_v54  ;;  %v776_v55 = vpop.permute.xlu0 %775  ;;  %v6060_v43 = vpop.permute.xlu1 %1448  ;;  %v7637_v12 = vld [vmem:[#allocation70_spill] sm:$0xff]  ;;  %v968_v54 = vand.u32 2147483647, %v904_v10  ;;  %v698_v34 = vsub.f32 1.0, %v6042_v25  ;;  %v6069_v3 = vpack.c.bf16 %v3516_v62, %v3515_v8  ;;  %4748 = vmatprep.subr.bf16.mxu1 %v7490_v61 }
 0x171   : > { %7633 = vst [vmem:[#allocation147_spill] sm:$0xff] %v6049_v27  ;;  %v902_v15 = vsub.f32 %v5654_v28, %v776_v55  ;;  %7635 = vst [vmem:[#allocation77_spill] sm:$0xff] %v6060_v43  ;;  %2345 = vperm.xlu0 %4889, %v7636_v2   ;;  %v903_v4 = vsub.f32 %v5659_v11, %v776_v55  ;;  %v576_v50 = vsub.f32 %v5654_v28, %v7637_v12  ;;  %v7640_v7 = vmov 1   ;;  %v3518_v25 = vld [vmem:[#allocation3 + $0x1a8] sm:$0xff] }
 0x172   : > { %v1033_v27 = vsub.f32 1.0, %v969_v31  ;;  %7638 = vst [vmem:[#allocation54_spill] sm:$0xff] %v6069_v3  ;;  %v6071_v43 = vmax.f32 %v700_v1, 0.0  ;;  %v577_v55 = vsub.f32 %v5659_v11, %v7637_v12  ;;  %v971_v2 = vand.u32 2147483647, %v907_v36  ;;  %v3517_v31 = vld [vmem:[#allocation3 + $0x1a0] sm:$0xff] }
 0x173   : > { %v966_v20 = vand.u32 2147483647, %v902_v15  ;;  %v967_v37 = vand.u32 2147483647, %v903_v4  ;;  %4874 = vset.pattern.permute.xlu1 %v7640_v7  ;;  %v647_v10 = vsub.f32 1.0, %v5710_v60  ;;  %v1032_v62 = vsub.f32 1.0, %v968_v54  ;;  %4764 = vmatpush1.bf16.msra.mxu1 %v6069_v3 }
 0x174   : > { %7639 = vst [vmem:[#allocation70_spill] sm:$0xff] %v6071_v43  ;;  %v788_v56 = vpop.permute.xlu0 %787  ;;  %v970_v15 = vand.u32 2147483647, %v906_v59  ;;  %2349 = vperm.xlu1 %4874, %v5947_v46   ;;  %v6080_v1 = vpop.permute.xlu1 %1458  ;;  %v1097_v7 = vmax.f32 %v1033_v27, 0.0  ;;  %v7642_v60 = vld [vmem:[#allocation78_spill] sm:$0xff]  ;;  %v6088_v33 = vpack.c.bf16 %v3518_v25, %v3517_v31  ;;  %v7643_v46 = vld [vmem:[#allocation71_spill] sm:$0xff]  ;;  %4749 = vmatprep.subr.bf16.mxu1 %v7490_v61 }
 0x175   : > { %v1030_v4 = vsub.f32 1.0, %v966_v20  ;;  %v909_v8 = vsub.f32 %v5659_v11, %v788_v56  ;;  %7641 = vst [vmem:[#allocation148_spill] sm:$0xff] %v6080_v1  ;;  %2357 = vperm.xlu0 %4889, %v5976_v22   ;;  %v1031_v12 = vsub.f32 1.0, %v967_v37  ;;  %v911_v43 = vsub.f32 %v5659_v11, %v7642_v60  ;;  %v3519_v27 = vld [vmem:[#allocation3 + $0x1b0] sm:$0xff]  ;;  %v3520_v36 = vld [vmem:[#allocation3 + $0x1b8] sm:$0xff] }
 0x176   : > { %v908_v59 = vsub.f32 %v5654_v28, %v788_v56  ;;  %v574_v1 = vsub.f32 %v5654_v28, %v7643_v46  ;;  %v1035_v22 = vsub.f32 1.0, %v971_v2  ;;  %v711_v54 = vmax.f32 %v647_v10, 0.0  ;;  %v7644_v25 = vld [vmem:[#allocation55_spill] sm:$0xff] }
 0x177   : > { %v1094_v38 = vmax.f32 %v1030_v4, 0.0  ;;  %v1095_v20 = vmax.f32 %v1031_v12, 0.0  ;;  %v973_v37 = vand.u32 2147483647, %v909_v8  ;;  %v6095_v4 = vand.u32 2147483647, %v576_v50  ;;  %4765 = vmatpush1.bf16.msra.mxu1 %v6088_v33 }
 0x178   : > { %v6092_v9 = vpop.permute.xlu0 %795  ;;  %v575_v56 = vsub.f32 %v5659_v11, %v7643_v46  ;;  %v1034_v12 = vsub.f32 1.0, %v970_v15  ;;  %v910_v31 = vsub.f32 %v5654_v28, %v7642_v60  ;;  %2353 = vperm.xlu1 %4874, %v7644_v25   ;;  %v6102_v2 = vpop.permute.xlu1 %1468  ;;  %v975_v10 = vand.u32 2147483647, %v911_v43  ;;  %4750 = vmatprep.subr.bf16.mxu1 %v7490_v61  ;;  %v3522_v43 = vld [vmem:[#allocation3 + $0x1c8] sm:$0xff] }
 0x179   : > { %7645 = vst [vmem:[#allocation78_spill] sm:$0xff] %v6102_v2  ;;  %2365 = vperm.xlu0 %4889, %v5997_v39   ;;  %v1159_v8 = vadd.f32 %v1095_v20, %v711_v54  ;;  %v1158_v3 = vadd.f32 %v1094_v38, %v5731_v41  ;;  %v1976_v50 = vmul.f32 0.002, %v7646_v21  ;;  %v6107_v48 = vmax.f32 %v701_v23, 0.0  ;;  %v3521_v38 = vld [vmem:[#allocation3 + $0x1c0] sm:$0xff]  ;;  %v7647_v20 = vld [vmem:[#allocation56_spill] sm:$0xff] }
 0x17a   : > { %v1096_v6 = vmax.f32 %v1032_v62, 0.0  ;;  %v972_v46 = vand.u32 2147483647, %v908_v59  ;;  %v6110_v15 = vpack.c.bf16 %v3520_v36, %v3519_v27  ;;  %v1099_v60 = vmax.f32 %v1035_v22, 0.0 }
 0x17b   : > { %v1037_v25 = vsub.f32 1.0, %v973_v37  ;;  %v913_v2 = vsub.f32 %v5659_v11, %v6092_v9  ;;  %3609 = vmatprep.mubr.f32.mxu0 %v1159_v8  ;;  %v1161_v41 = vadd.f32 %v1097_v7, %v5744_v58  ;;  %v6118_v23 = vmax.f32 %v698_v34, 0.0  ;;  %v7649_v7 = vld [vmem:[#allocation25_spill] sm:$0xff] }
 0x17c   : > { %v6114_v39 = vpop.permute.xlu0 %803  ;;  %v6120_v62 = vand.u32 2147483647, %v577_v55  ;;  %v6122_v36 = vand.u32 2147483647, %v574_v1  ;;  %v1098_v59 = vmax.f32 %v1034_v12, 0.0  ;;  %3610 = vmatmul.mubr.f32.vlgmr.msra.gmra.mrb[0].mxu0 %v1158_v3  ;;  %2361 = vperm.xlu1 %4874, %v7647_v20   ;;  %v6125_v22 = vpop.permute.xlu1 %1478  ;;  %v1039_v54 = vsub.f32 1.0, %v975_v10 }
 0x17d   : > { %7648 = vst [vmem:[#allocation71_spill] sm:$0xff] %v6125_v22  ;;  %v974_v37 = vand.u32 2147483647, %v910_v31  ;;  %2373 = vperm.xlu0 %4889, %v6018_v13   ;;  %3614 = vmatprep.mubr.f32.mxu0 %v1161_v41  ;;  %v4429_v58 = vadd.f32 20.0, %v1976_v50  ;;  %v1977_v27 = vmul.f32 0.002, %v7649_v7  ;;  %v912_v55 = vsub.f32 %v5654_v28, %v6092_v9 }
 0x17e   : > { %v1036_v34 = vsub.f32 1.0, %v972_v46  ;;  %v1160_v1 = vadd.f32 %v1096_v6, %v5741_v26  ;;  %4766 = vmatpush1.bf16.msra.mxu1 %v6110_v15  ;;  %v6133_v3 = vpack.c.bf16 %v3522_v43, %v3521_v38  ;;  %4661 = vmatpush1.bf16.msra.mxu0 %v5858_v24  ;;  %v915_v12 = vsub.f32 %v5659_v11, %v5619_v57  ;;  %v3523_v9 = vld [vmem:[#allocation3 + $0x1d0] sm:$0xff]  ;;  %v3524_v50 = vld [vmem:[#allocation3 + $0x1d8] sm:$0xff] }
 0x17f   : > { %v1101_v13 = vmax.f32 %v1037_v25, 0.0  ;;  %v977_v31 = vand.u32 2147483647, %v913_v2  ;;  %v1163_v8 = vadd.f32 %v1099_v60, %v5724_v42  ;;  %4751 = vmatprep.subr.bf16.mxu1 %v7490_v61  ;;  %4662 = vmatprep.subr.bf16.mxu0 %v7490_v61  ;;  %v7650_v26 = vsub.f32 1.0, %v6055_v5  ;;  %v7651_v25 = vld [vmem:[#allocation57_spill] sm:$0xff] }
 0x180   : > { %v6138_v10 = vpop.permute.xlu0 %811  ;;  %v704_v24 = vsub.f32 1.0, %v6095_v4  ;;  %v6148_v46 = vand.u32 2147483647, %v575_v56  ;;  %v914_v2 = vsub.f32 %v5654_v28, %v5619_v57  ;;  %3615 = vmatmul.mubr.f32.gmra.mrb[2].mxu0 %v1160_v1  ;;  %2369 = vperm.xlu1 %4874, %v7651_v25   ;;  %v6153_v42 = vpop.permute.xlu1 %1488  ;;  %v1038_v60 = vsub.f32 1.0, %v974_v37  ;;  %v7653_v5 = vld [vmem:[#allocation29_spill] sm:$0xff] }
 0x181   : > { %v6145_v6 = vmax.f32 %v7650_v26, 0.0  ;;  %7652 = vst [vmem:[#allocation55_spill] sm:$0xff] %v6153_v42  ;;  %v1103_v41 = vmax.f32 %v1039_v54, 0.0  ;;  %2377 = vperm.xlu0 %4889, %v4429_v58   ;;  %3619 = vmatprep.mubr.f32.mxu0 %v1163_v8  ;;  %v4430_v38 = vadd.f32 20.0, %v1977_v27  ;;  %v1978_v43 = vmul.f32 0.002, %v7653_v5 }
 0x182   : > { %v1100_v20 = vmax.f32 %v1036_v34, 0.0  ;;  %v976_v7 = vand.u32 2147483647, %v912_v55  ;;  %v1162_v4 = vadd.f32 %v1098_v59, %v5717_v14  ;;  %4767 = vmatpush1.bf16.msra.mxu1 %v6133_v3  ;;  %v6158_v56 = vpack.c.bf16 %v3524_v50, %v3523_v9  ;;  %4664 = vmatpush1.bf16.msra.mxu0 %v5875_v29  ;;  %v3525_v34 = vld [vmem:[#allocation3 + $0x1e0] sm:$0xff]  ;;  %v3526_v55 = vld [vmem:[#allocation3 + $0x1e8] sm:$0xff]  ;;  %v7654_v29 = vld [vmem:[#allocation72_spill] sm:$0xff] }
 0x183   : > { %v979_v57 = vand.u32 2147483647, %v915_v12  ;;  %v1041_v1 = vsub.f32 1.0, %v977_v31  ;;  %v917_v37 = vsub.f32 %v5659_v11, %v6114_v39  ;;  %v1165_v27 = vadd.f32 %v1101_v13, %v5739_v47  ;;  %4752 = vmatprep.subr.bf16.mxu1 %v7490_v61  ;;  %4665 = vmatprep.subr.bf16.mxu0 %v7490_v61  ;;  %v7656_v50 = vld [vmem:[#allocation27_spill] sm:$0xff] }
 0x184   : > { %v6163_v54 = vpop.permute.xlu0 %819  ;;  %v705_v14 = vsub.f32 1.0, %v6120_v62  ;;  %v580_v12 = vsub.f32 %v5654_v28, %v7654_v29  ;;  %v978_v31 = vand.u32 2147483647, %v914_v2  ;;  %3620 = vmatmul.mubr.f32.gmra.mrb[4].mxu0 %v1162_v4  ;;  %4875 = vset.pattern.permute.xlu1 %v7570_v30  ;;  %v6173_v8 = vpop.permute.xlu1 %1498  ;;  %v1102_v47 = vmax.f32 %v1038_v60, 0.0 }
 0x185   : > { %7655 = vst [vmem:[#allocation26_spill] sm:$0xff] %v6173_v8  ;;  %v919_v13 = vsub.f32 %v5659_v11, %v5626_v0  ;;  %2381 = vperm.xlu0 %4889, %v4430_v38   ;;  %3624 = vmatprep.mubr.f32.mxu0 %v1165_v27  ;;  %v4431_v9 = vadd.f32 20.0, %v1978_v43  ;;  %v1979_v62 = vmul.f32 0.002, %v7656_v50  ;;  %v1040_v26 = vsub.f32 1.0, %v976_v7  ;;  %v3527_v7 = vld [vmem:[#allocation3 + $0x1f0] sm:$0xff] }
 0x186   : > { %v916_v25 = vsub.f32 %v5654_v28, %v6114_v39  ;;  %2106 = vperm.xlu1 %4875, %v4429_v58   ;;  %v1164_v2 = vadd.f32 %v1100_v20, %v5737_v32  ;;  %4768 = vmatpush1.bf16.msra.mxu1 %v6158_v56  ;;  %v6182_v4 = vpack.c.bf16 %v3526_v55, %v3525_v34  ;;  %v1043_v60 = vsub.f32 1.0, %v979_v57  ;;  %v3528_v27 = vld [vmem:[#allocation3 + $0x1f8] sm:$0xff]  ;;  %v7657_v58 = vld [vmem:[#allocation73_spill] sm:$0xff] }
 0x187   : > { %v1105_v59 = vmax.f32 %v1041_v1, 0.0  ;;  %v981_v8 = vand.u32 2147483647, %v917_v37  ;;  %v1167_v43 = vadd.f32 %v1103_v41, %v5757_v51  ;;  %4753 = vmatprep.subr.bf16.mxu1 %v7490_v61  ;;  %4667 = vmatpush1.bf16.msra.mxu0 %v5892_v19  ;;  %v6189_v39 = vmax.f32 %v704_v24, 0.0  ;;  %v7659_v24 = vld [vmem:[#allocation32_spill] sm:$0xff] }
 0x188   : > { %v6184_v42 = vpop.permute.xlu0 %827  ;;  %v581_v32 = vsub.f32 %v5659_v11, %v7654_v29  ;;  %v578_v20 = vsub.f32 %v5654_v28, %v7657_v58  ;;  %v1042_v57 = vsub.f32 1.0, %v978_v31  ;;  %3625 = vmatmul.mubr.f32.gmra.mrb[6].mxu0 %v1164_v2  ;;  %v6195_v1 = vpop.permute.xlu1 %1508  ;;  %4668 = vmatprep.subr.bf16.mxu0 %v7490_v61  ;;  %v918_v51 = vsub.f32 %v5654_v28, %v5626_v0 }
 0x189   : > { %7658 = vst [vmem:[#allocation56_spill] sm:$0xff] %v6195_v1  ;;  %v983_v41 = vand.u32 2147483647, %v919_v13  ;;  %2385 = vperm.xlu0 %4889, %v4431_v9   ;;  %3629 = vmatprep.mubr.f32.mxu0 %v1167_v43  ;;  %v4432_v19 = vadd.f32 20.0, %v1979_v62  ;;  %v1980_v37 = vmul.f32 0.002, %v7659_v24  ;;  %v1166_v29 = vadd.f32 %v1102_v47, %v5752_v52 }
 0x18a   : > { %v1104_v34 = vmax.f32 %v1040_v26, 0.0  ;;  %v980_v55 = vand.u32 2147483647, %v916_v25  ;;  %2111 = vperm.xlu1 %4875, %v4430_v38   ;;  %4769 = vmatpush1.bf16.msra.mxu1 %v6182_v4  ;;  %v6203_v31 = vpack.c.bf16 %v3528_v27, %v3527_v7  ;;  %v1107_v2 = vmax.f32 %v1043_v60, 0.0  ;;  %v7662_v7 = vld [vmem:[#allocation79_spill] sm:$0xff]  ;;  %v7691_v24 = vld [vmem:[#allocation109_spill] sm:$0xff] }
 0x18b   : > { %v1045_v1 = vsub.f32 1.0, %v981_v8  ;;  %v921_v0 = vsub.f32 %v5659_v11, %v6138_v10  ;;  %v1169_v62 = vadd.f32 %v1105_v59, %v5750_v35  ;;  %4754 = vmatprep.subr.bf16.mxu1 %v7490_v61  ;;  %4670 = vmatpush1.bf16.msra.mxu0 %v5915_v44  ;;  %v6212_v38 = vmax.f32 %v705_v14, 0.0  ;;  %v7661_v44 = vld [vmem:[#allocation31_spill] sm:$0xff] }
 0x18c   : > { %v6207_v13 = vpop.permute.xlu0 %835  ;;  %v703_v52 = vsub.f32 1.0, %v6148_v46  ;;  %v6215_v47 = vand.u32 2147483647, %v580_v12  ;;  %v579_v8 = vsub.f32 %v5659_v11, %v7657_v58  ;;  %3630 = vmatmul.mubr.f32.gmra.mrb[8].mxu0 %v1166_v29  ;;  %4671 = vmatprep.subr.bf16.mxu0 %v7490_v61  ;;  %v1106_v26 = vmax.f32 %v1042_v57, 0.0 }
 0x18d   : > { %v982_v25 = vand.u32 2147483647, %v918_v51  ;;  %2389 = vperm.xlu0 %4889, %v4432_v19   ;;  %3634 = vmatprep.mubr.f32.mxu0 %v1169_v62  ;;  %v6220_v35 = vpop.permute.xlu1 %1644  ;;  %v4433_v59 = vadd.f32 20.0, %v1980_v37  ;;  %v1981_v14 = vmul.f32 0.002, %v7661_v44  ;;  %v1047_v60 = vsub.f32 1.0, %v983_v41 }
 0x18e   : > { %7660 = vst [vmem:[#allocation25_spill] sm:$0xff] %v6220_v35  ;;  %v1044_v43 = vsub.f32 1.0, %v980_v55  ;;  %v920_v46 = vsub.f32 %v5654_v28, %v6138_v10  ;;  %2116 = vperm.xlu1 %4875, %v4431_v9   ;;  %v1168_v12 = vadd.f32 %v1104_v34, %v5748_v16  ;;  %4770 = vmatpush1.bf16.msra.mxu1 %v6203_v31  ;;  %v1109_v58 = vmax.f32 %v1045_v1, 0.0 }
 0x18f   : > { %v923_v27 = vsub.f32 %v5659_v11, %v7662_v7  ;;  %v985_v57 = vand.u32 2147483647, %v921_v0  ;;  %v1171_v37 = vadd.f32 %v1107_v2, %v5787_v49  ;;  %4673 = vmatpush1.bf16.msra.mxu0 %v5942_v45  ;;  %v7663_v41 = vsub.f32 1.0, %v6122_v36  ;;  %v7665_v36 = vld [vmem:[#allocation35_spill] sm:$0xff] }
 0x190   : > { %v6229_v51 = vpop.permute.xlu0 %843  ;;  %v6237_v10 = vmax.f32 %v703_v52, 0.0  ;;  %v645_v16 = vand.u32 2147483647, %v581_v32  ;;  %v6239_v9 = vand.u32 2147483647, %v578_v20  ;;  %3635 = vmatmul.mubr.f32.gmra.mrb[10].mxu0 %v1168_v12  ;;  %4674 = vmatprep.subr.bf16.mxu0 %v7490_v61  ;;  %v1046_v1 = vsub.f32 1.0, %v982_v25 }
 0x191   : > { %v6235_v55 = vmax.f32 %v7663_v41, 0.0  ;;  %v922_v34 = vsub.f32 %v5654_v28, %v7662_v7  ;;  %2393 = vperm.xlu0 %4889, %v4433_v59   ;;  %3639 = vmatprep.mubr.f32.mxu0 %v1171_v37  ;;  %v6244_v49 = vpop.permute.xlu1 %1648  ;;  %v4434_v45 = vadd.f32 20.0, %v1981_v14  ;;  %v1982_v29 = vmul.f32 0.002, %v7665_v36 }
 0x192   : > { %7664 = vst [vmem:[#allocation57_spill] sm:$0xff] %v6244_v49  ;;  %v1111_v2 = vmax.f32 %v1047_v60, 0.0  ;;  %v1108_v0 = vmax.f32 %v1044_v43, 0.0  ;;  %v984_v62 = vand.u32 2147483647, %v920_v46  ;;  %2121 = vperm.xlu1 %4875, %v4432_v19   ;;  %v1170_v32 = vadd.f32 %v1106_v26, %v5776_v53 }
 0x193   : > { %v987_v20 = vand.u32 2147483647, %v923_v27  ;;  %v1049_v52 = vsub.f32 1.0, %v985_v57  ;;  %v925_v25 = vsub.f32 %v5659_v11, %v6163_v54  ;;  %v1173_v12 = vadd.f32 %v1109_v58, %v5772_v63  ;;  %4676 = vmatpush1.bf16.msra.mxu0 %v5973_v17  ;;  %v7667_v27 = vld [vmem:[#allocation33_spill] sm:$0xff]  ;;  %v7668_v58 = vld [vmem:[#allocation80_spill] sm:$0xff] }
 0x194   : > { %v6250_v44 = vpop.permute.xlu0 %851  ;;  %v708_v14 = vsub.f32 1.0, %v6215_v47  ;;  %v709_v7 = vsub.f32 1.0, %v645_v16  ;;  %v643_v60 = vand.u32 2147483647, %v579_v8  ;;  %v706_v43 = vsub.f32 1.0, %v6239_v9  ;;  %3640 = vmatmul.mubr.f32.gmra.mrb[12].mxu0 %v1170_v32  ;;  %4677 = vmatprep.subr.bf16.mxu0 %v7490_v61 }
 0x195   : > { %v1110_v53 = vmax.f32 %v1046_v1, 0.0  ;;  %v986_v19 = vand.u32 2147483647, %v922_v34  ;;  %2397 = vperm.xlu0 %4889, %v4434_v45   ;;  %3644 = vmatprep.mubr.f32.mxu0 %v1173_v12  ;;  %v6257_v26 = vpop.permute.xlu1 %1656  ;;  %v4435_v46 = vadd.f32 20.0, %v1982_v29  ;;  %v1983_v63 = vmul.f32 0.002, %v7667_v27 }
 0x196   : > { %7666 = vst [vmem:[#allocation29_spill] sm:$0xff] %v6257_v26  ;;  %v927_v17 = vsub.f32 %v5659_v11, %v7668_v58  ;;  %v1048_v47 = vsub.f32 1.0, %v984_v62  ;;  %v924_v8 = vsub.f32 %v5654_v28, %v6163_v54  ;;  %2126 = vperm.xlu1 %4875, %v4433_v59   ;;  %v1172_v57 = vadd.f32 %v1108_v0, %v5763_v40  ;;  %v7669_v34 = vld [vmem:[#allocation134_spill] sm:$0xff] }
 0x197   : > { %v1051_v37 = vsub.f32 1.0, %v987_v20  ;;  %v1113_v41 = vmax.f32 %v1049_v52, 0.0  ;;  %v989_v16 = vand.u32 2147483647, %v925_v25  ;;  %v1175_v1 = vadd.f32 %v1111_v2, %v5818_v18  ;;  %4679 = vmatpush1.bf16.msra.mxu0 %v7669_v34  ;;  %v7670_v12 = vld [vmem:[#allocation30_spill] sm:$0xff] }
 0x198   : > { %v6265_v9 = vpop.permute.xlu0 %859  ;;  %v6269_v29 = vmax.f32 %v708_v14, 0.0  ;;  %v6271_v32 = vmax.f32 %v709_v7, 0.0  ;;  %v707_v62 = vsub.f32 1.0, %v643_v60  ;;  %v1519_v54 = vsub.f32 %v5654_v28, %v7670_v12  ;;  %3645 = vmatmul.mubr.f32.gmra.mrb[14].mxu0 %v1172_v57  ;;  %4680 = vmatprep.subr.bf16.mxu0 %v7490_v61  ;;  %v7672_v0 = vld [vmem:[#allocation38_spill] sm:$0xff]  ;;  %v7673_v7 = vld [vmem:[#allocation99_spill] sm:$0xff] }
 0x199   : > { %v1050_v40 = vsub.f32 1.0, %v986_v19  ;;  %v926_v59 = vsub.f32 %v5654_v28, %v7668_v58  ;;  %2401 = vperm.xlu0 %4889, %v4435_v46   ;;  %3649 = vmatprep.mubr.f32.mxu0 %v1175_v1  ;;  %v6278_v18 = vpop.permute.xlu1 %1664  ;;  %v4436_v2 = vadd.f32 20.0, %v1983_v63  ;;  %v1984_v20 = vmul.f32 0.002, %v7672_v0  ;;  %v7674_v58 = vld [vmem:[#allocation97_spill] sm:$0xff]  ;;  %v7675_v26 = vld [vmem:[#allocation138_spill] sm:$0xff] }
 0x19a   : > { %7671 = vst [vmem:[#allocation72_spill] sm:$0xff] %v6278_v18  ;;  %v991_v52 = vand.u32 2147483647, %v927_v17  ;;  %v1112_v25 = vmax.f32 %v1048_v47, 0.0  ;;  %v988_v14 = vand.u32 2147483647, %v924_v8  ;;  %2131 = vperm.xlu1 %4875, %v4434_v45   ;;  %v1174_v60 = vadd.f32 %v1110_v53, %v7673_v7 }
 0x19b   : > { %v1115_v57 = vmax.f32 %v1051_v37, 0.0  ;;  %v1053_v34 = vsub.f32 1.0, %v989_v16  ;;  %v929_v19 = vsub.f32 %v5659_v11, %v6184_v42  ;;  %v1177_v1 = vadd.f32 %v1113_v41, %v7674_v58  ;;  %4682 = vmatpush1.bf16.msra.mxu0 %v7675_v26  ;;  %v7676_v47 = vld [vmem:[#allocation34_spill] sm:$0xff]  ;;  %v7677_v16 = vld [vmem:[#allocation36_spill] sm:$0xff] }
 0x19c   : > { %v6284_v12 = vpop.permute.xlu0 %867  ;;  %v6288_v63 = vmax.f32 %v706_v43, 0.0  ;;  %v6290_v18 = vmax.f32 %v707_v62, 0.0  ;;  %v1551_v17 = vand.u32 2147483647, %v1519_v54  ;;  %v1521_v45 = vsub.f32 %v5654_v28, %v7676_v47  ;;  %3650 = vmatmul.mubr.f32.gmra.mrb[16].mxu0 %v1174_v60  ;;  %4683 = vmatprep.subr.bf16.mxu0 %v7490_v61  ;;  %v7678_v54 = vld [vmem:[#allocation96_spill] sm:$0xff]  ;;  %v7679_v60 = vld [vmem:[#allocation82_spill] sm:$0xff] }
 0x19d   : > { %v1114_v53 = vmax.f32 %v1050_v40, 0.0  ;;  %v990_v8 = vand.u32 2147483647, %v926_v59  ;;  %2405 = vperm.xlu0 %4889, %v4436_v2   ;;  %3654 = vmatprep.mubr.f32.mxu0 %v1177_v1  ;;  %v6295_v37 = vpop.permute.xlu1 %1672  ;;  %v4437_v41 = vadd.f32 20.0, %v1984_v20  ;;  %v1985_v26 = vmul.f32 0.002, %v7677_v16 }
 0x19e   : > { %v1055_v43 = vsub.f32 1.0, %v991_v52  ;;  %v1052_v7 = vsub.f32 1.0, %v988_v14  ;;  %v928_v62 = vsub.f32 %v5654_v28, %v6184_v42  ;;  %2136 = vperm.xlu1 %4875, %v4435_v46   ;;  %v1176_v58 = vadd.f32 %v1112_v25, %v7678_v54  ;;  %v7680_v1 = vld [vmem:[#allocation104_spill] sm:$0xff]  ;;  %v7681_v20 = vld [vmem:[#allocation145_spill] sm:$0xff]  ;;  %v7683_v46 = vld [vmem:[#allocation39_spill] sm:$0xff] }
 0x19f   : > { %v931_v47 = vsub.f32 %v5659_v11, %v7679_v60  ;;  %v1117_v40 = vmax.f32 %v1053_v34, 0.0  ;;  %v993_v59 = vand.u32 2147483647, %v929_v19  ;;  %v1179_v35 = vadd.f32 %v1115_v57, %v7680_v1  ;;  %4685 = vmatpush1.bf16.msra.mxu0 %v7681_v20  ;;  %v7682_v14 = vld [vmem:[#allocation37_spill] sm:$0xff]  ;;  %v7687_v27 = vld [vmem:[#allocation54_spill] sm:$0xff] }
 0x1a0   : > { %v6303_v49 = vpop.permute.xlu0 %875  ;;  %v1583_v16 = vsub.f32 1.0, %v1551_v17  ;;  %v1553_v52 = vand.u32 2147483647, %v1521_v45  ;;  %v1523_v22 = vsub.f32 %v5654_v28, %v7682_v14  ;;  %v930_v42 = vsub.f32 %v5654_v28, %v7679_v60  ;;  %3655 = vmatmul.mubr.f32.gmra.mrb[18].mxu0 %v1176_v58  ;;  %4686 = vmatprep.subr.bf16.mxu0 %v7490_v61  ;;  %v7684_v17 = vld [vmem:[#allocation41_spill] sm:$0xff]  ;;  %v7685_v14 = vld [vmem:[#allocation102_spill] sm:$0xff] }
 0x1a1   : > { %v1525_v25 = vsub.f32 %v5654_v28, %v7683_v46  ;;  %v1054_v34 = vsub.f32 1.0, %v990_v8  ;;  %2409 = vperm.xlu0 %4889, %v4437_v41   ;;  %3659 = vmatprep.mubr.f32.mxu0 %v1179_v35  ;;  %v6314_v57 = vpop.permute.xlu1 %1680  ;;  %v4438_v19 = vadd.f32 20.0, %v1985_v26  ;;  %v1986_v45 = vmul.f32 0.002, %v7684_v17  ;;  %v7686_v8 = vld [vmem:[#allocation101_spill] sm:$0xff] }
 0x1a2   : > { %v1119_v54 = vmax.f32 %v1055_v43, 0.0  ;;  %v1116_v1 = vmax.f32 %v1052_v7, 0.0  ;;  %v992_v20 = vand.u32 2147483647, %v928_v62  ;;  %2141 = vperm.xlu1 %4875, %v4436_v2   ;;  %v1178_v60 = vadd.f32 %v1114_v53, %v7685_v14  ;;  %v7688_v53 = vld [vmem:[#allocation83_spill] sm:$0xff] }
 0x1a3   : > { %v995_v58 = vand.u32 2147483647, %v931_v47  ;;  %v1057_v30 = vsub.f32 1.0, %v993_v59  ;;  %v933_v0 = vsub.f32 %v5659_v11, %v6207_v13  ;;  %v1181_v35 = vadd.f32 %v1117_v40, %v7686_v8  ;;  %4688 = vmatpush1.bf16.msra.mxu0 %v7687_v27  ;;  %v7689_v40 = vld [vmem:[#allocation40_spill] sm:$0xff] }
 0x1a4   : > { %v6320_v46 = vpop.permute.xlu0 %883  ;;  %v6324_v26 = vmax.f32 %v1583_v16, 0.0  ;;  %v1585_v17 = vsub.f32 1.0, %v1553_v52  ;;  %v1555_v43 = vand.u32 2147483647, %v1523_v22  ;;  %v994_v7 = vand.u32 2147483647, %v930_v42  ;;  %3660 = vmatmul.mubr.f32.gmra.mrb[20].mxu0 %v1178_v60  ;;  %4689 = vmatprep.subr.bf16.mxu0 %v7490_v61 }
 0x1a5   : > { %v1557_v2 = vand.u32 2147483647, %v1525_v25  ;;  %v935_v62 = vsub.f32 %v5659_v11, %v7688_v53  ;;  %2413 = vperm.xlu0 %4889, %v4438_v19   ;;  %3664 = vmatprep.mubr.f32.mxu0 %v1181_v35  ;;  %v6329_v47 = vpop.permute.xlu1 %1688  ;;  %v4439_v59 = vadd.f32 20.0, %v1986_v45  ;;  %v1987_v14 = vmul.f32 0.002, %v7689_v40  ;;  %v7690_v52 = vld [vmem:[#allocation100_spill] sm:$0xff] }
 0x1a6   : > { %v1118_v27 = vmax.f32 %v1054_v34, 0.0  ;;  %v1056_v16 = vsub.f32 1.0, %v992_v20  ;;  %v932_v22 = vsub.f32 %v5654_v28, %v6207_v13  ;;  %2146 = vperm.xlu1 %4875, %v4437_v41   ;;  %v1180_v42 = vadd.f32 %v1116_v1, %v7690_v52  ;;  %v7692_v34 = vld [vmem:[#allocation81_spill] sm:$0xff] }
 0x1a7   : > { %v1059_v60 = vsub.f32 1.0, %v995_v58  ;;  %v1121_v25 = vmax.f32 %v1057_v30, 0.0  ;;  %v997_v8 = vand.u32 2147483647, %v933_v0  ;;  %v1183_v35 = vadd.f32 %v1119_v54, %v7691_v24  ;;  %4691 = vmatpush1.bf16.msra.mxu0 %v6088_v33  ;;  %v7693_v33 = vld [vmem:[#allocation43_spill] sm:$0xff] }
 0x1a8   : > { %v6335_v36 = vpop.permute.xlu0 %891  ;;  %v6339_v45 = vmax.f32 %v1585_v17, 0.0  ;;  %v1587_v40 = vsub.f32 1.0, %v1555_v43  ;;  %v1527_v20 = vsub.f32 %v5654_v28, %v7692_v34  ;;  %v1058_v50 = vsub.f32 1.0, %v994_v7  ;;  %3665 = vmatmul.mubr.f32.gmra.mrb[22].mxu0 %v1180_v42  ;;  %4692 = vmatprep.subr.bf16.mxu0 %v7490_v61  ;;  %v7694_v58 = vld [vmem:[#allocation107_spill] sm:$0xff] }
 0x1a9   : > { %v934_v30 = vsub.f32 %v5654_v28, %v7688_v53  ;;  %v999_v13 = vand.u32 2147483647, %v935_v62  ;;  %2417 = vperm.xlu0 %4889, %v4439_v59   ;;  %3669 = vmatprep.mubr.f32.mxu0 %v1183_v35  ;;  %v6346_v0 = vpop.permute.xlu1 %1696  ;;  %v4440_v24 = vadd.f32 20.0, %v1987_v14  ;;  %v1988_v41 = vmul.f32 0.002, %v7693_v33  ;;  %v7695_v62 = vld [vmem:[#allocation106_spill] sm:$0xff] }
 0x1aa   : > { %v1589_v17 = vsub.f32 1.0, %v1557_v2  ;;  %v1120_v54 = vmax.f32 %v1056_v16, 0.0  ;;  %v996_v1 = vand.u32 2147483647, %v932_v22  ;;  %2151 = vperm.xlu1 %4875, %v4438_v19   ;;  %v1182_v43 = vadd.f32 %v1118_v27, %v7694_v58  ;;  %v7697_v16 = vld [vmem:[#allocation44_spill] sm:$0xff]  ;;  %v7704_v33 = vld [vmem:[#allocation117_spill] sm:$0xff] }
 0x1ab   : > { %v1123_v7 = vmax.f32 %v1059_v60, 0.0  ;;  %v1061_v52 = vsub.f32 1.0, %v997_v8  ;;  %v937_v42 = vsub.f32 %v5659_v11, %v6229_v51  ;;  %v1185_v35 = vadd.f32 %v1121_v25, %v7695_v62  ;;  %4694 = vmatpush1.bf16.msra.mxu0 %v6110_v15  ;;  %v7699_v8 = vld [vmem:[#allocation42_spill] sm:$0xff] }
 0x1ac   : > { %v6352_v53 = vpop.permute.xlu0 %899  ;;  %v6356_v14 = vmax.f32 %v1587_v40, 0.0  ;;  %v6358_v34 = vand.u32 2147483647, %v1527_v20  ;;  %v1122_v2 = vmax.f32 %v1058_v50, 0.0  ;;  %v1529_v19 = vsub.f32 %v5654_v28, %v7697_v16  ;;  %3670 = vmatmul.mubr.f32.gmra.mrb[24].mxu0 %v1182_v43  ;;  %4695 = vmatprep.subr.bf16.mxu0 %v7490_v61  ;;  %v7700_v40 = vld [vmem:[#allocation84_spill] sm:$0xff]  ;;  %v7701_v43 = vld [vmem:[#allocation105_spill] sm:$0xff] }
 0x1ad   : > { %v998_v27 = vand.u32 2147483647, %v934_v30  ;;  %v1063_v22 = vsub.f32 1.0, %v999_v13  ;;  %2421 = vperm.xlu0 %4889, %v4440_v24   ;;  %3674 = vmatprep.mubr.f32.mxu0 %v1185_v35  ;;  %v6363_v60 = vpop.permute.xlu1 %1704  ;;  %v4441_v25 = vadd.f32 20.0, %v1988_v41  ;;  %v1989_v15 = vmul.f32 0.002, %v7699_v8 }
 0x1ae   : > { %7696 = vst [vmem:[#allocation73_spill] sm:$0xff] %v6356_v14  ;;  %7698 = vst [vmem:[#allocation31_spill] sm:$0xff] %v6363_v60  ;;  %v939_v20 = vsub.f32 %v5659_v11, %v7700_v40  ;;  %v1060_v58 = vsub.f32 1.0, %v996_v1  ;;  %v936_v50 = vsub.f32 %v5654_v28, %v6229_v51  ;;  %2156 = vperm.xlu1 %4875, %v4439_v59   ;;  %v6371_v16 = vmax.f32 %v1589_v17, 0.0  ;;  %v7705_v1 = vld [vmem:[#allocation47_spill] sm:$0xff] }
 0x1af   : > { %v1184_v62 = vadd.f32 %v1120_v54, %v7701_v43  ;;  %v1125_v30 = vmax.f32 %v1061_v52, 0.0  ;;  %v1001_v13 = vand.u32 2147483647, %v937_v42  ;;  %v1187_v41 = vadd.f32 %v1123_v7, %v7704_v33  ;;  %4697 = vmatpush1.bf16.msra.mxu0 %v6133_v3  ;;  %v7707_v3 = vld [vmem:[#allocation46_spill] sm:$0xff] }
 0x1b0   : > { %7702 = vst [vmem:[#allocation79_spill] sm:$0xff] %v6371_v16  ;;  %v6373_v35 = vpop.permute.xlu0 %1640  ;;  %v1591_v8 = vsub.f32 1.0, %v6358_v34  ;;  %v1561_v14 = vand.u32 2147483647, %v1529_v19  ;;  %v1531_v60 = vsub.f32 %v5654_v28, %v7705_v1  ;;  %v938_v51 = vsub.f32 %v5654_v28, %v7700_v40  ;;  %4698 = vmatprep.subr.bf16.mxu0 %v7490_v61  ;;  %v7708_v19 = vld [vmem:[#allocation115_spill] sm:$0xff]  ;;  %v7709_v1 = vld [vmem:[#allocation48_spill] sm:$0xff] }
 0x1b1   : > { %7703 = vst [vmem:[#allocation80_spill] sm:$0xff] %v6373_v35  ;;  %3675 = vmatmul.mubr.f32.gmra.mrb[26].mxu0 %v1184_v62  ;;  %v1062_v59 = vsub.f32 1.0, %v998_v27  ;;  %v1127_v17 = vmax.f32 %v1063_v22, 0.0  ;;  %2425 = vperm.xlu0 %4889, %v4441_v25   ;;  %v6383_v54 = vpop.permute.xlu1 %1712  ;;  %v4442_v33 = vadd.f32 20.0, %v1989_v15  ;;  %v1990_v7 = vmul.f32 0.002, %v7707_v3 }
 0x1b2   : > { %3679 = vmatprep.mubr.f32.mxu0 %v1187_v41  ;;  %7706 = vst [vmem:[#allocation134_spill] sm:$0xff] %v6383_v54  ;;  %v1003_v52 = vand.u32 2147483647, %v939_v20  ;;  %v1124_v42 = vmax.f32 %v1060_v58, 0.0  ;;  %v1000_v34 = vand.u32 2147483647, %v936_v50  ;;  %2161 = vperm.xlu1 %4875, %v4440_v24   ;;  %v1186_v43 = vadd.f32 %v1122_v2, %v7708_v19 }
 0x1b3   : > { %v1533_v40 = vsub.f32 %v5654_v28, %v7709_v1  ;;  %v1065_v62 = vsub.f32 1.0, %v1001_v13  ;;  %v941_v27 = vsub.f32 %v5659_v11, %v6250_v44  ;;  %v7711_v41 = vld [vmem:[#allocation114_spill] sm:$0xff]  ;;  %4700 = vmatpush1.bf16.msra.mxu0 %v6158_v56  ;;  %v1593_v15 = vsub.f32 1.0, %v1561_v14  ;;  %v7712_v50 = vld [vmem:[#allocation85_spill] sm:$0xff] }
 0x1b4   : > { %v6391_v22 = vpop.permute.xlu0 %1652  ;;  %v1189_v35 = vadd.f32 %v1125_v30, %v7711_v41  ;;  %v1563_v20 = vand.u32 2147483647, %v1531_v60  ;;  %v1002_v58 = vand.u32 2147483647, %v938_v51  ;;  %v942_v24 = vsub.f32 %v5654_v28, %v7712_v50  ;;  %4701 = vmatprep.subr.bf16.mxu0 %v7490_v61  ;;  %v7714_v1 = vld [vmem:[#allocation45_spill] sm:$0xff]  ;;  %v7770_v54 = vld [vmem:[#allocation66_spill] sm:$0xff] }
 0x1b5   : > { %7710 = vst [vmem:[#allocation30_spill] sm:$0xff] %v6391_v22  ;;  %3680 = vmatmul.mubr.f32.gmra.mrb[28].mxu0 %v1186_v43  ;;  %v1126_v2 = vmax.f32 %v1062_v59, 0.0  ;;  %v943_v13 = vsub.f32 %v5659_v11, %v7712_v50  ;;  %2429 = vperm.xlu0 %4889, %v4442_v33   ;;  %v6400_v19 = vpop.permute.xlu1 %1720  ;;  %v4443_v30 = vadd.f32 20.0, %v1990_v7  ;;  %v1991_v56 = vmul.f32 0.002, %v7714_v1  ;;  %v7715_v43 = vld [vmem:[#allocation111_spill] sm:$0xff] }
 0x1b6   : > { %3684 = vmatprep.mubr.f32.mxu0 %v1189_v35  ;;  %7713 = vst [vmem:[#allocation99_spill] sm:$0xff] %v6400_v19  ;;  %v1067_v14 = vsub.f32 1.0, %v1003_v52  ;;  %v1064_v60 = vsub.f32 1.0, %v1000_v34  ;;  %v940_v51 = vsub.f32 %v5654_v28, %v6250_v44  ;;  %2166 = vperm.xlu1 %4875, %v4441_v25   ;;  %v1188_v41 = vadd.f32 %v1124_v42, %v7715_v43  ;;  %v7717_v50 = vld [vmem:[#allocation124_spill] sm:$0xff] }
 0x1b7   : > { %v1565_v22 = vand.u32 2147483647, %v1533_v40  ;;  %v1129_v59 = vmax.f32 %v1065_v62, 0.0  ;;  %v1005_v3 = vand.u32 2147483647, %v941_v27  ;;  %v1191_v35 = vadd.f32 %v1127_v17, %v7717_v50  ;;  %4703 = vmatpush1.bf16.msra.mxu0 %v6182_v4  ;;  %v7721_v17 = vld [vmem:[#allocation10_spill] sm:$0xff] }
 0x1b8   : > { %v6406_v16 = vpop.permute.xlu0 %1660  ;;  %v6410_v7 = vmax.f32 %v1591_v8, 0.0  ;;  %v1595_v1 = vsub.f32 1.0, %v1563_v20  ;;  %v1066_v52 = vsub.f32 1.0, %v1002_v58  ;;  %v6412_v34 = vand.u32 2147483647, %v942_v24  ;;  %4704 = vmatprep.subr.bf16.mxu0 %v7490_v61  ;;  %v7722_v20 = vld [vmem:[#allocation122_spill] sm:$0xff] }
 0x1b9   : > { %7716 = vst [vmem:[#allocation97_spill] sm:$0xff] %v6406_v16  ;;  %3685 = vmatmul.mubr.f32.gmra.mrb[30].mxu0 %v1188_v41  ;;  %v6415_v44 = vmax.f32 %v1593_v15, 0.0  ;;  %v1007_v25 = vand.u32 2147483647, %v943_v13  ;;  %2433 = vperm.xlu0 %4889, %v4443_v30   ;;  %v6417_v42 = vpop.permute.xlu1 %1728  ;;  %v4444_v40 = vadd.f32 20.0, %v1991_v56  ;;  %v1131_v4 = vmax.f32 %v1067_v14, 0.0 }
 0x1ba   : > { %7718 = vst [vmem:[#allocation138_spill] sm:$0xff] %v6410_v7  ;;  %3689 = vmatprep.mubr.f32.mxu0 %v1191_v35  ;;  %7720 = vst [vmem:[#allocation36_spill] sm:$0xff] %v6417_v42  ;;  %v2633_v62 = vmul.f32 0.001, %v7721_v17  ;;  %v1128_v8 = vmax.f32 %v1064_v60, 0.0  ;;  %2171 = vperm.xlu1 %4875, %v4442_v33   ;;  %v1190_v58 = vadd.f32 %v1126_v2, %v7722_v20  ;;  %v1597_v24 = vsub.f32 1.0, %v1565_v22 }
 0x1bb   : > { %7719 = vst [vmem:[#allocation34_spill] sm:$0xff] %v6415_v44  ;;  %v1004_v27 = vand.u32 2147483647, %v940_v51  ;;  %v1069_v43 = vsub.f32 1.0, %v1005_v3  ;;  %v945_v61 = vsub.f32 %v5659_v11, %v6265_v9  ;;  %v7724_v13 = vld [vmem:[#allocation121_spill] sm:$0xff]  ;;  %4706 = vmatpush1.bf16.msra.mxu0 %v6203_v31  ;;  %v6427_v56 = vmax.f32 %v1595_v1, 0.0 }
 0x1bc   : > { %v6423_v15 = vpop.permute.xlu0 %1668  ;;  %v1193_v41 = vadd.f32 %v1129_v59, %v7724_v13  ;;  %v1130_v50 = vmax.f32 %v1066_v52, 0.0  ;;  %v7726_v14 = vld [vmem:[#allocation86_spill] sm:$0xff]  ;;  %v7727_v33 = vld [vmem:[#allocation87_spill] sm:$0xff]  ;;  %v1070_v3 = vsub.f32 1.0, %v6412_v34  ;;  %v1071_v22 = vsub.f32 1.0, %v1007_v25  ;;  %v7729_v35 = vld [vmem:[#allocation12_spill] sm:$0xff] }
 0x1bd   : > { %7723 = vst [vmem:[#allocation96_spill] sm:$0xff] %v6423_v15  ;;  %7725 = vst [vmem:[#allocation82_spill] sm:$0xff] %v6427_v56  ;;  %v1535_v60 = vsub.f32 %v5654_v28, %v7726_v14  ;;  %v946_v2 = vsub.f32 %v5654_v28, %v7727_v33  ;;  %3690 = vmatmul.mubr.f32.gmra.mrb[32].mxu0 %v1190_v58  ;;  %2437 = vperm.xlu0 %4889, %v4444_v40   ;;  %v6434_v51 = vpop.permute.xlu1 %1736  ;;  %v4445_v59 = vadd.f32 10.0, %v2633_v62  ;;  %v7730_v20 = vld [vmem:[#allocation120_spill] sm:$0xff]  ;;  %v7732_v14 = vld [vmem:[#allocation129_spill] sm:$0xff] }
 0x1be   : > { %3694 = vmatprep.mubr.f32.mxu0 %v1193_v41  ;;  %7728 = vst [vmem:[#allocation104_spill] sm:$0xff] %v6434_v51  ;;  %v2634_v31 = vmul.f32 0.001, %v7729_v35  ;;  %v947_v1 = vsub.f32 %v5659_v11, %v7727_v33  ;;  %v1068_v52 = vsub.f32 1.0, %v1004_v27  ;;  %v944_v17 = vsub.f32 %v5654_v28, %v6265_v9  ;;  %2176 = vperm.xlu1 %4875, %v4443_v30   ;;  %v7733_v16 = vld [vmem:[#allocation88_spill] sm:$0xff]  ;;  %v7734_v33 = vld [vmem:[#allocation89_spill] sm:$0xff] }
 0x1bf   : > { %v1192_v58 = vadd.f32 %v1128_v8, %v7730_v20  ;;  %v6442_v13 = vmax.f32 %v1597_v24, 0.0  ;;  %v1133_v34 = vmax.f32 %v1069_v43, 0.0  ;;  %v1009_v25 = vand.u32 2147483647, %v945_v61  ;;  %v3529_v30 = vld [vmem:[#allocation3 + $0x200] sm:$0xff]  ;;  %v3530_v8 = vld [vmem:[#allocation3 + $0x208] sm:$0xff] }
 0x1c0   : > { %v6444_v41 = vpop.permute.xlu0 %1676  ;;  %v1195_v62 = vadd.f32 %v1131_v4, %v7732_v14  ;;  %v1567_v15 = vand.u32 2147483647, %v1535_v60  ;;  %v6447_v35 = vand.u32 2147483647, %v946_v2  ;;  %v1537_v27 = vsub.f32 %v5654_v28, %v7733_v16  ;;  %v7736_v61 = vld [vmem:[#allocation9_spill] sm:$0xff] }
 0x1c1   : > { %7731 = vst [vmem:[#allocation145_spill] sm:$0xff] %v6442_v13  ;;  %v950_v9 = vsub.f32 %v5654_v28, %v7734_v33  ;;  %3695 = vmatmul.mubr.f32.gmra.mrb[34].mxu0 %v1192_v58  ;;  %v951_v24 = vsub.f32 %v5659_v11, %v7734_v33  ;;  %2986 = vperm.xlu0 %4889, %v4445_v59   ;;  %v6455_v43 = vpop.permute.xlu1 %1744  ;;  %v4446_v4 = vadd.f32 10.0, %v2634_v31  ;;  %v2635_v60 = vmul.f32 0.001, %v7736_v61  ;;  %v7737_v13 = vld [vmem:[#allocation127_spill] sm:$0xff] }
 0x1c2   : > { %3699 = vmatprep.mubr.f32.mxu0 %v1195_v62  ;;  %7735 = vst [vmem:[#allocation37_spill] sm:$0xff] %v6455_v43  ;;  %v6458_v2 = vpack.c.bf16 %v3530_v8, %v3529_v30  ;;  %v1011_v20 = vand.u32 2147483647, %v947_v1  ;;  %v1132_v16 = vmax.f32 %v1068_v52, 0.0  ;;  %v1008_v14 = vand.u32 2147483647, %v944_v17  ;;  %2181 = vperm.xlu1 %4875, %v4444_v40  }
 0x1c3   : > { %v1194_v58 = vadd.f32 %v1130_v50, %v7737_v13  ;;  %v1135_v56 = vmax.f32 %v1071_v22, 0.0  ;;  %v1073_v51 = vsub.f32 1.0, %v1009_v25  ;;  %v949_v33 = vsub.f32 %v5659_v11, %v6284_v12  ;;  %v7738_v62 = vld [vmem:[#allocation126_spill] sm:$0xff]  ;;  %v7740_v17 = vld [vmem:[#allocation11_spill] sm:$0xff] }
 0x1c4   : > { %v6463_v44 = vpop.permute.xlu0 %1684  ;;  %v1197_v43 = vadd.f32 %v1133_v34, %v7738_v62  ;;  %4708 = vmatprep.subr.bf16.mxu1 %v6458_v2  ;;  %v1134_v31 = vmax.f32 %v1070_v3, 0.0  ;;  %v1599_v30 = vsub.f32 1.0, %v1567_v15  ;;  %v1569_v8 = vand.u32 2147483647, %v1537_v27  ;;  %v7741_v15 = vld [vmem:[#allocation125_spill] sm:$0xff]  ;;  %v7742_v27 = vld [vmem:[#allocation90_spill] sm:$0xff] }
 0x1c5   : > { %v1014_v1 = vand.u32 2147483647, %v950_v9  ;;  %3700 = vmatmul.mubr.f32.gmra.mrb[36].mxu0 %v1194_v58  ;;  %v1074_v40 = vsub.f32 1.0, %v6447_v35  ;;  %v1015_v52 = vand.u32 2147483647, %v951_v24  ;;  %2990 = vperm.xlu0 %4889, %v4446_v4   ;;  %v6468_v50 = vpop.permute.xlu1 %1752  ;;  %v4447_v22 = vadd.f32 10.0, %v2635_v60 }
 0x1c6   : > { %3704 = vmatprep.mubr.f32.mxu0 %v1197_v43  ;;  %7739 = vst [vmem:[#allocation39_spill] sm:$0xff] %v6468_v50  ;;  %v2636_v13 = vmul.f32 0.001, %v7740_v17  ;;  %v1075_v25 = vsub.f32 1.0, %v1011_v20  ;;  %v1072_v61 = vsub.f32 1.0, %v1008_v14  ;;  %v948_v34 = vsub.f32 %v5654_v28, %v6284_v12  ;;  %2699 = vperm.xlu1 %4875, %v4445_v59   ;;  %v7743_v43 = vld [vmem:[#allocation136_spill] sm:$0xff] }
 0x1c7   : > { %v1196_v3 = vadd.f32 %v1132_v16, %v7741_v15  ;;  %v1539_v9 = vsub.f32 %v5654_v28, %v7742_v27  ;;  %v1137_v35 = vmax.f32 %v1073_v51, 0.0  ;;  %v1013_v24 = vand.u32 2147483647, %v949_v33  ;;  %v7745_v14 = vld [vmem:[#allocation91_spill] sm:$0xff]  ;;  %v7747_v33 = vld [vmem:[#allocation14_spill] sm:$0xff] }
 0x1c8   : > { %v6476_v58 = vpop.permute.xlu0 %1692  ;;  %v1199_v62 = vadd.f32 %v1135_v56, %v7743_v43  ;;  %v6479_v60 = vmax.f32 %v1599_v30, 0.0  ;;  %v1601_v17 = vsub.f32 1.0, %v1569_v8  ;;  %v1078_v20 = vsub.f32 1.0, %v1014_v1  ;;  %v7748_v8 = vld [vmem:[#allocation135_spill] sm:$0xff] }
 0x1c9   : > { %v954_v50 = vsub.f32 %v5654_v28, %v7745_v14  ;;  %3705 = vmatmul.mubr.f32.gmra.mrb[38].mxu0 %v1196_v3  ;;  %v1079_v12 = vsub.f32 1.0, %v1015_v52  ;;  %v955_v59 = vsub.f32 %v5659_v11, %v7745_v14  ;;  %2994 = vperm.xlu0 %4889, %v4447_v22   ;;  %v6485_v51 = vpop.permute.xlu1 %1760  ;;  %v4448_v16 = vadd.f32 10.0, %v2636_v13  ;;  %v7749_v14 = vld [vmem:[#allocation132_spill] sm:$0xff] }
 0x1ca   : > { %7744 = vst [vmem:[#allocation102_spill] sm:$0xff] %v6479_v60  ;;  %3709 = vmatprep.mubr.f32.mxu0 %v1199_v62  ;;  %7746 = vst [vmem:[#allocation101_spill] sm:$0xff] %v6485_v51  ;;  %v2637_v15 = vmul.f32 0.001, %v7747_v33  ;;  %v1139_v56 = vmax.f32 %v1075_v25, 0.0  ;;  %v1136_v30 = vmax.f32 %v1072_v61, 0.0  ;;  %2704 = vperm.xlu1 %4875, %v4446_v4   ;;  %v1198_v1 = vadd.f32 %v1134_v31, %v7748_v8 }
 0x1cb   : > { %v1012_v27 = vand.u32 2147483647, %v948_v34  ;;  %v1571_v43 = vand.u32 2147483647, %v1539_v9  ;;  %v1077_v60 = vsub.f32 1.0, %v1013_v24  ;;  %v953_v52 = vsub.f32 %v5659_v11, %v6303_v49  ;;  %v7751_v34 = vld [vmem:[#allocation13_spill] sm:$0xff] }
 0x1cc   : > { %v6491_v3 = vpop.permute.xlu0 %1700  ;;  %v1201_v62 = vadd.f32 %v1137_v35, %v7749_v14  ;;  %v1138_v42 = vmax.f32 %v1074_v40, 0.0  ;;  %v6494_v51 = vmax.f32 %v1601_v17, 0.0  ;;  %v6496_v13 = vmax.f32 %v1078_v20, 0.0  ;;  %v7752_v24 = vld [vmem:[#allocation93_spill] sm:$0xff]  ;;  %v7754_v17 = vld [vmem:[#allocation131_spill] sm:$0xff] }
 0x1cd   : > { %v1018_v25 = vand.u32 2147483647, %v954_v50  ;;  %3710 = vmatmul.mubr.f32.gmra.mrb[40].mxu0 %v1198_v1  ;;  %v1143_v61 = vmax.f32 %v1079_v12, 0.0  ;;  %v1019_v4 = vand.u32 2147483647, %v955_v59  ;;  %2998 = vperm.xlu0 %4889, %v4448_v16   ;;  %v4449_v31 = vadd.f32 10.0, %v2637_v15 }
 0x1ce   : > { %7750 = vst [vmem:[#allocation54_spill] sm:$0xff] %v6494_v51  ;;  %3714 = vmatprep.mubr.f32.mxu0 %v1201_v62  ;;  %v2638_v9 = vmul.f32 0.001, %v7751_v34  ;;  %v958_v33 = vsub.f32 %v5654_v28, %v7752_v24  ;;  %v1076_v8 = vsub.f32 1.0, %v1012_v27  ;;  %v952_v40 = vsub.f32 %v5654_v28, %v6303_v49  ;;  %2709 = vperm.xlu1 %4875, %v4447_v22   ;;  %v6503_v35 = vpop.permute.xlu1 %2026  ;;  %v7755_v15 = vld [vmem:[#allocation74_spill] sm:$0xff]  ;;  %v7757_v49 = vld [vmem:[#allocation95_spill] sm:$0xff] }
 0x1cf   : > { %7753 = vst [vmem:[#allocation83_spill] sm:$0xff] %v6503_v35  ;;  %v1200_v50 = vadd.f32 %v1136_v30, %v7754_v17  ;;  %v1603_v20 = vsub.f32 1.0, %v1571_v43  ;;  %v1141_v12 = vmax.f32 %v1077_v60, 0.0  ;;  %v1017_v59 = vand.u32 2147483647, %v953_v52  ;;  %v7758_v43 = vld [vmem:[#allocation16_spill] sm:$0xff] }
 0x1d0   : > { %v6506_v1 = vpop.permute.xlu0 %1708  ;;  %v1203_v14 = vadd.f32 %v1139_v56, %v7755_v15  ;;  %v1082_v62 = vsub.f32 1.0, %v1018_v25  ;;  %v959_v27 = vsub.f32 %v5659_v11, %v7752_v24  ;;  %v962_v22 = vsub.f32 %v5654_v28, %v7757_v49  ;;  %v7760_v24 = vld [vmem:[#allocation141_spill] sm:$0xff] }
 0x1d1   : > { %3715 = vmatmul.mubr.f32.gmra.mrb[42].mxu0 %v1200_v50  ;;  %v1083_v35 = vsub.f32 1.0, %v1019_v4  ;;  %v963_v60 = vsub.f32 %v5659_v11, %v7757_v49  ;;  %3002 = vperm.xlu0 %4889, %v4449_v31   ;;  %v4450_v30 = vadd.f32 10.0, %v2638_v9  ;;  %v2639_v56 = vmul.f32 0.001, %v7758_v43 }
 0x1d2   : > { %3719 = vmatprep.mubr.f32.mxu0 %v1203_v14  ;;  %v1022_v52 = vand.u32 2147483647, %v958_v33  ;;  %v1140_v25 = vmax.f32 %v1076_v8, 0.0  ;;  %v1016_v17 = vand.u32 2147483647, %v952_v40  ;;  %2714 = vperm.xlu1 %4875, %v4448_v16   ;;  %v6518_v15 = vpop.permute.xlu1 %2036  ;;  %v1202_v51 = vadd.f32 %v1138_v42, %v7760_v24  ;;  %v7763_v14 = vld [vmem:[#allocation140_spill] sm:$0xff] }
 0x1d3   : > { %7759 = vst [vmem:[#allocation100_spill] sm:$0xff] %v6518_v15  ;;  %v6521_v34 = vmax.f32 %v1603_v20, 0.0  ;;  %v1081_v50 = vsub.f32 1.0, %v1017_v59  ;;  %v957_v4 = vsub.f32 %v5659_v11, %v6320_v46  ;;  %v1205_v9 = vadd.f32 %v1141_v12, %v7763_v14  ;;  %v7764_v33 = vld [vmem:[#allocation64_spill] sm:$0xff]  ;;  %v7766_v24 = vld [vmem:[#allocation15_spill] sm:$0xff] }
 0x1d4   : > { %v6525_v49 = vpop.permute.xlu0 %1716  ;;  %v1023_v7 = vand.u32 2147483647, %v959_v27  ;;  %v1026_v43 = vand.u32 2147483647, %v962_v22  ;;  %v2194_v8 = vsub.f32 %v5654_v28, %v7764_v33  ;;  %v7765_v16 = vld [vmem:[#allocation116_spill] sm:$0xff]  ;;  %v6532_v42 = vmax.f32 %v1082_v62, 0.0 }
 0x1d5   : > { %7761 = vst [vmem:[#allocation109_spill] sm:$0xff] %v6521_v34  ;;  %7762 = vst [vmem:[#allocation81_spill] sm:$0xff] %v6525_v49  ;;  %v2196_v40 = vsub.f32 %v5654_v28, %v7765_v16  ;;  %3720 = vmatmul.mubr.f32.gmra.mrb[44].mxu0 %v1202_v51  ;;  %v1027_v20 = vand.u32 2147483647, %v963_v60  ;;  %3006 = vperm.xlu0 %4889, %v4450_v30   ;;  %v4451_v59 = vadd.f32 10.0, %v2639_v56  ;;  %v1086_v34 = vsub.f32 1.0, %v1022_v52 }
 0x1d6   : > { %3724 = vmatprep.mubr.f32.mxu0 %v1205_v9  ;;  %v2640_v15 = vmul.f32 0.001, %v7766_v24  ;;  %v1080_v19 = vsub.f32 1.0, %v1016_v17  ;;  %v956_v12 = vsub.f32 %v5654_v28, %v6320_v46  ;;  %2719 = vperm.xlu1 %4875, %v4449_v31   ;;  %v6537_v27 = vpop.permute.xlu1 %2041  ;;  %v7768_v22 = vld [vmem:[#allocation139_spill] sm:$0xff]  ;;  %v1147_v33 = vmax.f32 %v1083_v35, 0.0 }
 0x1d7   : > { %7767 = vst [vmem:[#allocation107_spill] sm:$0xff] %v6537_v27  ;;  %v1204_v14 = vadd.f32 %v1140_v25, %v7768_v22  ;;  %v1145_v51 = vmax.f32 %v1081_v50, 0.0  ;;  %v1021_v62 = vand.u32 2147483647, %v957_v4  ;;  %v7769_v60 = vld [vmem:[#allocation147_spill] sm:$0xff]  ;;  %v1087_v56 = vsub.f32 1.0, %v1023_v7 }
 0x1d8   : > { %v6540_v16 = vpop.permute.xlu0 %1724  ;;  %v1207_v9 = vadd.f32 %v1143_v61, %v7769_v60  ;;  %v1090_v49 = vsub.f32 1.0, %v1026_v43  ;;  %v2226_v24 = vand.u32 2147483647, %v2194_v8  ;;  %v2228_v52 = vand.u32 2147483647, %v2196_v40  ;;  %v7771_v25 = vld [vmem:[#allocation18_spill] sm:$0xff] }
 0x1d9   : > { %3725 = vmatmul.mubr.f32.gmra.mrb[46].mxu0 %v1204_v14  ;;  %v1091_v17 = vsub.f32 1.0, %v1027_v20  ;;  %v2198_v46 = vsub.f32 %v5654_v28, %v7770_v54  ;;  %3010 = vperm.xlu0 %4889, %v4451_v59   ;;  %v4452_v31 = vadd.f32 10.0, %v2640_v15  ;;  %v2641_v35 = vmul.f32 0.001, %v7771_v25  ;;  %v7773_v7 = vld [vmem:[#allocation146_spill] sm:$0xff]  ;;  %v7774_v43 = vld [vmem:[#allocation108_spill] sm:$0xff] }
 0x1da   : > { %3729 = vmatprep.mubr.f32.mxu0 %v1207_v9  ;;  %v1150_v50 = vmax.f32 %v1086_v34, 0.0  ;;  %v1144_v4 = vmax.f32 %v1080_v19, 0.0  ;;  %v1020_v22 = vand.u32 2147483647, %v956_v12  ;;  %2724 = vperm.xlu1 %4875, %v4450_v30   ;;  %v6546_v27 = vpop.permute.xlu1 %2051  ;;  %v1206_v61 = vadd.f32 %v6496_v13, %v7773_v7  ;;  %v7775_v15 = vld [vmem:[#allocation144_spill] sm:$0xff]  ;;  %v7776_v25 = vld [vmem:[#allocation17_spill] sm:$0xff] }
 0x1db   : > { %7772 = vst [vmem:[#allocation106_spill] sm:$0xff] %v6546_v27  ;;  %v2192_v8 = vsub.f32 %v5654_v28, %v7774_v43  ;;  %v1085_v40 = vsub.f32 1.0, %v1021_v62  ;;  %v961_v54 = vsub.f32 %v5659_v11, %v6335_v36  ;;  %v1209_v14 = vadd.f32 %v1145_v51, %v7775_v15  ;;  %v7777_v7 = vld [vmem:[#allocation123_spill] sm:$0xff] }
 0x1dc   : > { %v6554_v20 = vpop.permute.xlu0 %1732  ;;  %v1151_v34 = vmax.f32 %v1087_v56, 0.0  ;;  %v6557_v19 = vmax.f32 %v1090_v49, 0.0  ;;  %v2258_v30 = vsub.f32 1.0, %v2226_v24  ;;  %v2260_v12 = vsub.f32 1.0, %v2228_v52  ;;  %v7778_v56 = vld [vmem:[#allocation143_spill] sm:$0xff] }
 0x1dd   : > { %3730 = vmatmul.mubr.f32.gmra.mrb[48].mxu0 %v1206_v61  ;;  %v1155_v60 = vmax.f32 %v1091_v17, 0.0  ;;  %v2230_v9 = vand.u32 2147483647, %v2198_v46  ;;  %3014 = vperm.xlu0 %4889, %v4452_v31   ;;  %v4453_v13 = vadd.f32 10.0, %v2641_v35  ;;  %v2642_v62 = vmul.f32 0.001, %v7776_v25 }
 0x1de   : > { %3734 = vmatprep.mubr.f32.mxu0 %v1209_v14  ;;  %v1520_v43 = vsub.f32 %v5654_v28, %v7777_v7  ;;  %v1084_v27 = vsub.f32 1.0, %v1020_v22  ;;  %v960_v51 = vsub.f32 %v5654_v28, %v6335_v36  ;;  %2729 = vperm.xlu1 %4875, %v4451_v59   ;;  %v6564_v49 = vpop.permute.xlu1 %2061  ;;  %v1208_v24 = vadd.f32 %v1144_v4, %v7778_v56  ;;  %v7779_v22 = vld [vmem:[#allocation67_spill] sm:$0xff]  ;;  %v7781_v56 = vld [vmem:[#allocation130_spill] sm:$0xff] }
 0x1df   : > { %v6567_v52 = vand.u32 2147483647, %v2192_v8  ;;  %v1149_v17 = vmax.f32 %v1085_v40, 0.0  ;;  %v1025_v46 = vand.u32 2147483647, %v961_v54  ;;  %v1211_v35 = vadd.f32 %v1147_v33, %v6145_v6  ;;  %v7780_v54 = vld [vmem:[#allocation20_spill] sm:$0xff] }
 0x1e0   : > { %v6569_v61 = vpop.permute.xlu0 %1740  ;;  %v6572_v15 = vmax.f32 %v2258_v30, 0.0  ;;  %v6574_v14 = vmax.f32 %v2260_v12, 0.0  ;;  %v1522_v36 = vsub.f32 %v5654_v28, %v7779_v22  ;;  %v1210_v59 = vadd.f32 %v6532_v42, %v6118_v23 }
 0x1e1   : > { %3735 = vmatmul.mubr.f32.gmra.mrb[50].mxu0 %v1208_v24  ;;  %v2262_v4 = vsub.f32 1.0, %v2230_v9  ;;  %3018 = vperm.xlu0 %4889, %v4453_v13   ;;  %v4454_v8 = vadd.f32 10.0, %v2642_v62  ;;  %v1215_v40 = vadd.f32 %v1151_v34, %v6237_v10  ;;  %v2643_v25 = vmul.f32 0.001, %v7780_v54  ;;  %v7782_v62 = vld [vmem:[#allocation137_spill] sm:$0xff] }
 0x1e2   : > { %3739 = vmatprep.mubr.f32.mxu0 %v1211_v35  ;;  %v1552_v6 = vand.u32 2147483647, %v1520_v43  ;;  %v1148_v33 = vmax.f32 %v1084_v27, 0.0  ;;  %v1024_v30 = vand.u32 2147483647, %v960_v51  ;;  %2734 = vperm.xlu1 %4875, %v4452_v31   ;;  %v6582_v12 = vpop.permute.xlu1 %2071  ;;  %v1214_v7 = vadd.f32 %v1150_v50, %v6235_v55  ;;  %v7783_v31 = vld [vmem:[#allocation142_spill] sm:$0xff] }
 0x1e3   : > { %v1524_v24 = vsub.f32 %v5654_v28, %v7781_v56  ;;  %v1089_v23 = vsub.f32 1.0, %v1025_v46  ;;  %v965_v42 = vsub.f32 %v5659_v11, %v6352_v53  ;;  %v1213_v10 = vadd.f32 %v1149_v17, %v6107_v48  ;;  %v7784_v51 = vld [vmem:[#allocation77_spill] sm:$0xff]  ;;  %v7785_v48 = vld [vmem:[#allocation19_spill] sm:$0xff] }
 0x1e4   : > { %v6589_v9 = vpop.permute.xlu0 %1748  ;;  %v1554_v34 = vand.u32 2147483647, %v1522_v36  ;;  %v1526_v27 = vsub.f32 %v5654_v28, %v7782_v62  ;;  %v1528_v43 = vsub.f32 %v5654_v28, %v7783_v31  ;;  %v6597_v55 = vadd.f32 %v1155_v60, %v6290_v18  ;;  %v7786_v18 = vld [vmem:[#allocation70_spill] sm:$0xff] }
 0x1e5   : > { %3740 = vmatmul.mubr.f32.gmra.mrb[52].mxu0 %v1210_v59  ;;  %v6599_v50 = vmax.f32 %v2262_v4, 0.0  ;;  %v1530_v11 = vsub.f32 %v5654_v28, %v7784_v51  ;;  %3022 = vperm.xlu0 %4889, %v4454_v8   ;;  %v4455_v46 = vadd.f32 10.0, %v2643_v25  ;;  %v2644_v17 = vmul.f32 0.001, %v7785_v48 }
 0x1e6   : > { %3744 = vmatprep.mubr.f32.mxu0 %v1213_v10  ;;  %v1584_v35 = vsub.f32 1.0, %v1552_v6  ;;  %v1088_v22 = vsub.f32 1.0, %v1024_v30  ;;  %v964_v36 = vsub.f32 %v5654_v28, %v6352_v53  ;;  %2739 = vperm.xlu1 %4875, %v4453_v13   ;;  %v6606_v59 = vpop.permute.xlu1 %2081  ;;  %v1212_v60 = vadd.f32 %v1148_v33, %v7786_v18  ;;  %v7787_v30 = vld [vmem:[#allocation22_spill] sm:$0xff] }
 0x1e7   : > { %v1556_v4 = vand.u32 2147483647, %v1524_v24  ;;  %v1153_v54 = vmax.f32 %v1089_v23, 0.0  ;;  %v1029_v56 = vand.u32 2147483647, %v965_v42  ;;  %v2256_v10 = vsub.f32 1.0, %v6567_v52 }
 0x1e8   : > { %v6609_v62 = vpop.permute.xlu0 %1756  ;;  %v1586_v25 = vsub.f32 1.0, %v1554_v34  ;;  %v1558_v31 = vand.u32 2147483647, %v1526_v27  ;;  %v1560_v51 = vand.u32 2147483647, %v1528_v43  ;;  %v1775_v6 = vsub.f32 %v5654_v28, %v6295_v37  ;;  %v7788_v42 = vld [vmem:[#allocation148_spill] sm:$0xff] }
 0x1e9   : > { %3745 = vmatmul.mubr.f32.gmra.mrb[54].mxu0 %v1212_v60  ;;  %v1562_v53 = vand.u32 2147483647, %v1530_v11  ;;  %3026 = vperm.xlu0 %4889, %v4455_v46   ;;  %v4456_v13 = vadd.f32 10.0, %v2644_v17  ;;  %v2645_v33 = vmul.f32 0.001, %v7787_v30  ;;  %v1218_v24 = vadd.f32 %v6557_v19, %v6288_v63 }
 0x1ea   : > { %3749 = vmatprep.mubr.f32.mxu0 %v1215_v40  ;;  %v6617_v23 = vmax.f32 %v1584_v35, 0.0  ;;  %v1532_v52 = vsub.f32 %v5654_v28, %v7788_v42  ;;  %v1152_v34 = vmax.f32 %v1088_v22, 0.0  ;;  %v1028_v27 = vand.u32 2147483647, %v964_v36  ;;  %2744 = vperm.xlu1 %4875, %v4454_v8   ;;  %v6621_v43 = vpop.permute.xlu1 %2091  ;;  %v7789_v36 = vld [vmem:[#allocation21_spill] sm:$0xff] }
 0x1eb   : > { %v1588_v37 = vsub.f32 1.0, %v1556_v4  ;;  %v1093_v11 = vsub.f32 1.0, %v1029_v56  ;;  %v1217_v48 = vadd.f32 %v1153_v54, %v6212_v38  ;;  %v6626_v17 = vmax.f32 %v2256_v10, 0.0 }
 0x1ec   : > { %v6623_v40 = vpop.permute.xlu0 %1764  ;;  %v6628_v18 = vmax.f32 %v1586_v25, 0.0  ;;  %v1590_v63 = vsub.f32 1.0, %v1558_v31  ;;  %v1592_v19 = vsub.f32 1.0, %v1560_v51  ;;  %v1807_v35 = vand.u32 2147483647, %v1775_v6  ;;  %v7790_v6 = vld [vmem:[#allocation24_spill] sm:$0xff] }
 0x1ed   : > { %3750 = vmatmul.mubr.f32.gmra.mrb[56].mxu0 %v1214_v7  ;;  %v1594_v60 = vsub.f32 1.0, %v1562_v53  ;;  %v1776_v8 = vsub.f32 %v5654_v28, %v6444_v41  ;;  %3030 = vperm.xlu0 %4889, %v4456_v13   ;;  %v4457_v22 = vadd.f32 10.0, %v2645_v33  ;;  %v2646_v4 = vmul.f32 0.001, %v7789_v36 }
 0x1ee   : > { %3754 = vmatprep.mubr.f32.mxu0 %v1217_v48  ;;  %v6633_v56 = vand.u32 2147483647, %v1532_v52  ;;  %v1092_v38 = vsub.f32 1.0, %v1028_v27  ;;  %v2193_v54 = vsub.f32 %v5654_v28, %v6582_v12  ;;  %2749 = vperm.xlu1 %4875, %v4455_v46   ;;  %v6637_v10 = vpop.permute.xlu1 %2101  ;;  %v1216_v7 = vadd.f32 %v1152_v34, %v6189_v39 }
 0x1ef   : > { %v6640_v25 = vmax.f32 %v1588_v37, 0.0  ;;  %v1777_v41 = vsub.f32 %v5654_v28, %v6314_v57  ;;  %v1157_v31 = vmax.f32 %v1093_v11, 0.0  ;;  %v2647_v53 = vmul.f32 0.001, %v7790_v6  ;;  %v7791_v57 = vld [vmem:[#allocation23_spill] sm:$0xff] }
 0x1f0   : > { %v2346_v51 = vpop.permute.xlu0 %2345  ;;  %v6645_v30 = vmax.f32 %v1590_v63, 0.0  ;;  %v6647_v33 = vmax.f32 %v1592_v19, 0.0  ;;  %v1839_v42 = vsub.f32 1.0, %v1807_v35  ;;  %v6650_v46 = vmax.f32 %v1594_v60, 0.0 }
 0x1f1   : > { %3755 = vmatmul.mubr.f32.gmra.mrb[58].mxu0 %v1216_v7  ;;  %v2448_v12 = vsub.f32 %v5654_v28, %v2346_v51  ;;  %v1808_v39 = vand.u32 2147483647, %v1776_v8  ;;  %3034 = vperm.xlu0 %4889, %v4457_v22   ;;  %v4458_v52 = vadd.f32 10.0, %v2646_v4  ;;  %v2648_v34 = vmul.f32 0.001, %v7791_v57 }
 0x1f2   : > { %3759 = vmatprep.mubr.f32.mxu0 %v6597_v55  ;;  %v1596_v27 = vsub.f32 1.0, %v6633_v56  ;;  %v1156_v37 = vmax.f32 %v1092_v38, 0.0  ;;  %v2225_v11 = vand.u32 2147483647, %v2193_v54  ;;  %2754 = vperm.xlu1 %4875, %v4456_v13   ;;  %v1809_v63 = vand.u32 2147483647, %v1777_v41 }
 0x1f3   : > { %v2480_v48 = vand.u32 2147483647, %v2448_v12  ;;  %v2350_v19 = vpop.permute.xlu1 %2349  ;;  %v1221_v36 = vadd.f32 %v1157_v31, %v6271_v32  ;;  %v6656_v60 = vadd.f32 10.0, %v2647_v53  ;;  %v2649_v8 = vmul.f32 0.001, %v7646_v21 }
 0x1f4   : > { %v2358_v35 = vpop.permute.xlu0 %2357  ;;  %v1871_v55 = vmax.f32 %v1839_v42, 0.0  ;;  %v2449_v4 = vsub.f32 %v5654_v28, %v2350_v19  ;;  %v1840_v38 = vsub.f32 1.0, %v1808_v39  ;;  %v1778_v13 = vsub.f32 %v5654_v28, %v6463_v44 }
 0x1f5   : > { %v2512_v7 = vsub.f32 1.0, %v2480_v48  ;;  %3760 = vmatmul.mubr.f32.gmra.mrb[60].mxu0 %v1218_v24  ;;  %v2451_v51 = vsub.f32 %v5654_v28, %v2358_v35  ;;  %v2195_v54 = vsub.f32 %v5654_v28, %v6606_v59  ;;  %3038 = vperm.xlu0 %4889, %v4458_v52   ;;  %v6665_v32 = vadd.f32 10.0, %v2648_v34 }
 0x1f6   : > { %3764 = vmatprep.mubr.f32.mxu0 %v1221_v36  ;;  %v2257_v41 = vsub.f32 1.0, %v2225_v11  ;;  %v2481_v21 = vand.u32 2147483647, %v2449_v4  ;;  %2759 = vperm.xlu1 %4875, %v4457_v22   ;;  %v1220_v31 = vadd.f32 %v1156_v37, %v6269_v29  ;;  %v1841_v24 = vsub.f32 1.0, %v1809_v63  ;;  %v3531_v11 = vld [vmem:[#allocation3 + $0x210] sm:$0xff]  ;;  %v3532_v29 = vld [vmem:[#allocation3 + $0x218] sm:$0xff] }
 0x1f7   : > { %v2544_v6 = vmax.f32 %v2512_v7, 0.0  ;;  %v2483_v53 = vand.u32 2147483647, %v2451_v51  ;;  %v2354_v42 = vpop.permute.xlu1 %2353  ;;  %v6668_v39 = vadd.f32 10.0, %v2649_v8  ;;  %v2651_v44 = vmul.f32 0.001, %v7653_v5 }
 0x1f8   : > { %v2366_v12 = vpop.permute.xlu0 %2365  ;;  %v1779_v59 = vsub.f32 %v5654_v28, %v6329_v47  ;;  %v2513_v57 = vsub.f32 1.0, %v2481_v21  ;;  %v2450_v34 = vsub.f32 %v5654_v28, %v2354_v42  ;;  %v1903_v22 = vadd.f32 %v1871_v55, %v6324_v26  ;;  %v7792_v26 = vld [vmem:[#allocation27_spill] sm:$0xff]  ;;  %v3533_v21 = vld [vmem:[#allocation3 + $0x220] sm:$0xff] }
 0x1f9   : > { %3765 = vmatmul.mubr.f32.gmra.mrb[62].mxu0 %v1220_v31  ;;  %v1872_v37 = vmax.f32 %v1840_v38, 0.0  ;;  %v1810_v48 = vand.u32 2147483647, %v1778_v13  ;;  %v2227_v63 = vand.u32 2147483647, %v2195_v54  ;;  %3042 = vperm.xlu0 %4889, %v6656_v60   ;;  %v2576_v19 = vadd.f32 %v2544_v6, %v6626_v17  ;;  %v3534_v31 = vld [vmem:[#allocation3 + $0x228] sm:$0xff] }
 0x1fa   : > { %v2289_v35 = vmax.f32 %v2257_v41, 0.0  ;;  %v2545_v5 = vmax.f32 %v2513_v57, 0.0  ;;  %v2482_v36 = vand.u32 2147483647, %v2450_v34  ;;  %v2453_v47 = vsub.f32 %v5654_v28, %v2366_v12  ;;  %2764 = vperm.xlu1 %4875, %v4458_v52  }
 0x1fb   : > { %v1873_v8 = vmax.f32 %v1841_v24, 0.0  ;;  %v2515_v7 = vsub.f32 1.0, %v2483_v53  ;;  %3874 = vmatprep.mubr.f32.mxu1 %v2576_v19  ;;  %v2362_v4 = vpop.permute.xlu1 %2361  ;;  %v2652_v55 = vmul.f32 0.001, %v7792_v26  ;;  %v4711_v51 = vpack.c.bf16 %v3532_v29, %v3531_v11 }
 0x1fc   : > { %v6679_v38 = vand.u32 2147483647, %v1779_v59  ;;  %v2514_v13 = vsub.f32 1.0, %v2482_v36  ;;  %v2452_v54 = vsub.f32 %v5654_v28, %v2362_v4  ;;  %3875 = vmatmul.mubr.f32.vlgmr.msra.gmra.mrb[0].mxu1 %v1903_v22  ;;  %v6682_v17 = vpop.permute.xlu0 %2373  ;;  %v2577_v41 = vadd.f32 %v2545_v5, %v2289_v35 }
 0x1fd   : > { %v1842_v6 = vsub.f32 1.0, %v1810_v48  ;;  %v1780_v52 = vsub.f32 %v5654_v28, %v6476_v58  ;;  %v2259_v24 = vsub.f32 1.0, %v2227_v63  ;;  %v2197_v53 = vsub.f32 %v5654_v28, %v6621_v43  ;;  %3046 = vperm.xlu0 %4889, %v6665_v32   ;;  %4710 = vmatpush3.bf16.msra.mxu1 %v6458_v2  ;;  %v7793_v58 = vld [vmem:[#allocation32_spill] sm:$0xff]  ;;  %v3535_v48 = vld [vmem:[#allocation3 + $0x230] sm:$0xff] }
 0x1fe   : > { %v2546_v42 = vmax.f32 %v2514_v13, 0.0  ;;  %v2485_v12 = vand.u32 2147483647, %v2453_v47  ;;  %v2484_v59 = vand.u32 2147483647, %v2452_v54  ;;  %2769 = vperm.xlu1 %4875, %v6656_v60   ;;  %3879 = vmatprep.mubr.f32.mxu1 %v2577_v41  ;;  %v1904_v57 = vadd.f32 %v1872_v37, %v6617_v23  ;;  %v3536_v63 = vld [vmem:[#allocation3 + $0x238] sm:$0xff] }
 0x1ff   : > { %v2547_v34 = vmax.f32 %v2515_v7, 0.0  ;;  %v2370_v22 = vpop.permute.xlu1 %2369  ;;  %v6692_v11 = vadd.f32 10.0, %v2651_v44  ;;  %v2653_v29 = vmul.f32 0.001, %v7793_v58  ;;  %4712 = vmatprep.subr.bf16.mxu1 %v4711_v51  ;;  %v4715_v43 = vpack.c.bf16 %v3534_v31, %v3533_v21  ;;  %v3537_v54 = vld [vmem:[#allocation3 + $0x240] sm:$0xff]  ;;  %v3538_v41 = vld [vmem:[#allocation3 + $0x248] sm:$0xff] }
 0x200   : > { %v1781_v2 = vsub.f32 %v5654_v28, %v6346_v0  ;;  %v2516_v19 = vsub.f32 1.0, %v2484_v59  ;;  %v2454_v35 = vsub.f32 %v5654_v28, %v2370_v22  ;;  %3880 = vmatmul.mubr.f32.gmra.mrb[2].mxu1 %v1904_v57  ;;  %v6698_v60 = vpop.permute.xlu0 %2377  ;;  %v2578_v23 = vadd.f32 %v2546_v42, %v6572_v15  ;;  %v7794_v21 = vld [vmem:[#allocation78_spill] sm:$0xff] }
 0x201   : > { %v1843_v44 = vsub.f32 1.0, %v6679_v38  ;;  %v2291_v37 = vmax.f32 %v2259_v24, 0.0  ;;  %v2229_v5 = vand.u32 2147483647, %v2197_v53  ;;  %3050 = vperm.xlu0 %4889, %v6668_v39   ;;  %v1905_v36 = vadd.f32 %v1873_v8, %v6339_v45  ;;  %4714 = vmatpush3.bf16.msra.mxu1 %v4711_v51 }
 0x202   : > { %v1874_v47 = vmax.f32 %v1842_v6, 0.0  ;;  %v1812_v7 = vand.u32 2147483647, %v1780_v52  ;;  %v2517_v0 = vsub.f32 1.0, %v2485_v12  ;;  %2774 = vperm.xlu1 %4875, %v6665_v32   ;;  %3884 = vmatprep.mubr.f32.mxu1 %v2578_v23  ;;  %v4719_v4 = vpack.c.bf16 %v3536_v63, %v3535_v48  ;;  %v7795_v32 = vld [vmem:[#allocation35_spill] sm:$0xff] }
 0x203   : > { %v2548_v26 = vmax.f32 %v2516_v19, 0.0  ;;  %v2455_v15 = vsub.f32 %v5654_v28, %v6682_v17  ;;  %v2486_v13 = vand.u32 2147483647, %v2454_v35  ;;  %v2579_v38 = vadd.f32 %v2547_v34, %v2291_v37  ;;  %4716 = vmatprep.subr.bf16.mxu1 %v4715_v43  ;;  %v3539_v19 = vld [vmem:[#allocation3 + $0x250] sm:$0xff] }
 0x204   : > { %v1534_v45 = vsub.f32 %v5654_v28, %v7794_v21  ;;  %v1813_v8 = vand.u32 2147483647, %v1781_v2  ;;  %3885 = vmatmul.mubr.f32.gmra.mrb[4].mxu1 %v1905_v36  ;;  %v6709_v51 = vpop.permute.xlu0 %2381  ;;  %v6711_v31 = vadd.f32 10.0, %v2652_v55  ;;  %v2655_v6 = vmul.f32 0.001, %v7795_v32  ;;  %v7796_v2 = vld [vmem:[#allocation33_spill] sm:$0xff] }
 0x205   : > { %v1782_v52 = vsub.f32 %v5654_v28, %v6491_v3  ;;  %v2261_v17 = vsub.f32 1.0, %v2229_v5  ;;  %v2199_v24 = vsub.f32 %v5654_v28, %v6637_v10  ;;  %v2107_v53 = vpop.permute.xlu1 %2106  ;;  %3058 = vperm.xlu0 %4889, %v6692_v11   ;;  %3889 = vmatprep.mubr.f32.mxu1 %v2579_v38  ;;  %v6719_v42 = vadd.f32 10.0, %v2653_v29 }
 0x206   : > { %v1875_v12 = vmax.f32 %v1843_v44, 0.0  ;;  %v1844_v59 = vsub.f32 1.0, %v1812_v7  ;;  %2779 = vperm.xlu1 %4875, %v6668_v39   ;;  %v1906_v55 = vadd.f32 %v1874_v47, %v6628_v18  ;;  %4718 = vmatpush3.bf16.msra.mxu1 %v4715_v43  ;;  %v4723_v57 = vpack.c.bf16 %v3538_v41, %v3537_v54  ;;  %v3540_v18 = vld [vmem:[#allocation3 + $0x258] sm:$0xff]  ;;  %v7797_v43 = vld [vmem:[#allocation31_spill] sm:$0xff]  ;;  %v7799_v7 = vld [vmem:[#allocation73_spill] sm:$0xff] }
 0x207   : > { %v2549_v34 = vmax.f32 %v2517_v0, 0.0  ;;  %v2487_v3 = vand.u32 2147483647, %v2455_v15  ;;  %v2518_v22 = vsub.f32 1.0, %v2486_v13  ;;  %v2580_v58 = vadd.f32 %v2548_v26, %v6574_v14  ;;  %4720 = vmatprep.subr.bf16.mxu1 %v4719_v4  ;;  %v7800_v26 = vld [vmem:[#allocation38_spill] sm:$0xff] }
 0x208   : > { %v1845_v10 = vsub.f32 1.0, %v1813_v8  ;;  %v2200_v48 = vsub.f32 %v5654_v28, %v2107_v53  ;;  %3890 = vmatmul.mubr.f32.gmra.mrb[6].mxu1 %v1906_v55  ;;  %v6725_v29 = vpop.permute.xlu0 %2385  ;;  %v6727_v63 = vadd.f32 10.0, %v2655_v6  ;;  %v2656_v39 = vmul.f32 0.001, %v7796_v2  ;;  %v7801_v54 = vld [vmem:[#allocation50_spill] sm:$0xff] }
 0x209   : > { %v1783_v35 = vsub.f32 %v5654_v28, %v7797_v43  ;;  %v1814_v23 = vand.u32 2147483647, %v1782_v52  ;;  %v2293_v44 = vmax.f32 %v2261_v17, 0.0  ;;  %v2231_v37 = vand.u32 2147483647, %v2199_v24  ;;  %v2112_v14 = vpop.permute.xlu1 %2111  ;;  %3062 = vperm.xlu0 %4889, %v6711_v31   ;;  %3894 = vmatprep.mubr.f32.mxu1 %v2580_v58  ;;  %v3541_v24 = vld [vmem:[#allocation3 + $0x260] sm:$0xff] }
 0x20a   : > { %v1876_v5 = vmax.f32 %v1844_v59, 0.0  ;;  %v2456_v36 = vsub.f32 %v5654_v28, %v6698_v60  ;;  %v7798_v47 = vmov 1   ;;  %v1907_v0 = vadd.f32 %v1875_v12, %v7799_v7  ;;  %4722 = vmatpush3.bf16.msra.mxu1 %v4719_v4  ;;  %v3542_v53 = vld [vmem:[#allocation3 + $0x268] sm:$0xff] }
 0x20b   : > { %4876 = vset.pattern.permute.xlu1 %v7798_v47  ;;  %v2657_v15 = vmul.f32 0.001, %v7800_v26  ;;  %v2519_v13 = vsub.f32 1.0, %v2487_v3  ;;  %v2550_v38 = vmax.f32 %v2518_v22, 0.0  ;;  %v2581_v41 = vadd.f32 %v2549_v34, %v2293_v44  ;;  %4724 = vmatprep.subr.bf16.mxu1 %v4723_v57  ;;  %v7802_v2 = vld [vmem:[#allocation58_spill] sm:$0xff]  ;;  %v3544_v44 = vld [vmem:[#allocation3 + $0x278] sm:$0xff] }
 0x20c   : > { %2313 = vperm.xlu1 %4876, %v7801_v54   ;;  %v4727_v8 = vpack.c.bf16 %v3540_v18, %v3539_v19  ;;  %v1877_v32 = vmax.f32 %v1845_v10, 0.0  ;;  %v2232_v6 = vand.u32 2147483647, %v2200_v48  ;;  %v2201_v52 = vsub.f32 %v5654_v28, %v2112_v14  ;;  %3895 = vmatmul.mubr.f32.gmra.mrb[8].mxu1 %v1907_v0  ;;  %v6740_v60 = vpop.permute.xlu0 %2389  ;;  %v7803_v18 = vld [vmem:[#allocation134_spill] sm:$0xff] }
 0x20d   : > { %v6742_v17 = vadd.f32 10.0, %v2656_v39  ;;  %v1815_v12 = vand.u32 2147483647, %v1783_v35  ;;  %v1846_v4 = vsub.f32 1.0, %v1814_v23  ;;  %v1784_v59 = vsub.f32 %v5654_v28, %v6506_v1  ;;  %v2117_v34 = vpop.permute.xlu1 %2116  ;;  %3066 = vperm.xlu0 %4889, %v6719_v42   ;;  %3899 = vmatprep.mubr.f32.mxu1 %v2581_v41  ;;  %v7806_v41 = vld [vmem:[#allocation41_spill] sm:$0xff] }
 0x20e   : > { %v2263_v55 = vsub.f32 1.0, %v2231_v37  ;;  %v2488_v3 = vand.u32 2147483647, %v2456_v36  ;;  %v2457_v22 = vsub.f32 %v5654_v28, %v6709_v51  ;;  %v2202_v58 = vsub.f32 %v5654_v28, %v2117_v34  ;;  %4726 = vmatpush3.bf16.msra.mxu1 %v4723_v57  ;;  %v3543_v57 = vld [vmem:[#allocation3 + $0x270] sm:$0xff] }
 0x20f   : > { %v1908_v10 = vadd.f32 %v1876_v5, %v6640_v25  ;;  %v2551_v48 = vmax.f32 %v2519_v13, 0.0  ;;  %v2582_v39 = vadd.f32 %v2550_v38, %v6599_v50  ;;  %v6753_v1 = vadd.f32 10.0, %v2657_v15  ;;  %4728 = vmatprep.subr.bf16.mxu1 %v4727_v8  ;;  %v7804_v36 = vld [vmem:[#allocation79_spill] sm:$0xff] }
 0x210   : > { %3054 = vperm.xlu1 %4876, %v7802_v2   ;;  %v4731_v19 = vpack.c.bf16 %v3542_v53, %v3541_v24  ;;  %v1785_v43 = vsub.f32 %v5654_v28, %v7803_v18  ;;  %v2264_v35 = vsub.f32 1.0, %v2232_v6  ;;  %v2458_v51 = vsub.f32 %v5654_v28, %v6725_v29  ;;  %v6759_v25 = vpop.permute.xlu0 %2393 }
 0x211   : > { %v2233_v23 = vand.u32 2147483647, %v2201_v52  ;;  %3900 = vmatmul.mubr.f32.gmra.mrb[10].mxu1 %v1908_v10  ;;  %v1847_v37 = vsub.f32 1.0, %v1815_v12  ;;  %v1816_v14 = vand.u32 2147483647, %v1784_v59  ;;  %v2295_v50 = vmax.f32 %v2263_v55, 0.0  ;;  %v2122_v5 = vpop.permute.xlu1 %2121  ;;  %3074 = vperm.xlu0 %4889, %v6727_v63  }
 0x212   : > { %3904 = vmatprep.mubr.f32.mxu1 %v2582_v39  ;;  %v1909_v7 = vadd.f32 %v1877_v32, %v7804_v36  ;;  %v1878_v0 = vmax.f32 %v1846_v4, 0.0  ;;  %v2520_v26 = vsub.f32 1.0, %v2488_v3  ;;  %v2489_v15 = vand.u32 2147483647, %v2457_v22  ;;  %4730 = vmatpush3.bf16.msra.mxu1 %v4727_v8  ;;  %v7807_v55 = vld [vmem:[#allocation81_spill] sm:$0xff]  ;;  %v7811_v36 = vld [vmem:[#allocation138_spill] sm:$0xff] }
 0x213   : > { %v2234_v13 = vand.u32 2147483647, %v2202_v58  ;;  %v2203_v29 = vsub.f32 %v5654_v28, %v2122_v5  ;;  %v7805_v38 = vmov 0   ;;  %v2583_v54 = vadd.f32 %v2551_v48, %v2295_v50  ;;  %4732 = vmatprep.subr.bf16.mxu1 %v4731_v19  ;;  %v7810_v50 = vld [vmem:[#allocation51_spill] sm:$0xff] }
 0x214   : > { %4877 = vset.pattern.permute.xlu1 %v7805_v38  ;;  %v2659_v6 = vmul.f32 0.001, %v7806_v41  ;;  %v4735_v52 = vpack.c.bf16 %v3544_v44, %v3543_v57  ;;  %v1817_v24 = vand.u32 2147483647, %v1785_v43  ;;  %v2296_v53 = vmax.f32 %v2264_v35, 0.0  ;;  %v6767_v32 = vpop.permute.xlu0 %2397  ;;  %v7808_v43 = vld [vmem:[#allocation40_spill] sm:$0xff] }
 0x215   : > { %v2490_v12 = vand.u32 2147483647, %v2458_v51  ;;  %v2265_v59 = vsub.f32 1.0, %v2233_v23  ;;  %2789 = vperm.xlu1 %4877, %v6692_v11   ;;  %3905 = vmatmul.mubr.f32.gmra.mrb[12].mxu1 %v1909_v7  ;;  %v1879_v4 = vmax.f32 %v1847_v37, 0.0  ;;  %v1848_v8 = vsub.f32 1.0, %v1816_v14  ;;  %v2127_v22 = vpop.permute.xlu1 %2126  ;;  %v7809_v51 = vld [vmem:[#allocation99_spill] sm:$0xff] }
 0x216   : > { %v1786_v34 = vsub.f32 %v5654_v28, %v7807_v55  ;;  %v2459_v3 = vsub.f32 %v5654_v28, %v6740_v60  ;;  %3078 = vperm.xlu0 %4889, %v6742_v17   ;;  %3909 = vmatprep.mubr.f32.mxu1 %v2583_v54  ;;  %v2552_v58 = vmax.f32 %v2520_v26, 0.0  ;;  %v2521_v10 = vsub.f32 1.0, %v2489_v15 }
 0x217   : > { %v2266_v48 = vsub.f32 1.0, %v2234_v13  ;;  %v1910_v11 = vadd.f32 %v1878_v0, %v6645_v30  ;;  %4734 = vmatpush3.bf16.msra.mxu1 %v4731_v19  ;;  %v2235_v2 = vand.u32 2147483647, %v2203_v29  ;;  %v2204_v39 = vsub.f32 %v5654_v28, %v2127_v22 }
 0x218   : > { %v6776_v18 = vadd.f32 10.0, %v2659_v6  ;;  %v2660_v35 = vmul.f32 0.001, %v7808_v43  ;;  %4736 = vmatprep.subr.bf16.mxu1 %v4735_v52  ;;  %v1787_v60 = vsub.f32 %v5654_v28, %v7809_v51  ;;  %v2522_v23 = vsub.f32 1.0, %v2490_v12  ;;  %v6782_v44 = vpop.permute.xlu0 %2401 }
 0x219   : > { %v2297_v57 = vmax.f32 %v2265_v59, 0.0  ;;  %4878 = vset.pattern.permute.xlu1 %v7798_v47  ;;  %3910 = vmatmul.mubr.f32.gmra.mrb[14].mxu1 %v1910_v11  ;;  %v2584_v30 = vadd.f32 %v2552_v58, %v2296_v53  ;;  %v1849_v19 = vsub.f32 1.0, %v1817_v24  ;;  %v2491_v37 = vand.u32 2147483647, %v2459_v3  ;;  %v2132_v5 = vpop.permute.xlu1 %2131  ;;  %v7812_v59 = vld [vmem:[#allocation43_spill] sm:$0xff] }
 0x21a   : > { %v2460_v14 = vsub.f32 %v5654_v28, %v6759_v25  ;;  %2317 = vperm.xlu1 %4878, %v7810_v50   ;;  %3082 = vperm.xlu0 %4889, %v6753_v1   ;;  %v1911_v7 = vadd.f32 %v1879_v4, %v7811_v36  ;;  %v1880_v0 = vmax.f32 %v1848_v8, 0.0  ;;  %v1818_v26 = vand.u32 2147483647, %v1786_v34  ;;  %v7815_v36 = vld [vmem:[#allocation34_spill] sm:$0xff] }
 0x21b   : > { %v2553_v15 = vmax.f32 %v2521_v10, 0.0  ;;  %v2298_v13 = vmax.f32 %v2266_v48, 0.0  ;;  %3914 = vmatprep.mubr.f32.mxu1 %v2584_v30  ;;  %4738 = vmatpush3.bf16.msra.mxu1 %v4735_v52  ;;  %v2267_v29 = vsub.f32 1.0, %v2235_v2  ;;  %v2236_v54 = vand.u32 2147483647, %v2204_v39 }
 0x21c   : > { %v2205_v41 = vsub.f32 %v5654_v28, %v2132_v5  ;;  %v6790_v6 = vadd.f32 10.0, %v2660_v35  ;;  %v1819_v25 = vand.u32 2147483647, %v1787_v60  ;;  %v2554_v24 = vmax.f32 %v2522_v23, 0.0  ;;  %v6792_v53 = vpop.permute.xlu0 %2405  ;;  %v7813_v35 = vld [vmem:[#allocation36_spill] sm:$0xff] }
 0x21d   : > { %3915 = vmatmul.mubr.f32.gmra.mrb[16].mxu1 %v1911_v7  ;;  %v2585_v12 = vadd.f32 %v2553_v15, %v2297_v57  ;;  %v2661_v4 = vmul.f32 0.001, %v7812_v59  ;;  %v1881_v8 = vmax.f32 %v1849_v19, 0.0  ;;  %v2523_v55 = vsub.f32 1.0, %v2491_v37  ;;  %v2137_v3 = vpop.permute.xlu1 %2136 }
 0x21e   : > { %v2492_v34 = vand.u32 2147483647, %v2460_v14  ;;  %v2461_v52 = vsub.f32 %v5654_v28, %v6767_v32  ;;  %4879 = vset.pattern.permute.xlu1 %v7805_v38  ;;  %3090 = vperm.xlu0 %4889, %v6776_v18   ;;  %v1850_v22 = vsub.f32 1.0, %v1818_v26  ;;  %v1788_v58 = vsub.f32 %v5654_v28, %v6540_v16  ;;  %v7814_v16 = vld [vmem:[#allocation46_spill] sm:$0xff] }
 0x21f   : > { %3919 = vmatprep.mubr.f32.mxu1 %v2585_v12  ;;  %2794 = vperm.xlu1 %4879, %v6711_v31   ;;  %v1912_v10 = vadd.f32 %v1880_v0, %v6647_v33  ;;  %v2586_v48 = vadd.f32 %v2554_v24, %v2298_v13  ;;  %v2299_v11 = vmax.f32 %v2267_v29, 0.0  ;;  %v2268_v2 = vsub.f32 1.0, %v2236_v54 }
 0x220   : > { %v2237_v39 = vand.u32 2147483647, %v2205_v41  ;;  %v2206_v32 = vsub.f32 %v5654_v28, %v2137_v3  ;;  %v1851_v43 = vsub.f32 1.0, %v1819_v25  ;;  %v1789_v51 = vsub.f32 %v5654_v28, %v7813_v35  ;;  %v6806_v60 = vpop.permute.xlu0 %2409  ;;  %v7816_v25 = vld [vmem:[#allocation45_spill] sm:$0xff] }
 0x221   : > { %3920 = vmatmul.mubr.f32.gmra.mrb[18].mxu1 %v1912_v10  ;;  %v6808_v23 = vadd.f32 10.0, %v2661_v4  ;;  %v2663_v57 = vmul.f32 0.001, %v7814_v16  ;;  %v2555_v31 = vmax.f32 %v2523_v55, 0.0  ;;  %v2524_v30 = vsub.f32 1.0, %v2492_v34  ;;  %v2142_v37 = vpop.permute.xlu1 %2141  ;;  %v7817_v10 = vld [vmem:[#allocation110_spill] sm:$0xff] }
 0x222   : > { %v2493_v33 = vand.u32 2147483647, %v2461_v52  ;;  %v2462_v19 = vsub.f32 %v5654_v28, %v6782_v44  ;;  %3094 = vperm.xlu0 %4889, %v6790_v6   ;;  %3924 = vmatprep.mubr.f32.mxu1 %v2586_v48  ;;  %v1882_v14 = vmax.f32 %v1850_v22, 0.0  ;;  %v1820_v50 = vand.u32 2147483647, %v1788_v58 }
 0x223   : > { %v2207_v5 = vsub.f32 %v5654_v28, %v2142_v37  ;;  %2799 = vperm.xlu1 %4879, %v6719_v42   ;;  %v1913_v7 = vadd.f32 %v1881_v8, %v7815_v36  ;;  %v2300_v0 = vmax.f32 %v2268_v2, 0.0  ;;  %v2269_v26 = vsub.f32 1.0, %v2237_v39  ;;  %v7818_v2 = vld [vmem:[#allocation104_spill] sm:$0xff] }
 0x224   : > { %v2238_v15 = vand.u32 2147483647, %v2206_v32  ;;  %v2587_v13 = vadd.f32 %v2555_v31, %v2299_v11  ;;  %v1883_v29 = vmax.f32 %v1851_v43, 0.0  ;;  %v2463_v44 = vsub.f32 %v5654_v28, %v6792_v53  ;;  %v6819_v54 = vpop.permute.xlu0 %2413 }
 0x225   : > { %3925 = vmatmul.mubr.f32.gmra.mrb[20].mxu1 %v1913_v7  ;;  %v6821_v41 = vadd.f32 10.0, %v2663_v57  ;;  %v2664_v24 = vmul.f32 0.001, %v7816_v25  ;;  %v1821_v12 = vand.u32 2147483647, %v1789_v51  ;;  %v2556_v59 = vmax.f32 %v2524_v30, 0.0  ;;  %v2147_v8 = vpop.permute.xlu1 %2146 }
 0x226   : > { %v2525_v42 = vsub.f32 1.0, %v2493_v33  ;;  %v2494_v4 = vand.u32 2147483647, %v2462_v19  ;;  %3098 = vperm.xlu0 %4889, %v6808_v23   ;;  %3929 = vmatprep.mubr.f32.mxu1 %v2587_v13  ;;  %v1852_v55 = vsub.f32 1.0, %v1820_v50  ;;  %v1790_v34 = vsub.f32 %v5654_v28, %v6554_v20  ;;  %v7819_v30 = vld [vmem:[#allocation82_spill] sm:$0xff]  ;;  %v7820_v50 = vld [vmem:[#allocation59_spill] sm:$0xff] }
 0x227   : > { %v2239_v53 = vand.u32 2147483647, %v2207_v5  ;;  %4880 = vset.pattern.permute.xlu1 %v7798_v47  ;;  %v1914_v52 = vadd.f32 %v1882_v14, %v6650_v46  ;;  %v2301_v3 = vmax.f32 %v2269_v26, 0.0  ;;  %v2270_v22 = vsub.f32 1.0, %v2238_v15 }
 0x228   : > { %v2208_v58 = vsub.f32 %v5654_v28, %v2147_v8  ;;  %2321 = vperm.xlu1 %4880, %v7817_v10   ;;  %v2588_v48 = vadd.f32 %v2556_v59, %v2300_v0  ;;  %v6834_v11 = vand.u32 2147483647, %v1534_v45  ;;  %v1791_v20 = vsub.f32 %v5654_v28, %v7818_v2  ;;  %v6838_v32 = vpop.permute.xlu0 %2417 }
 0x229   : > { %v2495_v39 = vand.u32 2147483647, %v2463_v44  ;;  %3930 = vmatmul.mubr.f32.gmra.mrb[22].mxu1 %v1914_v52  ;;  %v6840_v46 = vadd.f32 10.0, %v2664_v24  ;;  %v1853_v43 = vsub.f32 1.0, %v1821_v12  ;;  %v2557_v35 = vmax.f32 %v2525_v42, 0.0  ;;  %v2152_v57 = vpop.permute.xlu1 %2151 }
 0x22a   : > { %v2526_v51 = vsub.f32 1.0, %v2494_v4  ;;  %v2464_v16 = vsub.f32 %v5654_v28, %v6806_v60  ;;  %3106 = vperm.xlu0 %4889, %v6821_v41   ;;  %3934 = vmatprep.mubr.f32.mxu1 %v2588_v48  ;;  %v1884_v21 = vmax.f32 %v1852_v55, 0.0  ;;  %v1822_v45 = vand.u32 2147483647, %v1790_v34  ;;  %v7821_v55 = vld [vmem:[#allocation71_spill] sm:$0xff] }
 0x22b   : > { %v2271_v31 = vsub.f32 1.0, %v2239_v53  ;;  %v1915_v33 = vadd.f32 %v1883_v29, %v7819_v30  ;;  %v2302_v19 = vmax.f32 %v2270_v22, 0.0  ;;  %v2240_v37 = vand.u32 2147483647, %v2208_v58  ;;  %v7822_v53 = vld [vmem:[#allocation37_spill] sm:$0xff]  ;;  %v7823_v22 = vld [vmem:[#allocation92_spill] sm:$0xff] }
 0x22c   : > { %v2209_v14 = vsub.f32 %v5654_v28, %v2152_v57  ;;  %3070 = vperm.xlu1 %4880, %v7820_v50   ;;  %v2589_v5 = vadd.f32 %v2557_v35, %v2301_v3  ;;  %v1628_v36 = vmax.f32 %v1596_v27, 0.0  ;;  %v1598_v60 = vsub.f32 1.0, %v6834_v11  ;;  %v6851_v26 = vpop.permute.xlu0 %2421  ;;  %v7825_v35 = vld [vmem:[#allocation145_spill] sm:$0xff] }
 0x22d   : > { %v1823_v7 = vand.u32 2147483647, %v1791_v20  ;;  %v2527_v0 = vsub.f32 1.0, %v2495_v39  ;;  %3935 = vmatmul.mubr.f32.gmra.mrb[24].mxu1 %v1915_v33  ;;  %v1885_v15 = vmax.f32 %v1853_v43, 0.0  ;;  %v2558_v13 = vmax.f32 %v2526_v51, 0.0  ;;  %v2157_v25 = vpop.permute.xlu1 %2156 }
 0x22e   : > { %v2496_v29 = vand.u32 2147483647, %v2464_v16  ;;  %v2465_v44 = vsub.f32 %v5654_v28, %v6819_v54  ;;  %3110 = vperm.xlu0 %4889, %v6840_v46   ;;  %3939 = vmatprep.mubr.f32.mxu1 %v2589_v5  ;;  %v1854_v24 = vsub.f32 1.0, %v1822_v45  ;;  %v1792_v56 = vsub.f32 %v5654_v28, %v6569_v61 }
 0x22f   : > { %v2303_v27 = vmax.f32 %v2271_v31, 0.0  ;;  %v1916_v12 = vadd.f32 %v1884_v21, %v1628_v36  ;;  %v2272_v59 = vsub.f32 1.0, %v2240_v37  ;;  %v2241_v42 = vand.u32 2147483647, %v2209_v14  ;;  %v7826_v36 = vld [vmem:[#allocation112_spill] sm:$0xff] }
 0x230   : > { %v2210_v4 = vsub.f32 %v5654_v28, %v2157_v25  ;;  %4881 = vset.pattern.permute.xlu1 %v7805_v38  ;;  %v2590_v8 = vadd.f32 %v2558_v13, %v2302_v19  ;;  %v1536_v54 = vsub.f32 %v5654_v28, %v7821_v55  ;;  %v1855_v34 = vsub.f32 1.0, %v1823_v7  ;;  %v2426_v61 = vpop.permute.xlu0 %2425 }
 0x231   : > { %v1793_v52 = vsub.f32 %v5654_v28, %v7822_v53  ;;  %v2559_v3 = vmax.f32 %v2527_v0, 0.0  ;;  %2809 = vperm.xlu1 %4881, %v6727_v63   ;;  %3940 = vmatmul.mubr.f32.gmra.mrb[26].mxu1 %v1916_v12  ;;  %v7824_v58 = vsub.f32 %v5654_v28, %v7823_v22  ;;  %v2528_v48 = vsub.f32 1.0, %v2496_v29  ;;  %v2162_v20 = vpop.permute.xlu1 %2161  ;;  %v7829_v22 = vld [vmem:[#allocation102_spill] sm:$0xff] }
 0x232   : > { %v2497_v11 = vand.u32 2147483647, %v2465_v44  ;;  %v2466_v2 = vsub.f32 %v5654_v28, %v6838_v32  ;;  %3944 = vmatprep.mubr.f32.mxu1 %v2590_v8  ;;  %v1886_v39 = vmax.f32 %v1854_v24, 0.0  ;;  %v1824_v43 = vand.u32 2147483647, %v1792_v56 }
 0x233   : > { %v6868_v10 = vand.u32 2147483647, %v7824_v58  ;;  %v1917_v51 = vadd.f32 %v1885_v15, %v7825_v35  ;;  %v2591_v16 = vadd.f32 %v2559_v3, %v2303_v27  ;;  %v2304_v63 = vmax.f32 %v2272_v59, 0.0  ;;  %v7827_v27 = vld [vmem:[#allocation55_spill] sm:$0xff] }
 0x234   : > { %v2273_v57 = vsub.f32 1.0, %v2241_v42  ;;  %v2242_v21 = vand.u32 2147483647, %v2210_v4  ;;  %v2211_v45 = vsub.f32 %v5654_v28, %v2162_v20  ;;  %v1630_v31 = vmax.f32 %v1598_v60, 0.0  ;;  %v6875_v32 = vpop.permute.xlu0 %2429  ;;  %v7828_v4 = vld [vmem:[#allocation39_spill] sm:$0xff] }
 0x235   : > { %v1568_v30 = vand.u32 2147483647, %v1536_v54  ;;  %v1887_v33 = vmax.f32 %v1855_v34, 0.0  ;;  %v1825_v19 = vand.u32 2147483647, %v1793_v52  ;;  %4882 = vset.pattern.permute.xlu1 %v7798_v47  ;;  %3945 = vmatmul.mubr.f32.gmra.mrb[28].mxu1 %v1917_v51  ;;  %v2560_v37 = vmax.f32 %v2528_v48, 0.0  ;;  %v2167_v7 = vpop.permute.xlu1 %2166 }
 0x236   : > { %v2529_v14 = vsub.f32 1.0, %v2497_v11  ;;  %v2498_v50 = vand.u32 2147483647, %v2466_v2  ;;  %v2467_v5 = vsub.f32 %v5654_v28, %v6851_v26  ;;  %2325 = vperm.xlu1 %4882, %v7826_v36   ;;  %3949 = vmatprep.mubr.f32.mxu1 %v2591_v16  ;;  %v1856_v0 = vsub.f32 1.0, %v1824_v43  ;;  %v7830_v36 = vld [vmem:[#allocation26_spill] sm:$0xff] }
 0x237   : > { %v1794_v60 = vsub.f32 %v5654_v28, %v6589_v9  ;;  %v2212_v15 = vsub.f32 %v5654_v28, %v2167_v7  ;;  %v1918_v13 = vadd.f32 %v1886_v39, %v1630_v31  ;;  %v2305_v29 = vmax.f32 %v2273_v57, 0.0 }
 0x238   : > { %v2274_v44 = vsub.f32 1.0, %v2242_v21  ;;  %v2243_v25 = vand.u32 2147483647, %v2211_v45  ;;  %v2592_v24 = vadd.f32 %v2560_v37, %v2304_v63  ;;  %v1600_v56 = vsub.f32 1.0, %v1568_v30  ;;  %v6886_v42 = vpop.permute.xlu0 %2433 }
 0x239   : > { %v1538_v12 = vsub.f32 %v5654_v28, %v7827_v27  ;;  %v1857_v26 = vsub.f32 1.0, %v1825_v19  ;;  %v2468_v59 = vsub.f32 %v5654_v28, %v2426_v61  ;;  %3950 = vmatmul.mubr.f32.gmra.mrb[30].mxu1 %v1918_v13  ;;  %v1795_v9 = vsub.f32 %v5654_v28, %v7828_v4  ;;  %v2172_v34 = vpop.permute.xlu1 %2171  ;;  %v7832_v27 = vld [vmem:[#allocation54_spill] sm:$0xff] }
 0x23a   : > { %v2561_v8 = vmax.f32 %v2529_v14, 0.0  ;;  %v2530_v55 = vsub.f32 1.0, %v2498_v50  ;;  %v2499_v54 = vand.u32 2147483647, %v2467_v5  ;;  %4883 = vset.pattern.permute.xlu1 %v7805_v38  ;;  %3954 = vmatprep.mubr.f32.mxu1 %v2592_v24  ;;  %v1888_v53 = vmax.f32 %v1856_v0, 0.0 }
 0x23b   : > { %v1826_v52 = vand.u32 2147483647, %v1794_v60  ;;  %v2244_v3 = vand.u32 2147483647, %v2212_v15  ;;  %2814 = vperm.xlu1 %4883, %v6742_v17   ;;  %v1919_v61 = vadd.f32 %v1887_v33, %v7829_v22  ;;  %v2306_v58 = vmax.f32 %v2274_v44, 0.0 }
 0x23c   : > { %v2275_v48 = vsub.f32 1.0, %v2243_v25  ;;  %v2213_v11 = vsub.f32 %v5654_v28, %v2172_v34  ;;  %v2593_v2 = vadd.f32 %v2561_v8, %v2305_v29  ;;  %v1632_v20 = vmax.f32 %v1600_v56, 0.0  ;;  %v6894_v51 = vpop.permute.xlu0 %2437 }
 0x23d   : > { %v1570_v39 = vand.u32 2147483647, %v1538_v12  ;;  %v1889_v43 = vmax.f32 %v1857_v26, 0.0  ;;  %v2500_v35 = vand.u32 2147483647, %v2468_v59  ;;  %3955 = vmatmul.mubr.f32.gmra.mrb[32].mxu1 %v1919_v61  ;;  %v2562_v63 = vmax.f32 %v2530_v55, 0.0  ;;  %v2177_v21 = vpop.permute.xlu1 %2176 }
 0x23e   : > { %v1827_v16 = vand.u32 2147483647, %v1795_v9  ;;  %v2531_v57 = vsub.f32 1.0, %v2499_v54  ;;  %v2469_v17 = vsub.f32 %v5654_v28, %v6875_v32  ;;  %3959 = vmatprep.mubr.f32.mxu1 %v2593_v2  ;;  %v1858_v45 = vsub.f32 1.0, %v1826_v52  ;;  %v7831_v32 = vld [vmem:[#allocation101_spill] sm:$0xff]  ;;  %v7833_v9 = vld [vmem:[#allocation52_spill] sm:$0xff] }
 0x23f   : > { %v1796_v31 = vsub.f32 %v5654_v28, %v6609_v62  ;;  %v2276_v30 = vsub.f32 1.0, %v2244_v3  ;;  %2819 = vperm.xlu1 %4883, %v6753_v1   ;;  %v1920_v33 = vadd.f32 %v1888_v53, %v1632_v20  ;;  %v2307_v19 = vmax.f32 %v2275_v48, 0.0 }
 0x240   : > { %v2245_v37 = vand.u32 2147483647, %v2213_v11  ;;  %v2214_v14 = vsub.f32 %v5654_v28, %v2177_v21  ;;  %v2594_v50 = vadd.f32 %v2562_v63, %v2306_v58  ;;  %v1602_v5 = vsub.f32 1.0, %v1570_v39  ;;  %v6906_v15 = vpop.permute.xlu0 %2986  ;;  %v7834_v63 = vld [vmem:[#allocation61_spill] sm:$0xff]  ;;  %v7835_v21 = vld [vmem:[#allocation56_spill] sm:$0xff] }
 0x241   : > { %v1540_v7 = vsub.f32 %v5654_v28, %v7830_v36  ;;  %v1797_v0 = vsub.f32 %v5654_v28, %v7831_v32  ;;  %v2532_v60 = vsub.f32 1.0, %v2500_v35  ;;  %3960 = vmatmul.mubr.f32.gmra.mrb[34].mxu1 %v1920_v33  ;;  %v1859_v62 = vsub.f32 1.0, %v1827_v16  ;;  %v2182_v44 = vpop.permute.xlu1 %2181 }
 0x242   : > { %v2563_v13 = vmax.f32 %v2531_v57, 0.0  ;;  %v2501_v1 = vand.u32 2147483647, %v2469_v17  ;;  %v2470_v29 = vsub.f32 %v5654_v28, %v6886_v42  ;;  %3964 = vmatprep.mubr.f32.mxu1 %v2594_v50  ;;  %v1890_v25 = vmax.f32 %v1858_v45, 0.0 }
 0x243   : > { %v1828_v24 = vand.u32 2147483647, %v1796_v31  ;;  %v2308_v56 = vmax.f32 %v2276_v30, 0.0  ;;  %4884 = vset.pattern.permute.xlu1 %v7798_v47  ;;  %v1921_v12 = vadd.f32 %v1889_v43, %v7832_v27  ;;  %v2277_v26 = vsub.f32 1.0, %v2245_v37 }
 0x244   : > { %v2246_v59 = vand.u32 2147483647, %v2214_v14  ;;  %v2215_v4 = vsub.f32 %v5654_v28, %v2182_v44  ;;  %2329 = vperm.xlu1 %4884, %v7833_v9   ;;  %v2595_v8 = vadd.f32 %v2563_v13, %v2307_v19  ;;  %v1634_v55 = vmax.f32 %v1602_v5, 0.0  ;;  %v2991_v53 = vpop.permute.xlu0 %2990 }
 0x245   : > { %v1572_v54 = vand.u32 2147483647, %v1540_v7  ;;  %v1829_v34 = vand.u32 2147483647, %v1797_v0  ;;  %v2564_v42 = vmax.f32 %v2532_v60, 0.0  ;;  %3965 = vmatmul.mubr.f32.gmra.mrb[36].mxu1 %v1921_v12  ;;  %v1891_v52 = vmax.f32 %v1859_v62, 0.0  ;;  %v2700_v58 = vpop.permute.xlu1 %2699 }
 0x246   : > { %v2533_v3 = vsub.f32 1.0, %v2501_v1  ;;  %v2502_v22 = vand.u32 2147483647, %v2470_v29  ;;  %v2471_v61 = vsub.f32 %v5654_v28, %v6894_v51  ;;  %3969 = vmatprep.mubr.f32.mxu1 %v2595_v8  ;;  %v1860_v48 = vsub.f32 1.0, %v1828_v24 }
 0x247   : > { %v1798_v11 = vsub.f32 %v5654_v28, %v6623_v40  ;;  %v1922_v2 = vadd.f32 %v1890_v25, %v1634_v55  ;;  %v2596_v20 = vadd.f32 %v2564_v42, %v2308_v56  ;;  %v2309_v39 = vmax.f32 %v2277_v26, 0.0 }
 0x248   : > { %v2278_v43 = vsub.f32 1.0, %v2246_v59  ;;  %v2247_v35 = vand.u32 2147483647, %v2215_v4  ;;  %v2857_v16 = vsub.f32 %v5654_v28, %v2700_v58  ;;  %3086 = vperm.xlu1 %4884, %v7834_v63   ;;  %v1605_v57 = vsub.f32 1.0, %v6868_v10  ;;  %v2995_v31 = vpop.permute.xlu0 %2994  ;;  %v7836_v10 = vld [vmem:[#allocation109_spill] sm:$0xff] }
 0x249   : > { %v1604_v17 = vsub.f32 1.0, %v1572_v54  ;;  %v1542_v51 = vsub.f32 %v5654_v28, %v7835_v21  ;;  %v1861_v45 = vsub.f32 1.0, %v1829_v34  ;;  %3970 = vmatmul.mubr.f32.gmra.mrb[38].mxu1 %v1922_v2  ;;  %v2565_v30 = vmax.f32 %v2533_v3, 0.0  ;;  %v2705_v37 = vpop.permute.xlu1 %2704 }
 0x24a   : > { %v2534_v40 = vsub.f32 1.0, %v2502_v22  ;;  %v2503_v33 = vand.u32 2147483647, %v2471_v61  ;;  %v3113_v19 = vsub.f32 %v5654_v28, %v6906_v15  ;;  %3974 = vmatprep.mubr.f32.mxu1 %v2596_v20  ;;  %v1892_v14 = vmax.f32 %v1860_v48, 0.0  ;;  %v7837_v48 = vld [vmem:[#allocation118_spill] sm:$0xff] }
 0x24b   : > { %v1830_v50 = vand.u32 2147483647, %v1798_v11  ;;  %v2858_v5 = vsub.f32 %v5654_v28, %v2705_v37  ;;  %v1923_v36 = vadd.f32 %v1891_v52, %v7836_v10  ;;  %v2310_v7 = vmax.f32 %v2278_v43, 0.0 }
 0x24c   : > { %v2279_v32 = vsub.f32 1.0, %v2247_v35  ;;  %v2889_v0 = vand.u32 2147483647, %v2857_v16  ;;  %4885 = vset.pattern.permute.xlu1 %v7805_v38  ;;  %v2597_v60 = vadd.f32 %v2565_v30, %v2309_v39  ;;  %v1636_v62 = vmax.f32 %v1604_v17, 0.0  ;;  %v2999_v15 = vpop.permute.xlu0 %2998 }
 0x24d   : > { %v1574_v13 = vand.u32 2147483647, %v1542_v51  ;;  %v1893_v1 = vmax.f32 %v1861_v45, 0.0  ;;  %v3114_v29 = vsub.f32 %v5654_v28, %v2991_v53  ;;  %2829 = vperm.xlu1 %4885, %v6776_v18   ;;  %3975 = vmatmul.mubr.f32.gmra.mrb[40].mxu1 %v1923_v36  ;;  %v2566_v44 = vmax.f32 %v2534_v40, 0.0  ;;  %v2710_v27 = vpop.permute.xlu1 %2709 }
 0x24e   : > { %v2535_v25 = vsub.f32 1.0, %v2503_v33  ;;  %v3145_v24 = vand.u32 2147483647, %v3113_v19  ;;  %v3115_v56 = vsub.f32 %v5654_v28, %v2995_v31  ;;  %3979 = vmatprep.mubr.f32.mxu1 %v2597_v60  ;;  %v1862_v12 = vsub.f32 1.0, %v1830_v50 }
 0x24f   : > { %v2890_v26 = vand.u32 2147483647, %v2858_v5  ;;  %v2859_v59 = vsub.f32 %v5654_v28, %v2710_v27  ;;  %v1924_v4 = vadd.f32 %v1892_v14, %v1636_v62  ;;  %v2311_v9 = vmax.f32 %v2279_v32, 0.0 }
 0x250   : > { %v2921_v8 = vsub.f32 1.0, %v2889_v0  ;;  %v3116_v55 = vsub.f32 %v5654_v28, %v2999_v15  ;;  %v2598_v54 = vadd.f32 %v2566_v44, %v2310_v7  ;;  %v1637_v18 = vmax.f32 %v1605_v57, 0.0  ;;  %v3003_v52 = vpop.permute.xlu0 %3002 }
 0x251   : > { %v1606_v34 = vsub.f32 1.0, %v1574_v13  ;;  %v3146_v42 = vand.u32 2147483647, %v3114_v29  ;;  %v2891_v53 = vand.u32 2147483647, %v2859_v59  ;;  %4886 = vset.pattern.permute.xlu1 %v7798_v47  ;;  %3980 = vmatmul.mubr.f32.gmra.mrb[42].mxu1 %v1924_v4  ;;  %v2567_v3 = vmax.f32 %v2535_v25, 0.0  ;;  %v2715_v11 = vpop.permute.xlu1 %2714 }
 0x252   : > { %v3177_v22 = vsub.f32 1.0, %v3145_v24  ;;  %v3147_v61 = vand.u32 2147483647, %v3115_v56  ;;  %v3117_v58 = vsub.f32 %v5654_v28, %v3003_v52  ;;  %2333 = vperm.xlu1 %4886, %v7837_v48   ;;  %3984 = vmatprep.mubr.f32.mxu1 %v2598_v54  ;;  %v1894_v2 = vmax.f32 %v1862_v12, 0.0  ;;  %v7838_v52 = vld [vmem:[#allocation53_spill] sm:$0xff] }
 0x253   : > { %v2922_v20 = vsub.f32 1.0, %v2890_v26  ;;  %v2860_v39 = vsub.f32 %v5654_v28, %v2715_v11  ;;  %v1925_v43 = vadd.f32 %v1893_v1, %v1637_v18  ;;  %v2953_v35 = vmax.f32 %v2921_v8, 0.0 }
 0x254   : > { %v3148_v16 = vand.u32 2147483647, %v3116_v55  ;;  %v2923_v63 = vsub.f32 1.0, %v2891_v53  ;;  %v2599_v57 = vadd.f32 %v2567_v3, %v2311_v9  ;;  %v1638_v17 = vmax.f32 %v1606_v34, 0.0  ;;  %v3007_v31 = vpop.permute.xlu0 %3006 }
 0x255   : > { %v3178_v21 = vsub.f32 1.0, %v3146_v42  ;;  %v3149_v51 = vand.u32 2147483647, %v3117_v58  ;;  %v2892_v45 = vand.u32 2147483647, %v2860_v39  ;;  %3985 = vmatmul.mubr.f32.gmra.mrb[44].mxu1 %v1925_v43  ;;  %v3209_v30 = vmax.f32 %v3177_v22, 0.0  ;;  %v2720_v19 = vpop.permute.xlu1 %2719 }
 0x256   : > { %v3179_v40 = vsub.f32 1.0, %v3147_v61  ;;  %v3118_v33 = vsub.f32 %v5654_v28, %v3007_v31  ;;  %4887 = vset.pattern.permute.xlu1 %v7805_v38  ;;  %3989 = vmatprep.mubr.f32.mxu1 %v2599_v57  ;;  %v2954_v37 = vmax.f32 %v2922_v20, 0.0  ;;  %v2861_v50 = vsub.f32 %v5654_v28, %v2720_v19 }
 0x257   : > { %v2924_v14 = vsub.f32 1.0, %v2892_v45  ;;  %2834 = vperm.xlu1 %4887, %v6790_v6   ;;  %v1926_v5 = vadd.f32 %v1894_v2, %v1638_v17  ;;  %v3180_v10 = vsub.f32 1.0, %v3148_v16  ;;  %v2955_v36 = vmax.f32 %v2923_v63, 0.0  ;;  %v7839_v16 = vld [vmem:[#allocation63_spill] sm:$0xff] }
 0x258   : > { %v3150_v7 = vand.u32 2147483647, %v3118_v33  ;;  %v3241_v32 = vadd.f32 %v3209_v30, %v2953_v35  ;;  %v3210_v0 = vmax.f32 %v3178_v21, 0.0  ;;  %v3181_v60 = vsub.f32 1.0, %v3149_v51  ;;  %v3011_v13 = vpop.permute.xlu0 %3010 }
 0x259   : > { %v2893_v62 = vand.u32 2147483647, %v2861_v50  ;;  %3990 = vmatmul.mubr.f32.gmra.mrb[46].mxu1 %v1926_v5  ;;  %v3211_v1 = vmax.f32 %v3179_v40, 0.0  ;;  %v3119_v29 = vsub.f32 %v5654_v28, %v3011_v13  ;;  %v2725_v15 = vpop.permute.xlu1 %2724  ;;  %v2956_v25 = vmax.f32 %v2924_v14, 0.0 }
 0x25a   : > { %4563 = vmatprep.mubr.f32.mxu1 %v3241_v32  ;;  %v3242_v44 = vadd.f32 %v3210_v0, %v2954_v37  ;;  %v2862_v6 = vsub.f32 %v5654_v28, %v2725_v15  ;;  %v3212_v56 = vmax.f32 %v3180_v10, 0.0  ;;  %v3182_v27 = vsub.f32 1.0, %v3150_v7 }
 0x25b   : > { %v2925_v24 = vsub.f32 1.0, %v2893_v62  ;;  %2839 = vperm.xlu1 %4887, %v6808_v23   ;;  %v3243_v12 = vadd.f32 %v3211_v1, %v2955_v36  ;;  %v3213_v26 = vmax.f32 %v3181_v60, 0.0  ;;  %v3151_v4 = vand.u32 2147483647, %v3119_v29 }
 0x25c   : > { %v2894_v9 = vand.u32 2147483647, %v2862_v6  ;;  %v3015_v8 = vpop.permute.xlu0 %3014  ;;  %v3244_v42 = vadd.f32 %v3212_v56, %v2956_v25  ;;  %v3214_v53 = vmax.f32 %v3182_v27, 0.0  ;;  %v7840_v25 = vld [vmem:[#allocation119_spill] sm:$0xff] }
 0x25d   : > { %v2957_v59 = vmax.f32 %v2925_v24, 0.0  ;;  %4564 = vmatmul.mubr.f32.vlgmr.msra.gmra.mrb[48].mxu1 %v3242_v44  ;;  %v3120_v55 = vsub.f32 %v5654_v28, %v3015_v8  ;;  %v2730_v54 = vpop.permute.xlu1 %2729  ;;  %v3183_v3 = vsub.f32 1.0, %v3151_v4 }
 0x25e   : > { %4566 = vmatprep.mubr.f32.mxu1 %v3243_v12  ;;  %v2926_v18 = vsub.f32 1.0, %v2894_v9  ;;  %v2863_v34 = vsub.f32 %v5654_v28, %v2730_v54 }
 0x25f   : > { %4888 = vset.pattern.permute.xlu1 %v7798_v47  ;;  %v3245_v23 = vadd.f32 %v3213_v26, %v2957_v59  ;;  %v3152_v61 = vand.u32 2147483647, %v3120_v55  ;;  %v3215_v63 = vmax.f32 %v3183_v3, 0.0 }
 0x260   : > { %2337 = vperm.xlu1 %4888, %v7838_v52   ;;  %v2958_v22 = vmax.f32 %v2926_v18, 0.0  ;;  %v2895_v58 = vand.u32 2147483647, %v2863_v34  ;;  %v3019_v48 = vpop.permute.xlu0 %3018 }
 0x261   : > { %4567 = vmatmul.mubr.f32.gmra.mrb[50].mxu1 %v3244_v42  ;;  %v3121_v11 = vsub.f32 %v5654_v28, %v3019_v48  ;;  %v2735_v2 = vpop.permute.xlu1 %2734  ;;  %v3184_v57 = vsub.f32 1.0, %v3152_v61 }
 0x262   : > { %4569 = vmatprep.mubr.f32.mxu1 %v3245_v23  ;;  %v2927_v20 = vsub.f32 1.0, %v2895_v58  ;;  %v2864_v39 = vsub.f32 %v5654_v28, %v2735_v2  ;;  %v3246_v43 = vadd.f32 %v3214_v53, %v2958_v22 }
 0x263   : > { %v3153_v35 = vand.u32 2147483647, %v3121_v11  ;;  %v3216_v37 = vmax.f32 %v3184_v57, 0.0 }
 0x264   : > { %3102 = vperm.xlu1 %4888, %v7839_v16   ;;  %v2959_v17 = vmax.f32 %v2927_v20, 0.0  ;;  %v2896_v21 = vand.u32 2147483647, %v2864_v39  ;;  %v3023_v51 = vpop.permute.xlu0 %3022 }
 0x265   : > { %4570 = vmatmul.mubr.f32.gmra.mrb[52].mxu1 %v3246_v43  ;;  %v3122_v45 = vsub.f32 %v5654_v28, %v3023_v51  ;;  %v2740_v31 = vpop.permute.xlu1 %2739  ;;  %v3185_v19 = vsub.f32 1.0, %v3153_v35 }
 0x266   : > { %v2928_v30 = vsub.f32 1.0, %v2896_v21  ;;  %v2865_v40 = vsub.f32 %v5654_v28, %v2740_v31  ;;  %v3247_v33 = vadd.f32 %v3215_v63, %v2959_v17 }
 0x267   : > { %v3154_v50 = vand.u32 2147483647, %v3122_v45  ;;  %v3217_v62 = vmax.f32 %v3185_v19, 0.0 }
 0x268   : > { %4890 = vset.pattern.permute.xlu1 %v7805_v38  ;;  %v2960_v14 = vmax.f32 %v2928_v30, 0.0  ;;  %v2897_v5 = vand.u32 2147483647, %v2865_v40  ;;  %4572 = vmatprep.mubr.f32.mxu1 %v3247_v33  ;;  %v3027_v10 = vpop.permute.xlu0 %3026 }
 0x269   : > { %2849 = vperm.xlu1 %4890, %v6821_v41   ;;  %v3123_v36 = vsub.f32 %v5654_v28, %v3027_v10  ;;  %v2745_v7 = vpop.permute.xlu1 %2744  ;;  %v3186_v13 = vsub.f32 1.0, %v3154_v50 }
 0x26a   : > { %v2929_v32 = vsub.f32 1.0, %v2897_v5  ;;  %v2866_v0 = vsub.f32 %v5654_v28, %v2745_v7  ;;  %v3248_v60 = vadd.f32 %v3216_v37, %v2960_v14 }
 0x26b   : > { %v3155_v29 = vand.u32 2147483647, %v3123_v36  ;;  %v3218_v59 = vmax.f32 %v3186_v13, 0.0 }
 0x26c   : > { %v2961_v1 = vmax.f32 %v2929_v32, 0.0  ;;  %v2898_v15 = vand.u32 2147483647, %v2866_v0  ;;  %4573 = vmatmul.mubr.f32.gmra.mrb[54].mxu1 %v3248_v60  ;;  %v3031_v44 = vpop.permute.xlu0 %3030 }
 0x26d   : > { %4891 = vset.pattern.permute.xlu1 %v7798_v47  ;;  %v3124_v41 = vsub.f32 %v5654_v28, %v3031_v44  ;;  %v2750_v24 = vpop.permute.xlu1 %2749  ;;  %v3187_v4 = vsub.f32 1.0, %v3155_v29 }
 0x26e   : > { %2341 = vperm.xlu1 %4891, %v7840_v25   ;;  %v2930_v6 = vsub.f32 1.0, %v2898_v15  ;;  %v2867_v56 = vsub.f32 %v5654_v28, %v2750_v24  ;;  %v3249_v27 = vadd.f32 %v3217_v62, %v2961_v1 }
 0x26f   : > { %v3156_v12 = vand.u32 2147483647, %v3124_v41  ;;  %v6961_v26 = vpop.f32.mrb[16].mxu0  ;;  %v3219_v22 = vmax.f32 %v3187_v4, 0.0 }
 0x270   : > { %v2962_v9 = vmax.f32 %v2930_v6, 0.0  ;;  %v2899_v8 = vand.u32 2147483647, %v2867_v56  ;;  %v3653_v55 = vpop.f32.mrb[17].mxu0  ;;  %4575 = vmatprep.mubr.f32.mxu1 %v3249_v27  ;;  %v3035_v47 = vpop.permute.xlu0 %3034 }
 0x271   : > { %v3125_v54 = vsub.f32 %v5654_v28, %v3035_v47  ;;  %v2755_v18 = vpop.permute.xlu1 %2754  ;;  %v3188_v53 = vsub.f32 1.0, %v3156_v12 }
 0x272   : > { %4892 = vset.pattern.permute.xlu1 %v7805_v38  ;;  %v2931_v34 = vsub.f32 1.0, %v2899_v8  ;;  %v2868_v42 = vsub.f32 %v5654_v28, %v2755_v18  ;;  %v3250_v23 = vadd.f32 %v3218_v59, %v2962_v9  ;;  %v7841_v9 = vld [vmem:[#allocation80_spill] sm:$0xff] }
 0x273   : > { %2854 = vperm.xlu1 %4892, %v6840_v46   ;;  %v3157_v52 = vand.u32 2147483647, %v3125_v54  ;;  %v6967_v3 = vpop.f32.mrb[18].mxu0  ;;  %v3220_v35 = vmax.f32 %v3188_v53, 0.0  ;;  %v1767_v8 = vsub.f32 %v5654_v28, %v7841_v9  ;;  %v7842_v53 = vld [vmem:[#allocation83_spill] sm:$0xff] }
 0x274   : > { %v2963_v61 = vmax.f32 %v2931_v34, 0.0  ;;  %v2900_v58 = vand.u32 2147483647, %v2868_v42  ;;  %v3658_v48 = vpop.f32.mrb[19].mxu0  ;;  %4576 = vmatmul.mubr.f32.gmra.mrb[56].mxu1 %v3250_v23  ;;  %v3039_v11 = vpop.permute.xlu0 %3038 }
 0x275   : > { %v3126_v2 = vsub.f32 %v5654_v28, %v3039_v11  ;;  %v2760_v38 = vpop.permute.xlu1 %2759  ;;  %v3189_v46 = vsub.f32 1.0, %v3157_v52  ;;  %v2184_v52 = vsub.f32 %v5654_v28, %v7842_v53 }
 0x276   : > { %v2932_v20 = vsub.f32 1.0, %v2900_v58  ;;  %v2869_v39 = vsub.f32 %v5654_v28, %v2760_v38  ;;  %v3251_v43 = vadd.f32 %v3219_v22, %v2963_v61  ;;  %v7843_v61 = vld [vmem:[#allocation98_spill] sm:$0xff]  ;;  %v1799_v38 = vand.u32 2147483647, %v1767_v8 }
 0x277   : > { %v6971_v16 = vpop.f32.mrb[20].mxu0  ;;  %v3158_v57 = vand.u32 2147483647, %v3126_v2  ;;  %v3221_v14 = vmax.f32 %v3189_v46, 0.0  ;;  %v1511_v58 = vsub.f32 %v5654_v28, %v7843_v61 }
 0x278   : > { %v2964_v63 = vmax.f32 %v2932_v20, 0.0  ;;  %v2901_v17 = vand.u32 2147483647, %v2869_v39  ;;  %v3663_v21 = vpop.f32.mrb[21].mxu0  ;;  %4578 = vmatprep.mubr.f32.mxu1 %v3251_v43  ;;  %v3043_v51 = vpop.permute.xlu0 %3042 }
 0x279   : > { %v3127_v45 = vsub.f32 %v5654_v28, %v3043_v51  ;;  %v2765_v31 = vpop.permute.xlu1 %2764  ;;  %v3190_v50 = vsub.f32 1.0, %v3158_v57  ;;  %v7844_v57 = vld [vmem:[#allocation128_spill] sm:$0xff]  ;;  %v2216_v21 = vand.u32 2147483647, %v2184_v52  ;;  %v1543_v51 = vand.u32 2147483647, %v1511_v58 }
 0x27a   : > { %v2933_v30 = vsub.f32 1.0, %v2901_v17  ;;  %v2870_v40 = vsub.f32 %v5654_v28, %v2765_v31  ;;  %v3252_v33 = vadd.f32 %v3220_v35, %v2964_v63  ;;  %v2874_v17 = vsub.f32 %v5654_v28, %v7844_v57 }
 0x27b   : > { %v3159_v19 = vand.u32 2147483647, %v3127_v45  ;;  %v6975_v37 = vpop.f32.mrb[22].mxu0  ;;  %v3222_v44 = vmax.f32 %v3190_v50, 0.0 }
 0x27c   : > { %v2965_v5 = vmax.f32 %v2933_v30, 0.0  ;;  %v2902_v10 = vand.u32 2147483647, %v2870_v40  ;;  %v3668_v36 = vpop.f32.mrb[23].mxu0  ;;  %4579 = vmatmul.mubr.f32.gmra.mrb[58].mxu1 %v3252_v33  ;;  %v3047_v7 = vpop.permute.xlu0 %3046 }
 0x27d   : > { %v3128_v32 = vsub.f32 %v5654_v28, %v3047_v7  ;;  %v2770_v0 = vpop.permute.xlu1 %2769  ;;  %v3191_v1 = vsub.f32 1.0, %v3159_v19  ;;  %v2906_v36 = vand.u32 2147483647, %v2874_v17  ;;  %v2248_v7 = vsub.f32 1.0, %v2216_v21 }
 0x27e   : > { %v2934_v60 = vsub.f32 1.0, %v2902_v10  ;;  %v2871_v62 = vsub.f32 %v5654_v28, %v2770_v0  ;;  %v3253_v13 = vadd.f32 %v3221_v14, %v2965_v5  ;;  %v1831_v14 = vsub.f32 1.0, %v1799_v38 }
 0x27f   : > { %v3160_v29 = vand.u32 2147483647, %v3128_v32  ;;  %v6979_v15 = vpop.f32.mrb[24].mxu0  ;;  %v3223_v55 = vmax.f32 %v3191_v1, 0.0  ;;  %v1575_v0 = vsub.f32 1.0, %v1543_v51 }
 0x280   : > { %v2966_v41 = vmax.f32 %v2934_v60, 0.0  ;;  %v2903_v25 = vand.u32 2147483647, %v2871_v62  ;;  %v3673_v24 = vpop.f32.mrb[25].mxu0  ;;  %4581 = vmatprep.mubr.f32.mxu1 %v3253_v13  ;;  %v3051_v6 = vpop.permute.xlu0 %3050 }
 0x281   : > { %v3129_v56 = vsub.f32 %v5654_v28, %v3051_v6  ;;  %v2775_v27 = vpop.permute.xlu1 %2774  ;;  %v3192_v47 = vsub.f32 1.0, %v3160_v29  ;;  %v2938_v24 = vsub.f32 1.0, %v2906_v36  ;;  %v2280_v6 = vmax.f32 %v2248_v7, 0.0 }
 0x282   : > { %v2935_v12 = vsub.f32 1.0, %v2903_v25  ;;  %v2872_v59 = vsub.f32 %v5654_v28, %v2775_v27  ;;  %v3254_v4 = vadd.f32 %v3222_v44, %v2966_v41  ;;  %v1863_v41 = vmax.f32 %v1831_v14, 0.0 }
 0x283   : > { %v3161_v34 = vand.u32 2147483647, %v3129_v56  ;;  %v3224_v39 = vmax.f32 %v3192_v47, 0.0 }
 0x284   : > { %v6985_v54 = vpop.f32.mrb[26].mxu0  ;;  %v2967_v18 = vmax.f32 %v2935_v12, 0.0  ;;  %v2904_v42 = vand.u32 2147483647, %v2872_v59  ;;  %4582 = vmatmul.mubr.f32.gmra.mrb[60].mxu1 %v3254_v4  ;;  %v3059_v40 = vpop.permute.xlu0 %3058  ;;  %v1607_v12 = vmax.f32 %v1575_v0, 0.0  ;;  %v7845_v59 = vld [vmem:[#allocation25_spill] sm:$0xff] }
 0x285   : > { %v3678_v23 = vpop.f32.mrb[27].mxu0  ;;  %v2780_v22 = vpop.permute.xlu1 %2779  ;;  %v3193_v43 = vsub.f32 1.0, %v3161_v34  ;;  %v3131_v60 = vsub.f32 %v5654_v28, %v3059_v40  ;;  %v1768_v4 = vsub.f32 %v5654_v28, %v7845_v59 }
 0x286   : > { %v2936_v48 = vsub.f32 1.0, %v2904_v42  ;;  %v2873_v11 = vsub.f32 %v5654_v28, %v2780_v22  ;;  %v3255_v2 = vadd.f32 %v3223_v55, %v2967_v18  ;;  %v7846_v55 = vld [vmem:[#allocation75_spill] sm:$0xff]  ;;  %v7847_v18 = vld [vmem:[#allocation94_spill] sm:$0xff]  ;;  %v1895_v22 = vadd.f32 %v1863_v41, %v1607_v12 }
 0x287   : > { %v3225_v50 = vmax.f32 %v3193_v43, 0.0  ;;  %v3163_v9 = vand.u32 2147483647, %v3131_v60  ;;  %v1512_v47 = vsub.f32 %v5654_v28, %v7846_v55  ;;  %v2185_v34 = vsub.f32 %v5654_v28, %v7847_v18  ;;  %v7850_v18 = vld [vmem:[#allocation103_spill] sm:$0xff] }
 0x288   : > { %v6992_v20 = vpop.f32.mrb[28].mxu0  ;;  %v2968_v35 = vmax.f32 %v2936_v48, 0.0  ;;  %v2905_v46 = vand.u32 2147483647, %v2873_v11  ;;  %4584 = vmatprep.mubr.f32.mxu1 %v3255_v2  ;;  %v3063_v8 = vpop.permute.xlu0 %3062  ;;  %v2970_v48 = vmax.f32 %v2938_v24, 0.0 }
 0x289   : > { %v3683_v63 = vpop.f32.mrb[29].mxu0  ;;  %v1800_v2 = vand.u32 2147483647, %v1768_v4  ;;  %v3195_v38 = vsub.f32 1.0, %v3163_v9  ;;  %v1544_v43 = vand.u32 2147483647, %v1512_v47  ;;  %v3132_v57 = vsub.f32 %v5654_v28, %v3063_v8 }
 0x28a   : > { %v2937_v45 = vsub.f32 1.0, %v2905_v46  ;;  %v3256_v30 = vadd.f32 %v3224_v39, %v2968_v35  ;;  %v2217_v35 = vand.u32 2147483647, %v2185_v34  ;;  %v7849_v9 = vld [vmem:[#allocation100_spill] sm:$0xff]  ;;  %v1513_v34 = vsub.f32 %v5654_v28, %v7850_v18  ;;  %v7854_v18 = vld [vmem:[#allocation107_spill] sm:$0xff] }
 0x28b   : > { %v2314_v31 = vpop.permute.xlu1 %2313  ;;  %v3227_v40 = vmax.f32 %v3195_v38, 0.0  ;;  %v1576_v14 = vsub.f32 1.0, %v1544_v43  ;;  %v3164_v36 = vand.u32 2147483647, %v3132_v57  ;;  %v2186_v8 = vsub.f32 %v5654_v28, %v7849_v9  ;;  %v7851_v38 = vld [vmem:[#allocation68_spill] sm:$0xff] }
 0x28c   : > { %v2440_v33 = vsub.f32 %v5654_v28, %v2314_v31  ;;  %v6997_v19 = vpop.f32.mrb[30].mxu0  ;;  %v2969_v5 = vmax.f32 %v2937_v45, 0.0  ;;  %4585 = vmatmul.mubr.f32.gmra.mrb[62].mxu1 %v3256_v30  ;;  %v3067_v45 = vpop.permute.xlu0 %3066  ;;  %v1832_v30 = vsub.f32 1.0, %v1800_v2 }
 0x28d   : > { %v3688_v10 = vpop.f32.mrb[31].mxu0  ;;  %v3133_v7 = vsub.f32 %v5654_v28, %v3067_v45  ;;  %v2218_v43 = vand.u32 2147483647, %v2186_v8 }
 0x28e   : > { %v2472_v32 = vand.u32 2147483647, %v2440_v33  ;;  %v3257_v13 = vadd.f32 %v3225_v50, %v2969_v5  ;;  %v2249_v50 = vsub.f32 1.0, %v2217_v35 }
 0x28f   : > { %v3055_v62 = vpop.permute.xlu1 %3054  ;;  %v3165_v12 = vand.u32 2147483647, %v3133_v7 }
 0x290   : > { %v2504_v1 = vsub.f32 1.0, %v2472_v32  ;;  %v3130_v29 = vsub.f32 %v5654_v28, %v3055_v62  ;;  %v7001_v44 = vpop.f32.mrb[32].mxu0  ;;  %4587 = vmatprep.mubr.f32.mxu1 %v3257_v13  ;;  %v1864_v13 = vmax.f32 %v1832_v30, 0.0  ;;  %v2281_v41 = vmax.f32 %v2249_v50, 0.0 }
 0x291   : > { %v3693_v25 = vpop.f32.mrb[33].mxu0 }
 0x292   : > { %v2536_v56 = vmax.f32 %v2504_v1, 0.0  ;;  %v3162_v27 = vand.u32 2147483647, %v3130_v29  ;;  %v1608_v29 = vmax.f32 %v1576_v14, 0.0  ;;  %v7848_v25 = vld [vmem:[#allocation57_spill] sm:$0xff] }
 0x293   : > { %v1769_v24 = vsub.f32 %v5654_v28, %v7848_v25 }
 0x294   : > { %v3194_v42 = vsub.f32 1.0, %v3162_v27  ;;  %v2790_v23 = vpop.permute.xlu1 %2789  ;;  %v7009_v53 = vpop.f32.mrb[34].mxu0  ;;  %v2568_v52 = vadd.f32 %v2536_v56, %v2280_v6  ;;  %v3196_v27 = vsub.f32 1.0, %v3164_v36 }
 0x295   : > { %v2875_v61 = vsub.f32 %v5654_v28, %v2790_v23  ;;  %v3698_v58 = vpop.f32.mrb[35].mxu0 }
 0x296   : > { %v3226_v11 = vmax.f32 %v3194_v42, 0.0  ;;  %3834 = vmatprep.mubr.f32.mxu0 %v2568_v52  ;;  %v1896_v52 = vadd.f32 %v1864_v13, %v1608_v29  ;;  %v3228_v58 = vmax.f32 %v3196_v27, 0.0 }
 0x297   : > { %v2907_v39 = vand.u32 2147483647, %v2875_v61  ;;  %3835 = vmatmul.mubr.f32.vlgmr.msra.gmra.mrb[0].mxu0 %v1895_v22  ;;  %v1801_v22 = vand.u32 2147483647, %v1769_v24 }
 0x298   : > { %v7012_v46 = vpop.f32.mrb[36].mxu0  ;;  %v3258_v63 = vadd.f32 %v3226_v11, %v2970_v48  ;;  %v3197_v48 = vsub.f32 1.0, %v3165_v12 }
 0x299   : > { %v2939_v17 = vsub.f32 1.0, %v2907_v39  ;;  %v2318_v21 = vpop.permute.xlu1 %2317  ;;  %v3703_v51 = vpop.f32.mrb[37].mxu0  ;;  %v2878_v39 = vsub.f32 %v5654_v28, %v7851_v38  ;;  %v1833_v30 = vsub.f32 1.0, %v1801_v22 }
 0x29a   : > { %v2441_v31 = vsub.f32 %v5654_v28, %v2318_v21  ;;  %4588 = vmatmul.mubr.f32.gmra.mrb[64].mxu1 %v3258_v63  ;;  %v1545_v63 = vand.u32 2147483647, %v1513_v34  ;;  %v3075_v51 = vpop.permute.xlu0 %3074  ;;  %v2187_v34 = vsub.f32 %v5654_v28, %v7854_v18 }
 0x29b   : > { %v2971_v33 = vmax.f32 %v2939_v17, 0.0  ;;  %v2910_v50 = vand.u32 2147483647, %v2878_v39  ;;  %v1865_v29 = vmax.f32 %v1833_v30, 0.0 }
 0x29c   : > { %v2473_v5 = vand.u32 2147483647, %v2441_v31  ;;  %v7016_v10 = vpop.f32.mrb[38].mxu0  ;;  %v1577_v7 = vsub.f32 1.0, %v1545_v63 }
 0x29d   : > { %v3708_v32 = vpop.f32.mrb[39].mxu0  ;;  %v3259_v0 = vadd.f32 %v3227_v40, %v2971_v33  ;;  %v3229_v40 = vmax.f32 %v3197_v48, 0.0  ;;  %v2942_v25 = vsub.f32 1.0, %v2910_v50 }
 0x29e   : > { %v2505_v60 = vsub.f32 1.0, %v2473_v5  ;;  %v2795_v62 = vpop.permute.xlu1 %2794  ;;  %v2250_v5 = vsub.f32 1.0, %v2218_v43  ;;  %v3135_v32 = vsub.f32 %v5654_v28, %v3075_v51  ;;  %v1609_v12 = vmax.f32 %v1577_v7, 0.0  ;;  %v3079_v8 = vpop.permute.xlu0 %3078 }
 0x29f   : > { %v2876_v1 = vsub.f32 %v5654_v28, %v2795_v62  ;;  %4590 = vmatprep.mubr.f32.mxu1 %v3259_v0  ;;  %v3136_v51 = vsub.f32 %v5654_v28, %v3079_v8 }
 0x2a0   : > { %v2537_v6 = vmax.f32 %v2505_v60, 0.0  ;;  %v7022_v56 = vpop.f32.mrb[40].mxu0  ;;  %v2282_v24 = vmax.f32 %v2250_v5, 0.0  ;;  %v3167_v9 = vand.u32 2147483647, %v3135_v32 }
 0x2a1   : > { %v2908_v59 = vand.u32 2147483647, %v2876_v1  ;;  %v3713_v4 = vpop.f32.mrb[41].mxu0 }
 0x2a2   : > { %v2800_v55 = vpop.permute.xlu1 %2799  ;;  %v2569_v47 = vadd.f32 %v2537_v6, %v2281_v41  ;;  %v3199_v43 = vsub.f32 1.0, %v3167_v9 }
 0x2a3   : > { %v2940_v42 = vsub.f32 1.0, %v2908_v59  ;;  %v2877_v23 = vsub.f32 %v5654_v28, %v2800_v55  ;;  %v7852_v59 = vld [vmem:[#allocation30_spill] sm:$0xff] }
 0x2a4   : > { %v7029_v61 = vpop.f32.mrb[42].mxu0  ;;  %3839 = vmatprep.mubr.f32.mxu0 %v2569_v47  ;;  %v1770_v4 = vsub.f32 %v5654_v28, %v7852_v59  ;;  %v7853_v55 = vld [vmem:[#allocation62_spill] sm:$0xff]  ;;  %v3231_v5 = vmax.f32 %v3199_v43, 0.0  ;;  %v7855_v59 = vld [vmem:[#allocation29_spill] sm:$0xff] }
 0x2a5   : > { %v2972_v11 = vmax.f32 %v2940_v42, 0.0  ;;  %v2909_v2 = vand.u32 2147483647, %v2877_v23  ;;  %3840 = vmatmul.mubr.f32.gmra.mrb[2].mxu0 %v1896_v52  ;;  %v3718_v35 = vpop.f32.mrb[43].mxu0  ;;  %v1514_v47 = vsub.f32 %v5654_v28, %v7853_v55 }
 0x2a6   : > { %v1802_v39 = vand.u32 2147483647, %v1770_v4  ;;  %v1771_v4 = vsub.f32 %v5654_v28, %v7855_v59 }
 0x2a7   : > { %v2941_v57 = vsub.f32 1.0, %v2909_v2  ;;  %v2322_v17 = vpop.permute.xlu1 %2321  ;;  %v3260_v21 = vadd.f32 %v3228_v58, %v2972_v11  ;;  %v1897_v11 = vadd.f32 %v1865_v29, %v1609_v12  ;;  %v2974_v2 = vmax.f32 %v2942_v25, 0.0 }
 0x2a8   : > { %v2442_v45 = vsub.f32 %v5654_v28, %v2322_v17  ;;  %v7034_v31 = vpop.f32.mrb[44].mxu0  ;;  %v1546_v63 = vand.u32 2147483647, %v1514_v47  ;;  %v1834_v50 = vsub.f32 1.0, %v1802_v39 }
 0x2a9   : > { %v2973_v33 = vmax.f32 %v2941_v57, 0.0  ;;  %v3723_v14 = vpop.f32.mrb[45].mxu0  ;;  %4591 = vmatmul.mubr.f32.gmra.mrb[66].mxu1 %v3260_v21  ;;  %v2219_v57 = vand.u32 2147483647, %v2187_v34 }
 0x2aa   : > { %v2474_v36 = vand.u32 2147483647, %v2442_v45  ;;  %v1578_v7 = vsub.f32 1.0, %v1546_v63 }
 0x2ab   : > { %v3071_v0 = vpop.permute.xlu1 %3070  ;;  %v3261_v60 = vadd.f32 %v3229_v40, %v2973_v33  ;;  %v3083_v33 = vpop.permute.xlu0 %3082  ;;  %v2251_v32 = vsub.f32 1.0, %v2219_v57 }
 0x2ac   : > { %v2506_v62 = vsub.f32 1.0, %v2474_v36  ;;  %v3134_v13 = vsub.f32 %v5654_v28, %v3071_v0  ;;  %v7038_v1 = vpop.f32.mrb[46].mxu0  ;;  %v1610_v12 = vmax.f32 %v1578_v7, 0.0 }
 0x2ad   : > { %v3728_v41 = vpop.f32.mrb[47].mxu0  ;;  %4593 = vmatprep.mubr.f32.mxu1 %v3261_v60  ;;  %v2283_v9 = vmax.f32 %v2251_v32, 0.0 }
 0x2ae   : > { %v2538_v6 = vmax.f32 %v2506_v62, 0.0  ;;  %v3166_v27 = vand.u32 2147483647, %v3134_v13  ;;  %v3168_v62 = vand.u32 2147483647, %v3136_v51  ;;  %v3137_v13 = vsub.f32 %v5654_v28, %v3083_v33  ;;  %v7858_v33 = vld [vmem:[#allocation133_spill] sm:$0xff] }
 0x2af   : > { %v3091_v32 = vpop.permute.xlu0 %3090 }
 0x2b0   : > { %v3198_v42 = vsub.f32 1.0, %v3166_v27  ;;  %v2810_v23 = vpop.permute.xlu1 %2809  ;;  %v7046_v52 = vpop.f32.mrb[48].mxu0  ;;  %v2570_v22 = vadd.f32 %v2538_v6, %v2282_v24  ;;  %v1866_v6 = vmax.f32 %v1834_v50, 0.0  ;;  %v3200_v47 = vsub.f32 1.0, %v3168_v62 }
 0x2b1   : > { %v2879_v58 = vsub.f32 %v5654_v28, %v2810_v23  ;;  %v3733_v48 = vpop.f32.mrb[49].mxu0  ;;  %v3169_v18 = vand.u32 2147483647, %v3137_v13  ;;  %v7856_v23 = vld [vmem:[#allocation49_spill] sm:$0xff]  ;;  %v3139_v59 = vsub.f32 %v5654_v28, %v3091_v32 }
 0x2b2   : > { %v3230_v38 = vmax.f32 %v3198_v42, 0.0  ;;  %3844 = vmatprep.mubr.f32.mxu0 %v2570_v22  ;;  %v2188_v22 = vsub.f32 %v5654_v28, %v7856_v23  ;;  %v1898_v43 = vadd.f32 %v1866_v6, %v1610_v12  ;;  %v3232_v57 = vmax.f32 %v3200_v47, 0.0 }
 0x2b3   : > { %v2911_v35 = vand.u32 2147483647, %v2879_v58  ;;  %3845 = vmatmul.mubr.f32.gmra.mrb[4].mxu0 %v1897_v11  ;;  %v7857_v11 = vld [vmem:[#allocation76_spill] sm:$0xff] }
 0x2b4   : > { %v7049_v17 = vpop.f32.mrb[50].mxu0  ;;  %v3262_v21 = vadd.f32 %v3230_v38, %v2974_v2  ;;  %v1515_v2 = vsub.f32 %v5654_v28, %v7857_v11 }
 0x2b5   : > { %v2943_v45 = vsub.f32 1.0, %v2911_v35  ;;  %v2326_v30 = vpop.permute.xlu1 %2325  ;;  %v3738_v40 = vpop.f32.mrb[51].mxu0  ;;  %v1803_v35 = vand.u32 2147483647, %v1771_v4 }
 0x2b6   : > { %v2443_v14 = vsub.f32 %v5654_v28, %v2326_v30  ;;  %4594 = vmatmul.mubr.f32.gmra.mrb[68].mxu1 %v3262_v21  ;;  %v3201_v21 = vsub.f32 1.0, %v3169_v18  ;;  %v2220_v40 = vand.u32 2147483647, %v2188_v22  ;;  %v1547_v50 = vand.u32 2147483647, %v1515_v2  ;;  %v7859_v2 = vld [vmem:[#allocation97_spill] sm:$0xff] }
 0x2b7   : > { %v2975_v36 = vmax.f32 %v2943_v45, 0.0  ;;  %v1835_v13 = vsub.f32 1.0, %v1803_v35  ;;  %v7860_v35 = vld [vmem:[#allocation106_spill] sm:$0xff] }
 0x2b8   : > { %v2475_v0 = vand.u32 2147483647, %v2443_v14  ;;  %v7053_v60 = vpop.f32.mrb[52].mxu0  ;;  %v2882_v14 = vsub.f32 %v5654_v28, %v7858_v33  ;;  %v1579_v12 = vsub.f32 1.0, %v1547_v50 }
 0x2b9   : > { %v3743_v29 = vpop.f32.mrb[53].mxu0  ;;  %v3263_v41 = vadd.f32 %v3231_v5, %v2975_v36 }
 0x2ba   : > { %v2507_v25 = vsub.f32 1.0, %v2475_v0  ;;  %v2815_v24 = vpop.permute.xlu1 %2814  ;;  %v3233_v29 = vmax.f32 %v3201_v21, 0.0  ;;  %v2914_v6 = vand.u32 2147483647, %v2882_v14  ;;  %v1611_v11 = vmax.f32 %v1579_v12, 0.0 }
 0x2bb   : > { %v2880_v27 = vsub.f32 %v5654_v28, %v2815_v24  ;;  %4596 = vmatprep.mubr.f32.mxu1 %v3263_v41  ;;  %v2252_v24 = vsub.f32 1.0, %v2220_v40  ;;  %v7861_v40 = vld [vmem:[#allocation113_spill] sm:$0xff] }
 0x2bc   : > { %v2539_v8 = vmax.f32 %v2507_v25, 0.0  ;;  %v7059_v55 = vpop.f32.mrb[54].mxu0  ;;  %v2946_v22 = vsub.f32 1.0, %v2914_v6  ;;  %v1516_v33 = vsub.f32 %v5654_v28, %v7861_v40 }
 0x2bd   : > { %v2912_v34 = vand.u32 2147483647, %v2880_v27  ;;  %v3748_v42 = vpop.f32.mrb[55].mxu0  ;;  %v2284_v23 = vmax.f32 %v2252_v24, 0.0 }
 0x2be   : > { %v2820_v58 = vpop.permute.xlu1 %2819  ;;  %v2571_v48 = vadd.f32 %v2539_v8, %v2283_v9  ;;  %v1548_v6 = vand.u32 2147483647, %v1516_v33 }
 0x2bf   : > { %v2944_v38 = vsub.f32 1.0, %v2912_v34  ;;  %v2881_v39 = vsub.f32 %v5654_v28, %v2820_v58  ;;  %v1867_v34 = vmax.f32 %v1835_v13, 0.0 }
 0x2c0   : > { %v7066_v63 = vpop.f32.mrb[56].mxu0  ;;  %3849 = vmatprep.mubr.f32.mxu0 %v2571_v48 }
 0x2c1   : > { %v2976_v51 = vmax.f32 %v2944_v38, 0.0  ;;  %v2913_v45 = vand.u32 2147483647, %v2881_v39  ;;  %v3753_v30 = vpop.f32.mrb[57].mxu0  ;;  %3850 = vmatmul.mubr.f32.gmra.mrb[6].mxu0 %v1898_v43  ;;  %v1772_v38 = vsub.f32 %v5654_v28, %v7859_v2  ;;  %v3171_v39 = vand.u32 2147483647, %v3139_v59  ;;  %v3095_v43 = vpop.permute.xlu0 %3094 }
 0x2c3   : > { %v2945_v5 = vsub.f32 1.0, %v2913_v45  ;;  %v2330_v36 = vpop.permute.xlu1 %2329  ;;  %v3264_v7 = vadd.f32 %v3232_v57, %v2976_v51  ;;  %v2189_v57 = vsub.f32 %v5654_v28, %v7860_v35  ;;  %v1804_v32 = vand.u32 2147483647, %v1772_v38 }
 0x2c4   : > { %v2444_v0 = vsub.f32 %v5654_v28, %v2330_v36  ;;  %v7071_v62 = vpop.f32.mrb[58].mxu0  ;;  %v2978_v36 = vmax.f32 %v2946_v22, 0.0 }
 0x2c5   : > { %v2977_v41 = vmax.f32 %v2945_v5, 0.0  ;;  %v3758_v25 = vpop.f32.mrb[59].mxu0  ;;  %4597 = vmatmul.mubr.f32.gmra.mrb[70].mxu1 %v3264_v7  ;;  %v1899_v5 = vadd.f32 %v1867_v34, %v1611_v11  ;;  %v1580_v11 = vsub.f32 1.0, %v1548_v6 }
 0x2c6   : > { %v2476_v27 = vand.u32 2147483647, %v2444_v0  ;;  %v3203_v0 = vsub.f32 1.0, %v3171_v39 }
 0x2c7   : > { %v3087_v4 = vpop.permute.xlu1 %3086  ;;  %v3265_v9 = vadd.f32 %v3233_v29, %v2977_v41  ;;  %v2221_v29 = vand.u32 2147483647, %v2189_v57  ;;  %v3140_v41 = vsub.f32 %v5654_v28, %v3095_v43 }
 0x2c8   : > { %v2508_v8 = vsub.f32 1.0, %v2476_v27  ;;  %v3138_v47 = vsub.f32 %v5654_v28, %v3087_v4  ;;  %v7075_v18 = vpop.f32.mrb[60].mxu0  ;;  %v3235_v34 = vmax.f32 %v3203_v0, 0.0  ;;  %v7863_v0 = vld [vmem:[#allocation60_spill] sm:$0xff] }
 0x2c9   : > { %v3763_v42 = vpop.f32.mrb[61].mxu0  ;;  %4599 = vmatprep.mubr.f32.mxu1 %v3265_v9  ;;  %v3099_v9 = vpop.permute.xlu0 %3098  ;;  %v3172_v22 = vand.u32 2147483647, %v3140_v41 }
 0x2ca   : > { %v2540_v58 = vmax.f32 %v2508_v8, 0.0  ;;  %v3170_v48 = vand.u32 2147483647, %v3138_v47  ;;  %v1836_v47 = vsub.f32 1.0, %v1804_v32  ;;  %v3141_v2 = vsub.f32 %v5654_v28, %v3099_v9 }
 0x2cb   : > { %v3204_v33 = vsub.f32 1.0, %v3172_v22 }
 0x2cc   : > { %v3202_v21 = vsub.f32 1.0, %v3170_v48  ;;  %v2830_v51 = vpop.permute.xlu1 %2829  ;;  %v7081_v45 = vpop.f32.mrb[62].mxu0  ;;  %v2572_v30 = vadd.f32 %v2540_v58, %v2284_v23  ;;  %v2253_v23 = vsub.f32 1.0, %v2221_v29  ;;  %v1868_v57 = vmax.f32 %v1836_v47, 0.0 }
 0x2cd   : > { %v2883_v14 = vsub.f32 %v5654_v28, %v2830_v51  ;;  %v3768_v50 = vpop.f32.mrb[63].mxu0  ;;  %v7862_v51 = vld [vmem:[#allocation72_spill] sm:$0xff]  ;;  %v3236_v9 = vmax.f32 %v3204_v33, 0.0 }
 0x2ce   : > { %v3234_v7 = vmax.f32 %v3202_v21, 0.0  ;;  %3854 = vmatprep.mubr.f32.mxu0 %v2572_v30  ;;  %v1773_v30 = vsub.f32 %v5654_v28, %v7862_v51  ;;  %v2285_v40 = vmax.f32 %v2253_v23, 0.0 }
 0x2cf   : > { %v2915_v13 = vand.u32 2147483647, %v2883_v14  ;;  %3855 = vmatmul.mubr.f32.gmra.mrb[8].mxu0 %v1899_v5  ;;  %v3876_v25 = vpop.f32.mrb[0].mxu1  ;;  %v1612_v5 = vmax.f32 %v1580_v11, 0.0 }
 0x2d0   : > { %v3266_v24 = vadd.f32 %v3234_v7, %v2978_v36  ;;  %v7088_v12 = vadd.f32 %v3876_v25, %v6961_v26  ;;  %v3878_v4 = vpop.f32.mrb[1].mxu1  ;;  %v3173_v36 = vand.u32 2147483647, %v3141_v2  ;;  %v7864_v25 = vld [vmem:[#allocation28_spill] sm:$0xff] }
 0x2d1   : > { %v2947_v27 = vsub.f32 1.0, %v2915_v13  ;;  %v2334_v59 = vpop.permute.xlu1 %2333  ;;  %v2190_v13 = vsub.f32 %v5654_v28, %v7863_v0  ;;  %v1805_v4 = vand.u32 2147483647, %v1773_v30 }
 0x2d2   : > { %v2445_v8 = vsub.f32 %v5654_v28, %v2334_v59  ;;  %4600 = vmatmul.mubr.f32.gmra.mrb[72].mxu1 %v3266_v24  ;;  %v1517_v24 = vsub.f32 %v5654_v28, %v7864_v25  ;;  %v1900_v59 = vadd.f32 %v1868_v57, %v1612_v5  ;;  %v3205_v47 = vsub.f32 1.0, %v3173_v36 }
 0x2d3   : > { %v2979_v42 = vmax.f32 %v2947_v27, 0.0  ;;  %v3881_v48 = vpop.f32.mrb[2].mxu1  ;;  %v2222_v22 = vand.u32 2147483647, %v2190_v13 }
 0x2d4   : > { %v2477_v58 = vand.u32 2147483647, %v2445_v8  ;;  %v7093_v38 = vadd.f32 %v3881_v48, %v6967_v3  ;;  %v3883_v26 = vpop.f32.mrb[3].mxu1  ;;  %v1549_v11 = vand.u32 2147483647, %v1517_v24  ;;  %v3237_v51 = vmax.f32 %v3205_v47, 0.0 }
 0x2d5   : > { %v3267_v39 = vadd.f32 %v3235_v34, %v2979_v42  ;;  %v2254_v33 = vsub.f32 1.0, %v2222_v22 }
 0x2d6   : > { %v2509_v43 = vsub.f32 1.0, %v2477_v58  ;;  %v2835_v35 = vpop.permute.xlu1 %2834  ;;  %v7865_v58 = vld [vmem:[#allocation69_spill] sm:$0xff]  ;;  %v1581_v5 = vsub.f32 1.0, %v1549_v11 }
 0x2d7   : > { %v2884_v21 = vsub.f32 %v5654_v28, %v2835_v35  ;;  %4602 = vmatprep.mubr.f32.mxu1 %v3267_v39  ;;  %v3886_v50 = vpop.f32.mrb[4].mxu1  ;;  %v2886_v48 = vsub.f32 %v5654_v28, %v7865_v58  ;;  %v2286_v24 = vmax.f32 %v2254_v33, 0.0 }
 0x2d8   : > { %v2541_v14 = vmax.f32 %v2509_v43, 0.0  ;;  %v7099_v3 = vadd.f32 %v3886_v50, %v6971_v16  ;;  %v3888_v32 = vpop.f32.mrb[5].mxu1  ;;  %v3107_v43 = vpop.permute.xlu0 %3106 }
 0x2d9   : > { %v2916_v7 = vand.u32 2147483647, %v2884_v21  ;;  %v1837_v21 = vsub.f32 1.0, %v1805_v4  ;;  %v3143_v36 = vsub.f32 %v5654_v28, %v3107_v43  ;;  %v1613_v4 = vmax.f32 %v1581_v5, 0.0 }
 0x2da   : > { %v2840_v29 = vpop.permute.xlu1 %2839  ;;  %v2573_v41 = vadd.f32 %v2541_v14, %v2285_v40  ;;  %v2918_v14 = vand.u32 2147483647, %v2886_v48 }
 0x2db   : > { %v2948_v6 = vsub.f32 1.0, %v2916_v7  ;;  %v2885_v27 = vsub.f32 %v5654_v28, %v2840_v29  ;;  %v3891_v8 = vpop.f32.mrb[6].mxu1  ;;  %v3175_v47 = vand.u32 2147483647, %v3143_v36 }
 0x2dc   : > { %3859 = vmatprep.mubr.f32.mxu0 %v2573_v41  ;;  %v7107_v42 = vadd.f32 %v3891_v8, %v6975_v37  ;;  %v3893_v23 = vpop.f32.mrb[7].mxu1  ;;  %v1869_v41 = vmax.f32 %v1837_v21, 0.0 }
 0x2dd   : > { %v2980_v16 = vmax.f32 %v2948_v6, 0.0  ;;  %v2917_v34 = vand.u32 2147483647, %v2885_v27  ;;  %3860 = vmatmul.mubr.f32.gmra.mrb[10].mxu0 %v1900_v59  ;;  %v2950_v6 = vsub.f32 1.0, %v2918_v14 }
 0x2df   : > { %v2949_v2 = vsub.f32 1.0, %v2917_v34  ;;  %v2338_v26 = vpop.permute.xlu1 %2337  ;;  %v3268_v39 = vadd.f32 %v3236_v9, %v2980_v16  ;;  %v3896_v57 = vpop.f32.mrb[8].mxu1  ;;  %v7866_v9 = vld [vmem:[#allocation96_spill] sm:$0xff]  ;;  %v2191_v16 = vsub.f32 %v5654_v28, %v6564_v49  ;;  %v2982_v43 = vmax.f32 %v2950_v6, 0.0 }
 0x2e0   : > { %v2446_v35 = vsub.f32 %v5654_v28, %v2338_v26  ;;  %v7113_v37 = vadd.f32 %v3896_v57, %v6979_v15  ;;  %v3898_v40 = vpop.f32.mrb[9].mxu1  ;;  %v1774_v8 = vsub.f32 %v5654_v28, %v7866_v9  ;;  %v3207_v49 = vsub.f32 1.0, %v3175_v47 }
 0x2e1   : > { %v2981_v30 = vmax.f32 %v2949_v2, 0.0  ;;  %4603 = vmatmul.mubr.f32.gmra.mrb[74].mxu1 %v3268_v39  ;;  %v1901_v39 = vadd.f32 %v1869_v41, %v1613_v4 }
 0x2e2   : > { %v2478_v50 = vand.u32 2147483647, %v2446_v35  ;;  %v3111_v35 = vpop.permute.xlu0 %3110  ;;  %v1806_v21 = vand.u32 2147483647, %v1774_v8 }
 0x2e3   : > { %v3103_v7 = vpop.permute.xlu1 %3102  ;;  %v3269_v32 = vadd.f32 %v3237_v51, %v2981_v30  ;;  %v2223_v30 = vand.u32 2147483647, %v2191_v16 }
 0x2e4   : > { %v2510_v0 = vsub.f32 1.0, %v2478_v50  ;;  %v3142_v13 = vsub.f32 %v5654_v28, %v3103_v7  ;;  %v3901_v29 = vpop.f32.mrb[10].mxu1  ;;  %v3144_v50 = vsub.f32 %v5654_v28, %v3111_v35 }
 0x2e5   : > { %v7118_v25 = vadd.f32 %v3901_v29, %v6985_v54  ;;  %v3903_v15 = vpop.f32.mrb[11].mxu1  ;;  %4605 = vmatprep.mubr.f32.mxu1 %v3269_v32  ;;  %v7867_v54 = vld [vmem:[#allocation65_spill] sm:$0xff]  ;;  %v2255_v41 = vsub.f32 1.0, %v2223_v30 }
 0x2e6   : > { %v2542_v27 = vmax.f32 %v2510_v0, 0.0  ;;  %v3174_v59 = vand.u32 2147483647, %v3142_v13  ;;  %v1518_v48 = vsub.f32 %v5654_v28, %v7867_v54  ;;  %v1838_v0 = vsub.f32 1.0, %v1806_v21 }
 0x2e7   : > { %v3239_v13 = vmax.f32 %v3207_v49, 0.0 }
 0x2e8   : > { %v3206_v34 = vsub.f32 1.0, %v3174_v59  ;;  %v2850_v23 = vpop.permute.xlu1 %2849  ;;  %v3906_v22 = vpop.f32.mrb[12].mxu1  ;;  %v2574_v58 = vadd.f32 %v2542_v27, %v2286_v24  ;;  %v1550_v14 = vand.u32 2147483647, %v1518_v48  ;;  %v3176_v27 = vand.u32 2147483647, %v3144_v50 }
 0x2e9   : > { %v2887_v11 = vsub.f32 %v5654_v28, %v2850_v23  ;;  %v7128_v2 = vadd.f32 %v3906_v22, %v6992_v20  ;;  %v3908_v26 = vpop.f32.mrb[13].mxu1  ;;  %v1870_v47 = vmax.f32 %v1838_v0, 0.0 }
 0x2ea   : > { %v3238_v57 = vmax.f32 %v3206_v34, 0.0  ;;  %3864 = vmatprep.mubr.f32.mxu0 %v2574_v58  ;;  %v1582_v6 = vsub.f32 1.0, %v1550_v14  ;;  %v2287_v34 = vmax.f32 %v2255_v41, 0.0  ;;  %v3208_v54 = vsub.f32 1.0, %v3176_v27 }
 0x2eb   : > { %v2919_v51 = vand.u32 2147483647, %v2887_v11  ;;  %3865 = vmatmul.mubr.f32.gmra.mrb[12].mxu0 %v1901_v39 }
 0x2ec   : > { %v3911_v40 = vpop.f32.mrb[14].mxu1  ;;  %v3270_v33 = vadd.f32 %v3238_v57, %v2982_v43  ;;  %v1614_v58 = vmax.f32 %v1582_v6, 0.0  ;;  %v3240_v57 = vmax.f32 %v3208_v54, 0.0 }
 0x2ed   : > { %v2951_v5 = vsub.f32 1.0, %v2919_v51  ;;  %v7132_v20 = vadd.f32 %v3911_v40, %v6997_v19  ;;  %v2342_v36 = vpop.permute.xlu1 %2341  ;;  %v3913_v7 = vpop.f32.mrb[15].mxu1 }
 0x2ee   : > { %v2447_v32 = vsub.f32 %v5654_v28, %v2342_v36  ;;  %4606 = vmatmul.mubr.f32.gmra.mrb[76].mxu1 %v3270_v33  ;;  %v1902_v43 = vadd.f32 %v1870_v47, %v1614_v58 }
 0x2ef   : > { %v2983_v29 = vmax.f32 %v2951_v5, 0.0 }
 0x2f0   : > { %v2479_v15 = vand.u32 2147483647, %v2447_v32  ;;  %v3916_v24 = vpop.f32.mrb[16].mxu1 }
 0x2f1   : > { %v7136_v59 = vadd.f32 %v3916_v24, %v7001_v44  ;;  %v3918_v4 = vpop.f32.mrb[17].mxu1  ;;  %v3271_v9 = vadd.f32 %v3239_v13, %v2983_v29 }
 0x2f2   : > { %v2511_v19 = vsub.f32 1.0, %v2479_v15  ;;  %v2855_v8 = vpop.permute.xlu1 %2854 }
 0x2f3   : > { %v2888_v16 = vsub.f32 %v5654_v28, %v2855_v8  ;;  %4608 = vmatprep.mubr.f32.mxu1 %v3271_v9 }
 0x2f4   : > { %v2543_v23 = vmax.f32 %v2511_v19, 0.0  ;;  %v3921_v22 = vpop.f32.mrb[18].mxu1 }
 0x2f5   : > { %v2920_v48 = vand.u32 2147483647, %v2888_v16  ;;  %v7140_v11 = vadd.f32 %v3921_v22, %v7009_v53  ;;  %v3923_v26 = vpop.f32.mrb[19].mxu1 }
 0x2f6   : > { %v2575_v44 = vadd.f32 %v2543_v23, %v2287_v34 }
 0x2f7   : > { %v2952_v39 = vsub.f32 1.0, %v2920_v48 }
 0x2f8   : > { %3869 = vmatprep.mubr.f32.mxu0 %v2575_v44  ;;  %v3926_v35 = vpop.f32.mrb[20].mxu1 }
 0x2f9   : > { %v2984_v21 = vmax.f32 %v2952_v39, 0.0  ;;  %v7143_v28 = vadd.f32 %v3926_v35, %v7012_v46  ;;  %3870 = vmatmul.mubr.f32.gmra.mrb[14].mxu0 %v1902_v43  ;;  %v3928_v49 = vpop.f32.mrb[21].mxu1 }
 0x2fb   : > { %v3272_v51 = vadd.f32 %v3240_v57, %v2984_v21 }
 0x2fc   : > { %v3931_v30 = vpop.f32.mrb[22].mxu1 }
 0x2fd   : > { %v7146_v40 = vadd.f32 %v3931_v30, %v7016_v10  ;;  %v3933_v53 = vpop.f32.mrb[23].mxu1  ;;  %4609 = vmatmul.mubr.f32.gmra.mrb[78].mxu1 %v3272_v51 }
 0x300   : > { %v3936_v33 = vpop.f32.mrb[24].mxu1 }
 0x301   : > { %v7149_v14 = vadd.f32 %v3936_v33, %v7022_v56  ;;  %v3938_v50 = vpop.f32.mrb[25].mxu1 }
 0x304   : > { %v3941_v5 = vpop.f32.mrb[26].mxu1 }
 0x305   : > { %v7152_v36 = vadd.f32 %v3941_v5, %v7029_v61  ;;  %v3943_v46 = vpop.f32.mrb[27].mxu1 }
 0x308   : > { %v3946_v7 = vpop.f32.mrb[28].mxu1 }
 0x309   : > { %v7155_v32 = vadd.f32 %v3946_v7, %v7034_v31  ;;  %v3948_v0 = vpop.f32.mrb[29].mxu1 }
 0x30c   : > { %v3951_v13 = vpop.f32.mrb[30].mxu1 }
 0x30d   : > { %v7158_v10 = vadd.f32 %v3951_v13, %v7038_v1  ;;  %v3953_v29 = vpop.f32.mrb[31].mxu1 }
 0x310   : > { %v3956_v41 = vpop.f32.mrb[32].mxu1 }
 0x311   : > { %v7161_v56 = vadd.f32 %v3956_v41, %v7046_v52  ;;  %v3958_v15 = vpop.f32.mrb[33].mxu1 }
 0x314   : > { %v3961_v24 = vpop.f32.mrb[34].mxu1 }
 0x315   : > { %v7164_v61 = vadd.f32 %v3961_v24, %v7049_v17  ;;  %v3963_v6 = vpop.f32.mrb[35].mxu1 }
 0x318   : > { %v3966_v27 = vpop.f32.mrb[36].mxu1 }
 0x319   : > { %v7167_v31 = vadd.f32 %v3966_v27, %v7053_v60  ;;  %v3968_v4 = vpop.f32.mrb[37].mxu1 }
 0x31c   : > { %v3971_v9 = vpop.f32.mrb[38].mxu1 }
 0x31d   : > { %v7170_v1 = vadd.f32 %v3971_v9, %v7059_v55  ;;  %v3973_v19 = vpop.f32.mrb[39].mxu1 }
 0x320   : > { %v3976_v8 = vpop.f32.mrb[40].mxu1 }
 0x321   : > { %v7173_v52 = vadd.f32 %v3976_v8, %v7066_v63  ;;  %v3978_v47 = vpop.f32.mrb[41].mxu1 }
 0x324   : > { %v3981_v16 = vpop.f32.mrb[42].mxu1 }
 0x325   : > { %v7176_v17 = vadd.f32 %v3981_v16, %v7071_v62  ;;  %v3983_v34 = vpop.f32.mrb[43].mxu1 }
 0x328   : > { %v3986_v60 = vpop.f32.mrb[44].mxu1 }
 0x329   : > { %v7179_v23 = vadd.f32 %v3986_v60, %v7075_v18  ;;  %v3988_v22 = vpop.f32.mrb[45].mxu1 }
 0x32c   : > { %v3991_v55 = vpop.f32.mrb[46].mxu1 }
 0x32d   : > { %v7182_v58 = vadd.f32 %v3991_v55, %v7081_v45  ;;  %v3993_v54 = vpop.f32.mrb[47].mxu1 }
 0x330   : > { %v4565_v63 = vpop.f32.mrb[48].mxu1 }
 0x331   : > { %v4061_v48 = vpop.f32.mrb[49].mxu1 }
 0x334   : > { %v7184_v26 = vpop.f32.mrb[50].mxu1 }
 0x335   : > { %v4071_v44 = vpop.f32.mrb[51].mxu1 }
 0x338   : > { %v7186_v62 = vpop.f32.mrb[52].mxu1 }
 0x339   : > { %v7188_v39 = vpop.f32.mrb[53].mxu1 }
 0x33f   : > { %v7190_v43 = vpop.f32.mrb[54].mxu1 }
 0x340   : > { %v7192_v35 = vpop.f32.mrb[55].mxu1 }
 0x347   : > { %v4577_v18 = vpop.f32.mrb[56].mxu1 }
 0x348   : > { %v4107_v45 = vadd.f32 %v4577_v18, %v7093_v38  ;;  %v4101_v57 = vpop.f32.mrb[57].mxu1 }
 0x349   : > { %v4102_v21 = vadd.f32 %v4101_v57, %v7088_v12 }
 0x34a   : > { %4229 = vst [vmem:[%s7199_s25 + $0x48] sm:$0xff] %v4107_v45 }
 0x34b   : > { %4228 = vst [vmem:[%s7199_s25 + $0x40] sm:$0xff] %v4102_v21 }
 0x34f   : > { %v4580_v49 = vpop.f32.mrb[58].mxu1 }
 0x350   : > { %v4117_v51 = vadd.f32 %v4580_v49, %v7107_v42  ;;  %v4111_v30 = vpop.f32.mrb[59].mxu1 }
 0x351   : > { %v4112_v38 = vadd.f32 %v4111_v30, %v7099_v3 }
 0x352   : > { %4231 = vst [vmem:[%s7199_s25 + $0x58] sm:$0xff] %v4117_v51 }
 0x353   : > { %4230 = vst [vmem:[%s7199_s25 + $0x50] sm:$0xff] %v4112_v38 }
 0x357   : > { %v4583_v12 = vpop.f32.mrb[60].mxu1 }
 0x358   : > { %v4127_v53 = vadd.f32 %v4583_v12, %v7118_v25  ;;  %v4121_v33 = vpop.f32.mrb[61].mxu1 }
 0x359   : > { %v4122_v50 = vadd.f32 %v4121_v33, %v7113_v37 }
 0x35a   : > { %4233 = vst [vmem:[%s7199_s25 + $0x68] sm:$0xff] %v4127_v53 }
 0x35b   : > { %4232 = vst [vmem:[%s7199_s25 + $0x60] sm:$0xff] %v4122_v50 }
 0x35f   : > { %v4586_v5 = vpop.f32.mrb[62].mxu1 }
 0x360   : > { %v4137_v42 = vadd.f32 %v4586_v5, %v7132_v20  ;;  %v4131_v46 = vpop.f32.mrb[63].mxu1 }
 0x361   : > { %v4132_v7 = vadd.f32 %v4131_v46, %v7128_v2 }
 0x362   : > { %4235 = vst [vmem:[%s7199_s25 + $0x78] sm:$0xff] %v4137_v42 }
 0x363   : > { %4234 = vst [vmem:[%s7199_s25 + $0x70] sm:$0xff] %v4132_v7 }
 0x36a   : > { %v3836_v3 = vpop.f32.mrb[0].mxu0 }
 0x36b   : > { %v4062_v0 = vadd.f32 %v4061_v48, %v3836_v3  ;;  %v3838_v13 = vpop.f32.mrb[1].mxu0 }
 0x36d   : > { %4220 = vst [vmem:[%s7199_s25] sm:$0xff] %v4062_v0  ;;  %v4589_v37 = vpop.f32.mrb[64].mxu1 }
 0x36e   : > { %v4147_v25 = vadd.f32 %v4589_v37, %v7140_v11  ;;  %v4141_v29 = vpop.f32.mrb[65].mxu1 }
 0x36f   : > { %v4142_v41 = vadd.f32 %v4141_v29, %v7136_v59 }
 0x370   : > { %4237 = vst [vmem:[%s7199_s25 + $0x88] sm:$0xff] %v4147_v25 }
 0x371   : > { %4236 = vst [vmem:[%s7199_s25 + $0x80] sm:$0xff] %v4142_v41 }
 0x378   : > { %v3841_v20 = vpop.f32.mrb[2].mxu0 }
 0x379   : > { %v4067_v2 = vadd.f32 %v4565_v63, %v3841_v20  ;;  %v3843_v15 = vpop.f32.mrb[3].mxu0 }
 0x37b   : > { %4221 = vst [vmem:[%s7199_s25 + $0x8] sm:$0xff] %v4067_v2 }
 0x37c   : > { %v4592_v24 = vpop.f32.mrb[66].mxu1 }
 0x37d   : > { %v4157_v6 = vadd.f32 %v4592_v24, %v7146_v40  ;;  %v4151_v27 = vpop.f32.mrb[67].mxu1 }
 0x37e   : > { %v4152_v4 = vadd.f32 %v4151_v27, %v7143_v28 }
 0x37f   : > { %4239 = vst [vmem:[%s7199_s25 + $0x98] sm:$0xff] %v4157_v6 }
 0x380   : > { %4238 = vst [vmem:[%s7199_s25 + $0x90] sm:$0xff] %v4152_v4 }
 0x386   : > { %v3846_v11 = vpop.f32.mrb[4].mxu0 }
 0x387   : > { %v4072_v59 = vadd.f32 %v4071_v44, %v3846_v11  ;;  %v3848_v9 = vpop.f32.mrb[5].mxu0 }
 0x389   : > { %4222 = vst [vmem:[%s7199_s25 + $0x10] sm:$0xff] %v4072_v59  ;;  %v4595_v19 = vpop.f32.mrb[68].mxu1 }
 0x38a   : > { %v4167_v8 = vadd.f32 %v4595_v19, %v7152_v36  ;;  %v4161_v47 = vpop.f32.mrb[69].mxu1 }
 0x38b   : > { %v4162_v16 = vadd.f32 %v4161_v47, %v7149_v14 }
 0x38c   : > { %4241 = vst [vmem:[%s7199_s25 + $0xa8] sm:$0xff] %v4167_v8 }
 0x38d   : > { %4240 = vst [vmem:[%s7199_s25 + $0xa0] sm:$0xff] %v4162_v16 }
 0x394   : > { %v3851_v40 = vpop.f32.mrb[6].mxu0 }
 0x395   : > { %v4077_v28 = vadd.f32 %v7184_v26, %v3851_v40  ;;  %v3853_v34 = vpop.f32.mrb[7].mxu0 }
 0x397   : > { %4223 = vst [vmem:[%s7199_s25 + $0x18] sm:$0xff] %v4077_v28 }
 0x398   : > { %v4598_v60 = vpop.f32.mrb[70].mxu1 }
 0x399   : > { %v4177_v22 = vadd.f32 %v4598_v60, %v7158_v10  ;;  %v4171_v55 = vpop.f32.mrb[71].mxu1 }
 0x39a   : > { %v4172_v54 = vadd.f32 %v4171_v55, %v7155_v32 }
 0x39b   : > { %4243 = vst [vmem:[%s7199_s25 + $0xb8] sm:$0xff] %v4177_v22 }
 0x39c   : > { %4242 = vst [vmem:[%s7199_s25 + $0xb0] sm:$0xff] %v4172_v54 }
 0x3a2   : > { %v3856_v14 = vpop.f32.mrb[8].mxu0 }
 0x3a3   : > { %v4082_v36 = vadd.f32 %v7188_v39, %v3856_v14  ;;  %v3858_v63 = vpop.f32.mrb[9].mxu0 }
 0x3a5   : > { %4224 = vst [vmem:[%s7199_s25 + $0x20] sm:$0xff] %v4082_v36  ;;  %v4601_v48 = vpop.f32.mrb[72].mxu1 }
 0x3a6   : > { %v4187_v26 = vadd.f32 %v4601_v48, %v7164_v61  ;;  %v4181_v44 = vpop.f32.mrb[73].mxu1 }
 0x3a7   : > { %v4182_v18 = vadd.f32 %v4181_v44, %v7161_v56 }
 0x3a8   : > { %4245 = vst [vmem:[%s7199_s25 + $0xc8] sm:$0xff] %v4187_v26 }
 0x3a9   : > { %4244 = vst [vmem:[%s7199_s25 + $0xc0] sm:$0xff] %v4182_v18 }
 0x3b0   : > { %v3861_v32 = vpop.f32.mrb[10].mxu0 }
 0x3b1   : > { %v4087_v10 = vadd.f32 %v7186_v62, %v3861_v32  ;;  %v3863_v45 = vpop.f32.mrb[11].mxu0 }
 0x3b3   : > { %4225 = vst [vmem:[%s7199_s25 + $0x28] sm:$0xff] %v4087_v10 }
 0x3b4   : > { %v4604_v39 = vpop.f32.mrb[74].mxu1 }
 0x3b5   : > { %v4197_v57 = vadd.f32 %v4604_v39, %v7170_v1  ;;  %v4191_v21 = vpop.f32.mrb[75].mxu1 }
 0x3b6   : > { %v4192_v49 = vadd.f32 %v4191_v21, %v7167_v31 }
 0x3b7   : > { %4247 = vst [vmem:[%s7199_s25 + $0xd8] sm:$0xff] %v4197_v57 }
 0x3b8   : > { %4246 = vst [vmem:[%s7199_s25 + $0xd0] sm:$0xff] %v4192_v49 }
 0x3be   : > { %v3866_v56 = vpop.f32.mrb[12].mxu0 }
 0x3bf   : > { %v4092_v61 = vadd.f32 %v7192_v35, %v3866_v56  ;;  %v3868_v51 = vpop.f32.mrb[13].mxu0 }
 0x3c1   : > { %4226 = vst [vmem:[%s7199_s25 + $0x30] sm:$0xff] %v4092_v61  ;;  %v4607_v62 = vpop.f32.mrb[76].mxu1 }
 0x3c2   : > { %v4207_v30 = vadd.f32 %v4607_v62, %v7176_v17  ;;  %v4201_v38 = vpop.f32.mrb[77].mxu1 }
 0x3c3   : > { %v4202_v1 = vadd.f32 %v4201_v38, %v7173_v52 }
 0x3c4   : > { %4249 = vst [vmem:[%s7199_s25 + $0xe8] sm:$0xff] %v4207_v30 }
 0x3c5   : > { %4248 = vst [vmem:[%s7199_s25 + $0xe0] sm:$0xff] %v4202_v1 }
 0x3cc   : > { %v3871_v31 = vpop.f32.mrb[14].mxu0 }
 0x3cd   : > { %v4097_v12 = vadd.f32 %v7190_v43, %v3871_v31  ;;  %v3873_v53 = vpop.f32.mrb[15].mxu0 }
 0x3cf   : > { %4227 = vst [vmem:[%s7199_s25 + $0x38] sm:$0xff] %v4097_v12 }
 0x3d0   : > { %v4610_v35 = vpop.f32.mrb[78].mxu1 }
 0x3d1   : > { %v4217_v33 = vadd.f32 %v4610_v35, %v7182_v58  ;;  %v4211_v17 = vpop.f32.mrb[79].mxu1 }
 0x3d2   : > { %v4212_v52 = vadd.f32 %v4211_v17, %v7179_v23 }
 0x3d3   : > { %4251 = vst [vmem:[%s7199_s25 + $0xf8] sm:$0xff] %v4217_v33 }
 0x3d4   : > { %4250 = vst [vmem:[%s7199_s25 + $0xf0] sm:$0xff] %v4212_v52 }
 0x3d5   : > { %4934 = shalt.err (!%p4931_p7)
}
 0x3d6   : > { %s4935_s7 = scalar_lea.hbm %s7262_s30, 4096  ;;  %s4939_s16 = scalar_lea.hbm %s7314_s2, 8192 }
 0x3d7   : > { %p4936_p8 = scmp.ne.s32.totalorder %s7262_s30, %s4935_s7  ;;  %p4940_p1 = scmp.lt.u32.totalorder %s7262_s30, %s7314_s2 }
 0x3d8   : > { %p4941_p0 = scmp.lt.u32.totalorder %s4939_s16, %s4935_s7  ;;  %p4943_p6 = scmp.lt.u32.totalorder %s4935_s7, %s7262_s30 }
 0x3d9   : > { %p4937_p11 = pnand %p4936_p8, %p7868_p9 }
 0x3da   : > { %p4942_p5 = por %p4941_p0, %p4940_p1 }
 0x3db   : > { %p4938_p13 = pneg %p4937_p11 }
 0x3dc   : > { %p4944_p10 = por %p4943_p6, %p4942_p5 }
 0x3de   : > { %p4945_p12 = pnand %p4944_p10, %p4938_p13 }
 0x3e0   : > { %4948 = shalt.err (!%p4945_p12)
}
 0x3e1   : > { %s4996_s21 = smov 128   ;;  %s4997_s23 = smov 8  }
 0x3e2   : > { %4815 = dma.vmem_to_hbm [thread:$0]  (%p7868_p9), %s7264_s27, 4096, %s7262_s30, %s7271_s13, %s4996_s21, %s4996_s21, %s4997_s23  }
 0x3e3 PF: > { %p4827_p2 = scmp.ge.s32.totalorder %s4987_s12, 2  ;;  %s4281_s24 = sand.u32 1, %s4975_s9  }
 0x3e4   : > { %p7869_p3 = scmp.ne.s32.totalorder %s7438_s20, 0  ;;  %s4282_s25 = scalar_lea.sflag [#allocation5], %s4281_s24 }
 0x3e6   : > { %p4822_p4 = pnand %p4827_p2, %p7869_p3 }
 0x3e8   : > { %4970 = dma.done.wait (!%p4822_p4), %s4282_s25, 4096  }
 0x3e9   : > { %4972 = vsyncadd (!%p4822_p4), %s4282_s25, 4294963200  ;;  %p13_p7 = scmp.ge.s32.totalorder %s5038_s15, 4   ;;  %s7870_s9 = smov %s4979_s10 }
 0x3ea   : > { %s7871_s10 = smov %s4983_s11  ;;  %s7872_s11 = smov %s5049_s18 }
 0x3eb   : > { %s7873_s12 = smov %s5038_s15  ;;  %15 = sbr.rel (!%p13_p7) target bundleno = 4 (0x4), region = 68 }
 0x3f2   :  { %4287 = vsyncpa [#allocation4], 1 }
 0x3f3   :  { %4289 = vsyncpa [#allocation4 + $0x1], 1 }
 0x3f4   :  { %4290 = vsyncpa [#allocation5], 1 }
 0x3f5   :  { %4292 = vsyncpa [#allocation5 + $0x1], 1 }

</bundles_post_ra>
